<compile_context>
chip_gen: v6e
topology: v6e:2x2x1
jax: 0.10.0
libtpu: 0.0.40
codegen_flags: <defaults>
</compile_context>

<pallas_src>
import jax
import jax.numpy as jnp
from jax.experimental import pallas as pl
from jax.experimental.pallas import tpu as pltpu

KH, KW = 3, 3
C_OUT = 32
KPAD = 16                      # 9 taps zero-padded to 16 (aligned contraction dim)


def _vmem_capacity_bytes():
    """Physical VMEM per core; conservative fallback if the query is unavailable."""
    try:
        info = pltpu.get_tpu_info()
        cap = int(getattr(info, "vmem_capacity_bytes", 0))
        if cap > 0:
            return cap
    except Exception:
        pass
    return 64 * 1024 * 1024    # v7x floor; safe on every generation


def _num_tensorcores():
    """TensorCores per chip (2 on v7x); fallback 1 (v5e/v6e)."""
    try:
        dev = jax.devices()[0]
        for attr in ("num_cores", "core_count", "num_cores_per_chip"):
            val = getattr(dev, attr, None)
            if isinstance(val, int) and val > 0:
                return val
    except Exception:
        pass
    return 1


def _pick_batch_block(n, per_image_block_bytes, vmem_budget_bytes, num_cores):
    """Largest divisor of n whose (double-buffered) blocks fit the VMEM budget.
    The ">= num_cores grid steps" rule only applies on multi-TensorCore chips;
    on single-TC chips a single grid step is fine (saves ~0.35us/step)."""
    best = 1
    for nb in range(1, n + 1):
        if n % nb:
            continue
        if 2 * nb * per_image_block_bytes > vmem_budget_bytes:
            continue
        if num_cores > 1 and n >= num_cores and (n // nb) < num_cores:
            continue
        best = nb
    return best


def _round_up(x, m):
    return (x + m - 1) // m * m


def conv2d_3x3_pallas(x_nchw, weight, bias):
    """x_nchw: (N, 1, H, W) f32; weight: (32, 1, 3, 3) f32; bias: (32,) f32.
    Returns (N, 32, H-2, W-2) f32, matching torch.nn.Conv2d(1, 32, 3, 1)."""
    N, C_in, H, W = x_nchw.shape
    assert C_in == 1
    Ho, Wo = H - KH + 1, W - KW + 1
    HWo = Ho * Wo

    # Free, contiguous relayouts (no slice/copy passes over the input).
    x = x_nchw.reshape(N, H, W)
    w2d = jnp.pad(weight.reshape(C_OUT, KH * KW),
                  ((0, 0), (0, KPAD - KH * KW)))          # (32, 16), cols 9..15 = 0
    b2d = bias.reshape(C_OUT, 1)                          # (32, 1)

    # Padded ((8,128)-tiled) VMEM footprint per image, per pipeline buffer.
    in_bytes = _round_up(H, 8) * _round_up(W, 128) * 4
    out_bytes = _round_up(C_OUT, 8) * _round_up(HWo, 128) * 4
    per_image = in_bytes + out_bytes

    vmem_cap = _vmem_capacity_bytes()
    vmem_limit = min(int(0.75 * vmem_cap), 96 * 1024 * 1024)
    NB = _pick_batch_block(N, per_image, vmem_limit // 2, _num_tensorcores())
    grid = (N // NB,)

    def kernel(x_ref, w_ref, b_ref, o_ref, pt_ref):
        # x_ref : (NB, H, W)        VMEM
        # w_ref : (32, KPAD)        VMEM  (column t = dy*3 + dx, cols >= 9 zero)
        # b_ref : (32, 1)           VMEM
        # o_ref : (NB, 32, Ho*Wo)   VMEM  (lane-dense, NCHW-compatible layout)
        # pt_ref: (KPAD, Ho*Wo)     VMEM scratch (im2col matrix, rebuilt per image)
        pt_ref[...] = jnp.zeros_like(pt_ref)   # keep the zero-padded rows 9..15 clean
        w = w_ref[...]
        b = b_ref[...]
        for i in range(NB):
            # Build the im2col matrix for image i: row t = dy*3+dx holds the
            # flattened (Ho*Wo) shifted patch. Only these 9*Ho small copies touch
            # partial lanes; all compute and stores below are lane-dense.
            for dy in range(KH):
                for dx in range(KW):
                    t = dy * KW + dx
                    for y in range(Ho):
                        pt_ref[pl.ds(t, 1), pl.ds(y * Wo, Wo)] = (
                            x_ref[i, pl.ds(dy + y, 1), pl.ds(dx, Wo)])
            # One MXU matmul per image: (32, 16) @ (16, Ho*Wo) -> (32, Ho*Wo).
            acc = jnp.dot(w, pt_ref[...], preferred_element_type=jnp.float32)
            o_ref[i] = acc + b

    out_flat = pl.pallas_call(
        kernel,
        out_shape=jax.ShapeDtypeStruct((N, C_OUT, HWo), jnp.float32),
        grid_spec=pltpu.PrefetchScalarGridSpec(
            num_scalar_prefetch=0,
            grid=grid,
            in_specs=[
                pl.BlockSpec((NB, H, W), lambda n: (n, 0, 0)),
                pl.BlockSpec((C_OUT, KPAD), lambda n: (0, 0)),
                pl.BlockSpec((C_OUT, 1), lambda n: (0, 0)),
            ],
            out_specs=pl.BlockSpec((NB, C_OUT, HWo), lambda n: (n, 0, 0)),
            scratch_shapes=[pltpu.VMEM((KPAD, HWo), jnp.float32)],
        ),
        compiler_params=pltpu.CompilerParams(
            dimension_semantics=("parallel",),
            vmem_limit_bytes=vmem_limit,
        ),
    )(x, w2d, b2d)

    # Contiguous (free) reshape back to NCHW.
    return out_flat.reshape(N, C_OUT, Ho, Wo)


def _reference_conv(x_nchw, weight, bias):
    # Exact f32 elementwise reference (avoids XLA conv default-precision ambiguity).
    N, _, H, W = x_nchw.shape
    Ho, Wo = H - KH + 1, W - KW + 1
    x = x_nchw.reshape(N, H, W)
    out = jnp.zeros((N, C_OUT, Ho, Wo), jnp.float32)
    for dy in range(KH):
        for dx in range(KW):
            patch = x[:, dy:dy + Ho, dx:dx + Wo]                  # (N, Ho, Wo)
            out = out + patch[:, None, :, :] * weight[:, 0, dy, dx][None, :, None, None]
    return out + bias.reshape(1, C_OUT, 1, 1)


if __name__ == "__main__":
    key = jax.random.PRNGKey(0)
    k_x, k_w, k_b = jax.random.split(key, 3)

    # Small shapes consistent with Conv2d(1, 32, 3, 1): batch=2, 1 channel, 16x16.
    N, H, W = 2, 16, 16
    x = jax.random.normal(k_x, (N, 1, H, W), dtype=jnp.float32)

    # PyTorch-style init: U(-1/sqrt(fan_in), 1/sqrt(fan_in)), fan_in = 1*3*3 = 9.
    bound = 1.0 / jnp.sqrt(9.0)
    weight = jax.random.uniform(k_w, (C_OUT, 1, KH, KW), jnp.float32, -bound, bound)
    bias = jax.random.uniform(k_b, (C_OUT,), jnp.float32, -bound, bound)

    out = conv2d_3x3_pallas(x, weight, bias)
    out = jax.block_until_ready(out)

    ref = _reference_conv(x, weight, bias)
    assert out.shape == (N, C_OUT, H - 2, W - 2), out.shape
    # Tolerance covers MXU f32 pass-decomposition differences across TPU generations.
    assert jnp.allclose(out, ref, atol=5e-3, rtol=1e-3), "mismatch vs reference conv"

    print("KERNEL_OK")
</pallas_src>

<mosaic_0001>
module attributes {stable_mosaic.version = 11 : i64} {
  func.func @kernel(%arg0: i32, %arg1: memref<2x16x16xf32, #tpu.memory_space<vmem>>, %arg2: memref<32x16xf32, #tpu.memory_space<vmem>>, %arg3: memref<32x1xf32, #tpu.memory_space<vmem>>, %arg4: memref<2x32x196xf32, #tpu.memory_space<vmem>>, %arg5: memref<16x196xf32, #tpu.memory_space<vmem>>) attributes {dimension_semantics = [#tpu.dimension_semantics<parallel>], iteration_bounds = array<i64: 1>, scalar_prefetch = 0 : i64, scratch_operands = 1 : i64, tpu.core_type = #tpu.core_type<tc>, window_params = [{transform_indices = @transform_0, window_bounds = array<i64: 2, 16, 16>}, {pipeline_mode = #tpu.pipeline_mode<synchronous>, transform_indices = @transform_1, window_bounds = array<i64: 32, 16>}, {pipeline_mode = #tpu.pipeline_mode<synchronous>, transform_indices = @transform_2, window_bounds = array<i64: 32, 1>}, {transform_indices = @transform_3, window_bounds = array<i64: 2, 32, 196>}]} {
    %cst = arith.constant 0.000000e+00 : f32
    %0 = vector.broadcast %cst : f32 to vector<16x196xf32>
    %c0 = arith.constant 0 : index
    %c0_0 = arith.constant 0 : index
    %1 = vector.load %arg5[%c0, %c0_0] : memref<16x196xf32, #tpu.memory_space<vmem>>, vector<16x196xf32>
    tpu.vector_store %arg5[%c0, %c0_0], %0 {strides = array<i32>} : memref<16x196xf32, #tpu.memory_space<vmem>>, vector<16x196xf32>,
    %c0_1 = arith.constant 0 : index
    %c0_2 = arith.constant 0 : index
    %2 = vector.load %arg2[%c0_1, %c0_2] : memref<32x16xf32, #tpu.memory_space<vmem>>, vector<32x16xf32>
    %c0_3 = arith.constant 0 : index
    %c0_4 = arith.constant 0 : index
    %3 = vector.load %arg3[%c0_3, %c0_4] : memref<32x1xf32, #tpu.memory_space<vmem>>, vector<32x1xf32>
    %c0_5 = arith.constant 0 : index
    %c0_6 = arith.constant 0 : index
    %c0_7 = arith.constant 0 : index
    %4 = vector.load %arg1[%c0_5, %c0_6, %c0_7] : memref<2x16x16xf32, #tpu.memory_space<vmem>>, vector<1x1x14xf32>
    %5 = vector.shape_cast %4 : vector<1x1x14xf32> to vector<1x14xf32>
    %c0_8 = arith.constant 0 : index
    %c0_9 = arith.constant 0 : index
    %6 = vector.load %arg5[%c0_8, %c0_9] : memref<16x196xf32, #tpu.memory_space<vmem>>, vector<1x14xf32>
    tpu.vector_store %arg5[%c0_8, %c0_9], %5 {strides = array<i32>} : memref<16x196xf32, #tpu.memory_space<vmem>>, vector<1x14xf32>,
    %c0_10 = arith.constant 0 : index
    %c1 = arith.constant 1 : index
    %c0_11 = arith.constant 0 : index
    %7 = vector.load %arg1[%c0_10, %c1, %c0_11] : memref<2x16x16xf32, #tpu.memory_space<vmem>>, vector<1x1x14xf32>
    %8 = vector.shape_cast %7 : vector<1x1x14xf32> to vector<1x14xf32>
    %c0_12 = arith.constant 0 : index
    %c14 = arith.constant 14 : index
    %9 = vector.load %arg5[%c0_12, %c14] : memref<16x196xf32, #tpu.memory_space<vmem>>, vector<1x14xf32>
    tpu.vector_store %arg5[%c0_12, %c14], %8 {strides = array<i32>} : memref<16x196xf32, #tpu.memory_space<vmem>>, vector<1x14xf32>,
    %c0_13 = arith.constant 0 : index
    %c2 = arith.constant 2 : index
    %c0_14 = arith.constant 0 : index
    %10 = vector.load %arg1[%c0_13, %c2, %c0_14] : memref<2x16x16xf32, #tpu.memory_space<vmem>>, vector<1x1x14xf32>
    %11 = vector.shape_cast %10 : vector<1x1x14xf32> to vector<1x14xf32>
    %c0_15 = arith.constant 0 : index
    %c28 = arith.constant 28 : index
    %12 = vector.load %arg5[%c0_15, %c28] : memref<16x196xf32, #tpu.memory_space<vmem>>, vector<1x14xf32>
    tpu.vector_store %arg5[%c0_15, %c28], %11 {strides = array<i32>} : memref<16x196xf32, #tpu.memory_space<vmem>>, vector<1x14xf32>,
    %c0_16 = arith.constant 0 : index
    %c3 = arith.constant 3 : index
    %c0_17 = arith.constant 0 : index
    %13 = vector.load %arg1[%c0_16, %c3, %c0_17] : memref<2x16x16xf32, #tpu.memory_space<vmem>>, vector<1x1x14xf32>
    %14 = vector.shape_cast %13 : vector<1x1x14xf32> to vector<1x14xf32>
    %c0_18 = arith.constant 0 : index
    %c42 = arith.constant 42 : index
    %15 = vector.load %arg5[%c0_18, %c42] : memref<16x196xf32, #tpu.memory_space<vmem>>, vector<1x14xf32>
    tpu.vector_store %arg5[%c0_18, %c42], %14 {strides = array<i32>} : memref<16x196xf32, #tpu.memory_space<vmem>>, vector<1x14xf32>,
    %c0_19 = arith.constant 0 : index
    %c4 = arith.constant 4 : index
    %c0_20 = arith.constant 0 : index
    %16 = vector.load %arg1[%c0_19, %c4, %c0_20] : memref<2x16x16xf32, #tpu.memory_space<vmem>>, vector<1x1x14xf32>
    %17 = vector.shape_cast %16 : vector<1x1x14xf32> to vector<1x14xf32>
    %c0_21 = arith.constant 0 : index
    %c56 = arith.constant 56 : index
    %18 = vector.load %arg5[%c0_21, %c56] : memref<16x196xf32, #tpu.memory_space<vmem>>, vector<1x14xf32>
    tpu.vector_store %arg5[%c0_21, %c56], %17 {strides = array<i32>} : memref<16x196xf32, #tpu.memory_space<vmem>>, vector<1x14xf32>,
    %c0_22 = arith.constant 0 : index
    %c5 = arith.constant 5 : index
    %c0_23 = arith.constant 0 : index
    %19 = vector.load %arg1[%c0_22, %c5, %c0_23] : memref<2x16x16xf32, #tpu.memory_space<vmem>>, vector<1x1x14xf32>
    %20 = vector.shape_cast %19 : vector<1x1x14xf32> to vector<1x14xf32>
    %c0_24 = arith.constant 0 : index
    %c70 = arith.constant 70 : index
    %21 = vector.load %arg5[%c0_24, %c70] : memref<16x196xf32, #tpu.memory_space<vmem>>, vector<1x14xf32>
    tpu.vector_store %arg5[%c0_24, %c70], %20 {strides = array<i32>} : memref<16x196xf32, #tpu.memory_space<vmem>>, vector<1x14xf32>,
    %c0_25 = arith.constant 0 : index
    %c6 = arith.constant 6 : index
    %c0_26 = arith.constant 0 : index
    %22 = vector.load %arg1[%c0_25, %c6, %c0_26] : memref<2x16x16xf32, #tpu.memory_space<vmem>>, vector<1x1x14xf32>
    %23 = vector.shape_cast %22 : vector<1x1x14xf32> to vector<1x14xf32>
    %c0_27 = arith.constant 0 : index
    %c84 = arith.constant 84 : index
    %24 = vector.load %arg5[%c0_27, %c84] : memref<16x196xf32, #tpu.memory_space<vmem>>, vector<1x14xf32>
    tpu.vector_store %arg5[%c0_27, %c84], %23 {strides = array<i32>} : memref<16x196xf32, #tpu.memory_space<vmem>>, vector<1x14xf32>,
    %c0_28 = arith.constant 0 : index
    %c7 = arith.constant 7 : index
    %c0_29 = arith.constant 0 : index
    %25 = vector.load %arg1[%c0_28, %c7, %c0_29] : memref<2x16x16xf32, #tpu.memory_space<vmem>>, vector<1x1x14xf32>
    %26 = vector.shape_cast %25 : vector<1x1x14xf32> to vector<1x14xf32>
    %c0_30 = arith.constant 0 : index
    %c98 = arith.constant 98 : index
    %27 = vector.load %arg5[%c0_30, %c98] : memref<16x196xf32, #tpu.memory_space<vmem>>, vector<1x14xf32>
    tpu.vector_store %arg5[%c0_30, %c98], %26 {strides = array<i32>} : memref<16x196xf32, #tpu.memory_space<vmem>>, vector<1x14xf32>,
    %c0_31 = arith.constant 0 : index
    %c8 = arith.constant 8 : index
    %c0_32 = arith.constant 0 : index
    %28 = vector.load %arg1[%c0_31, %c8, %c0_32] : memref<2x16x16xf32, #tpu.memory_space<vmem>>, vector<1x1x14xf32>
    %29 = vector.shape_cast %28 : vector<1x1x14xf32> to vector<1x14xf32>
    %c0_33 = arith.constant 0 : index
    %c112 = arith.constant 112 : index
    %30 = vector.load %arg5[%c0_33, %c112] : memref<16x196xf32, #tpu.memory_space<vmem>>, vector<1x14xf32>
    tpu.vector_store %arg5[%c0_33, %c112], %29 {strides = array<i32>} : memref<16x196xf32, #tpu.memory_space<vmem>>, vector<1x14xf32>,
    %c0_34 = arith.constant 0 : index
    %c9 = arith.constant 9 : index
    %c0_35 = arith.constant 0 : index
    %31 = vector.load %arg1[%c0_34, %c9, %c0_35] : memref<2x16x16xf32, #tpu.memory_space<vmem>>, vector<1x1x14xf32>
    %32 = vector.shape_cast %31 : vector<1x1x14xf32> to vector<1x14xf32>
    %c0_36 = arith.constant 0 : index
    %c126 = arith.constant 126 : index
    %33 = vector.load %arg5[%c0_36, %c126] : memref<16x196xf32, #tpu.memory_space<vmem>>, vector<1x14xf32>
    tpu.vector_store %arg5[%c0_36, %c126], %32 {strides = array<i32>} : memref<16x196xf32, #tpu.memory_space<vmem>>, vector<1x14xf32>,
    %c0_37 = arith.constant 0 : index
    %c10 = arith.constant 10 : index
    %c0_38 = arith.constant 0 : index
    %34 = vector.load %arg1[%c0_37, %c10, %c0_38] : memref<2x16x16xf32, #tpu.memory_space<vmem>>, vector<1x1x14xf32>
    %35 = vector.shape_cast %34 : vector<1x1x14xf32> to vector<1x14xf32>
    %c0_39 = arith.constant 0 : index
    %c140 = arith.constant 140 : index
    %36 = vector.load %arg5[%c0_39, %c140] : memref<16x196xf32, #tpu.memory_space<vmem>>, vector<1x14xf32>
    tpu.vector_store %arg5[%c0_39, %c140], %35 {strides = array<i32>} : memref<16x196xf32, #tpu.memory_space<vmem>>, vector<1x14xf32>,
    %c0_40 = arith.constant 0 : index
    %c11 = arith.constant 11 : index
    %c0_41 = arith.constant 0 : index
    %37 = vector.load %arg1[%c0_40, %c11, %c0_41] : memref<2x16x16xf32, #tpu.memory_space<vmem>>, vector<1x1x14xf32>
    %38 = vector.shape_cast %37 : vector<1x1x14xf32> to vector<1x14xf32>
    %c0_42 = arith.constant 0 : index
    %c154 = arith.constant 154 : index
    %39 = vector.load %arg5[%c0_42, %c154] : memref<16x196xf32, #tpu.memory_space<vmem>>, vector<1x14xf32>
    tpu.vector_store %arg5[%c0_42, %c154], %38 {strides = array<i32>} : memref<16x196xf32, #tpu.memory_space<vmem>>, vector<1x14xf32>,
    %c0_43 = arith.constant 0 : index
    %c12 = arith.constant 12 : index
    %c0_44 = arith.constant 0 : index
    %40 = vector.load %arg1[%c0_43, %c12, %c0_44] : memref<2x16x16xf32, #tpu.memory_space<vmem>>, vector<1x1x14xf32>
    %41 = vector.shape_cast %40 : vector<1x1x14xf32> to vector<1x14xf32>
    %c0_45 = arith.constant 0 : index
    %c168 = arith.constant 168 : index
    %42 = vector.load %arg5[%c0_45, %c168] : memref<16x196xf32, #tpu.memory_space<vmem>>, vector<1x14xf32>
    tpu.vector_store %arg5[%c0_45, %c168], %41 {strides = array<i32>} : memref<16x196xf32, #tpu.memory_space<vmem>>, vector<1x14xf32>,
    %c0_46 = arith.constant 0 : index
    %c13 = arith.constant 13 : index
    %c0_47 = arith.constant 0 : index
    %43 = vector.load %arg1[%c0_46, %c13, %c0_47] : memref<2x16x16xf32, #tpu.memory_space<vmem>>, vector<1x1x14xf32>
    %44 = vector.shape_cast %43 : vector<1x1x14xf32> to vector<1x14xf32>
    %c0_48 = arith.constant 0 : index
    %c182 = arith.constant 182 : index
    %45 = vector.load %arg5[%c0_48, %c182] : memref<16x196xf32, #tpu.memory_space<vmem>>, vector<1x14xf32>
    tpu.vector_store %arg5[%c0_48, %c182], %44 {strides = array<i32>} : memref<16x196xf32, #tpu.memory_space<vmem>>, vector<1x14xf32>,
    %c0_49 = arith.constant 0 : index
    %c0_50 = arith.constant 0 : index
    %c1_51 = arith.constant 1 : index
    %46 = vector.load %arg1[%c0_49, %c0_50, %c1_51] : memref<2x16x16xf32, #tpu.memory_space<vmem>>, vector<1x1x14xf32>
    %47 = vector.shape_cast %46 : vector<1x1x14xf32> to vector<1x14xf32>
    %c1_52 = arith.constant 1 : index
    %c0_53 = arith.constant 0 : index
    %48 = vector.load %arg5[%c1_52, %c0_53] : memref<16x196xf32, #tpu.memory_space<vmem>>, vector<1x14xf32>
    tpu.vector_store %arg5[%c1_52, %c0_53], %47 {strides = array<i32>} : memref<16x196xf32, #tpu.memory_space<vmem>>, vector<1x14xf32>,
    %c0_54 = arith.constant 0 : index
    %c1_55 = arith.constant 1 : index
    %c1_56 = arith.constant 1 : index
    %49 = vector.load %arg1[%c0_54, %c1_55, %c1_56] : memref<2x16x16xf32, #tpu.memory_space<vmem>>, vector<1x1x14xf32>
    %50 = vector.shape_cast %49 : vector<1x1x14xf32> to vector<1x14xf32>
    %c1_57 = arith.constant 1 : index
    %c14_58 = arith.constant 14 : index
    %51 = vector.load %arg5[%c1_57, %c14_58] : memref<16x196xf32, #tpu.memory_space<vmem>>, vector<1x14xf32>
    tpu.vector_store %arg5[%c1_57, %c14_58], %50 {strides = array<i32>} : memref<16x196xf32, #tpu.memory_space<vmem>>, vector<1x14xf32>,
    %c0_59 = arith.constant 0 : index
    %c2_60 = arith.constant 2 : index
    %c1_61 = arith.constant 1 : index
    %52 = vector.load %arg1[%c0_59, %c2_60, %c1_61] : memref<2x16x16xf32, #tpu.memory_space<vmem>>, vector<1x1x14xf32>
    %53 = vector.shape_cast %52 : vector<1x1x14xf32> to vector<1x14xf32>
    %c1_62 = arith.constant 1 : index
    %c28_63 = arith.constant 28 : index
    %54 = vector.load %arg5[%c1_62, %c28_63] : memref<16x196xf32, #tpu.memory_space<vmem>>, vector<1x14xf32>
    tpu.vector_store %arg5[%c1_62, %c28_63], %53 {strides = array<i32>} : memref<16x196xf32, #tpu.memory_space<vmem>>, vector<1x14xf32>,
    %c0_64 = arith.constant 0 : index
    %c3_65 = arith.constant 3 : index
    %c1_66 = arith.constant 1 : index
    %55 = vector.load %arg1[%c0_64, %c3_65, %c1_66] : memref<2x16x16xf32, #tpu.memory_space<vmem>>, vector<1x1x14xf32>
    %56 = vector.shape_cast %55 : vector<1x1x14xf32> to vector<1x14xf32>
    %c1_67 = arith.constant 1 : index
    %c42_68 = arith.constant 42 : index
    %57 = vector.load %arg5[%c1_67, %c42_68] : memref<16x196xf32, #tpu.memory_space<vmem>>, vector<1x14xf32>
    tpu.vector_store %arg5[%c1_67, %c42_68], %56 {strides = array<i32>} : memref<16x196xf32, #tpu.memory_space<vmem>>, vector<1x14xf32>,
    %c0_69 = arith.constant 0 : index
    %c4_70 = arith.constant 4 : index
    %c1_71 = arith.constant 1 : index
    %58 = vector.load %arg1[%c0_69, %c4_70, %c1_71] : memref<2x16x16xf32, #tpu.memory_space<vmem>>, vector<1x1x14xf32>
    %59 = vector.shape_cast %58 : vector<1x1x14xf32> to vector<1x14xf32>
    %c1_72 = arith.constant 1 : index
    %c56_73 = arith.constant 56 : index
    %60 = vector.load %arg5[%c1_72, %c56_73] : memref<16x196xf32, #tpu.memory_space<vmem>>, vector<1x14xf32>
    tpu.vector_store %arg5[%c1_72, %c56_73], %59 {strides = array<i32>} : memref<16x196xf32, #tpu.memory_space<vmem>>, vector<1x14xf32>,
    %c0_74 = arith.constant 0 : index
    %c5_75 = arith.constant 5 : index
    %c1_76 = arith.constant 1 : index
    %61 = vector.load %arg1[%c0_74, %c5_75, %c1_76] : memref<2x16x16xf32, #tpu.memory_space<vmem>>, vector<1x1x14xf32>
    %62 = vector.shape_cast %61 : vector<1x1x14xf32> to vector<1x14xf32>
    %c1_77 = arith.constant 1 : index
    %c70_78 = arith.constant 70 : index
    %63 = vector.load %arg5[%c1_77, %c70_78] : memref<16x196xf32, #tpu.memory_space<vmem>>, vector<1x14xf32>
    tpu.vector_store %arg5[%c1_77, %c70_78], %62 {strides = array<i32>} : memref<16x196xf32, #tpu.memory_space<vmem>>, vector<1x14xf32>,
    %c0_79 = arith.constant 0 : index
    %c6_80 = arith.constant 6 : index
    %c1_81 = arith.constant 1 : index
    %64 = vector.load %arg1[%c0_79, %c6_80, %c1_81] : memref<2x16x16xf32, #tpu.memory_space<vmem>>, vector<1x1x14xf32>
    %65 = vector.shape_cast %64 : vector<1x1x14xf32> to vector<1x14xf32>
    %c1_82 = arith.constant 1 : index
    %c84_83 = arith.constant 84 : index
    %66 = vector.load %arg5[%c1_82, %c84_83] : memref<16x196xf32, #tpu.memory_space<vmem>>, vector<1x14xf32>
    tpu.vector_store %arg5[%c1_82, %c84_83], %65 {strides = array<i32>} : memref<16x196xf32, #tpu.memory_space<vmem>>, vector<1x14xf32>,
    %c0_84 = arith.constant 0 : index
    %c7_85 = arith.constant 7 : index
    %c1_86 = arith.constant 1 : index
    %67 = vector.load %arg1[%c0_84, %c7_85, %c1_86] : memref<2x16x16xf32, #tpu.memory_space<vmem>>, vector<1x1x14xf32>
    %68 = vector.shape_cast %67 : vector<1x1x14xf32> to vector<1x14xf32>
    %c1_87 = arith.constant 1 : index
    %c98_88 = arith.constant 98 : index
    %69 = vector.load %arg5[%c1_87, %c98_88] : memref<16x196xf32, #tpu.memory_space<vmem>>, vector<1x14xf32>
    tpu.vector_store %arg5[%c1_87, %c98_88], %68 {strides = array<i32>} : memref<16x196xf32, #tpu.memory_space<vmem>>, vector<1x14xf32>,
    %c0_89 = arith.constant 0 : index
    %c8_90 = arith.constant 8 : index
    %c1_91 = arith.constant 1 : index
    %70 = vector.load %arg1[%c0_89, %c8_90, %c1_91] : memref<2x16x16xf32, #tpu.memory_space<vmem>>, vector<1x1x14xf32>
    %71 = vector.shape_cast %70 : vector<1x1x14xf32> to vector<1x14xf32>
    %c1_92 = arith.constant 1 : index
    %c112_93 = arith.constant 112 : index
    %72 = vector.load %arg5[%c1_92, %c112_93] : memref<16x196xf32, #tpu.memory_space<vmem>>, vector<1x14xf32>
    tpu.vector_store %arg5[%c1_92, %c112_93], %71 {strides = array<i32>} : memref<16x196xf32, #tpu.memory_space<vmem>>, vector<1x14xf32>,
    %c0_94 = arith.constant 0 : index
    %c9_95 = arith.constant 9 : index
    %c1_96 = arith.constant 1 : index
    %73 = vector.load %arg1[%c0_94, %c9_95, %c1_96] : memref<2x16x16xf32, #tpu.memory_space<vmem>>, vector<1x1x14xf32>
    %74 = vector.shape_cast %73 : vector<1x1x14xf32> to vector<1x14xf32>
    %c1_97 = arith.constant 1 : index
    %c126_98 = arith.constant 126 : index
    %75 = vector.load %arg5[%c1_97, %c126_98] : memref<16x196xf32, #tpu.memory_space<vmem>>, vector<1x14xf32>
    tpu.vector_store %arg5[%c1_97, %c126_98], %74 {strides = array<i32>} : memref<16x196xf32, #tpu.memory_space<vmem>>, vector<1x14xf32>,
    %c0_99 = arith.constant 0 : index
    %c10_100 = arith.constant 10 : index
    %c1_101 = arith.constant 1 : index
    %76 = vector.load %arg1[%c0_99, %c10_100, %c1_101] : memref<2x16x16xf32, #tpu.memory_space<vmem>>, vector<1x1x14xf32>
    %77 = vector.shape_cast %76 : vector<1x1x14xf32> to vector<1x14xf32>
    %c1_102 = arith.constant 1 : index
    %c140_103 = arith.constant 140 : index
    %78 = vector.load %arg5[%c1_102, %c140_103] : memref<16x196xf32, #tpu.memory_space<vmem>>, vector<1x14xf32>
    tpu.vector_store %arg5[%c1_102, %c140_103], %77 {strides = array<i32>} : memref<16x196xf32, #tpu.memory_space<vmem>>, vector<1x14xf32>,
    %c0_104 = arith.constant 0 : index
    %c11_105 = arith.constant 11 : index
    %c1_106 = arith.constant 1 : index
    %79 = vector.load %arg1[%c0_104, %c11_105, %c1_106] : memref<2x16x16xf32, #tpu.memory_space<vmem>>, vector<1x1x14xf32>
    %80 = vector.shape_cast %79 : vector<1x1x14xf32> to vector<1x14xf32>
    %c1_107 = arith.constant 1 : index
    %c154_108 = arith.constant 154 : index
    %81 = vector.load %arg5[%c1_107, %c154_108] : memref<16x196xf32, #tpu.memory_space<vmem>>, vector<1x14xf32>
    tpu.vector_store %arg5[%c1_107, %c154_108], %80 {strides = array<i32>} : memref<16x196xf32, #tpu.memory_space<vmem>>, vector<1x14xf32>,
    %c0_109 = arith.constant 0 : index
    %c12_110 = arith.constant 12 : index
    %c1_111 = arith.constant 1 : index
    %82 = vector.load %arg1[%c0_109, %c12_110, %c1_111] : memref<2x16x16xf32, #tpu.memory_space<vmem>>, vector<1x1x14xf32>
    %83 = vector.shape_cast %82 : vector<1x1x14xf32> to vector<1x14xf32>
    %c1_112 = arith.constant 1 : index
    %c168_113 = arith.constant 168 : index
    %84 = vector.load %arg5[%c1_112, %c168_113] : memref<16x196xf32, #tpu.memory_space<vmem>>, vector<1x14xf32>
    tpu.vector_store %arg5[%c1_112, %c168_113], %83 {strides = array<i32>} : memref<16x196xf32, #tpu.memory_space<vmem>>, vector<1x14xf32>,
    %c0_114 = arith.constant 0 : index
    %c13_115 = arith.constant 13 : index
    %c1_116 = arith.constant 1 : index
    %85 = vector.load %arg1[%c0_114, %c13_115, %c1_116] : memref<2x16x16xf32, #tpu.memory_space<vmem>>, vector<1x1x14xf32>
    %86 = vector.shape_cast %85 : vector<1x1x14xf32> to vector<1x14xf32>
    %c1_117 = arith.constant 1 : index
    %c182_118 = arith.constant 182 : index
    %87 = vector.load %arg5[%c1_117, %c182_118] : memref<16x196xf32, #tpu.memory_space<vmem>>, vector<1x14xf32>
    tpu.vector_store %arg5[%c1_117, %c182_118], %86 {strides = array<i32>} : memref<16x196xf32, #tpu.memory_space<vmem>>, vector<1x14xf32>,
    %c0_119 = arith.constant 0 : index
    %c0_120 = arith.constant 0 : index
    %c2_121 = arith.constant 2 : index
    %88 = vector.load %arg1[%c0_119, %c0_120, %c2_121] : memref<2x16x16xf32, #tpu.memory_space<vmem>>, vector<1x1x14xf32>
    %89 = vector.shape_cast %88 : vector<1x1x14xf32> to vector<1x14xf32>
    %c2_122 = arith.constant 2 : index
    %c0_123 = arith.constant 0 : index
    %90 = vector.load %arg5[%c2_122, %c0_123] : memref<16x196xf32, #tpu.memory_space<vmem>>, vector<1x14xf32>
    tpu.vector_store %arg5[%c2_122, %c0_123], %89 {strides = array<i32>} : memref<16x196xf32, #tpu.memory_space<vmem>>, vector<1x14xf32>,
    %c0_124 = arith.constant 0 : index
    %c1_125 = arith.constant 1 : index
    %c2_126 = arith.constant 2 : index
    %91 = vector.load %arg1[%c0_124, %c1_125, %c2_126] : memref<2x16x16xf32, #tpu.memory_space<vmem>>, vector<1x1x14xf32>
    %92 = vector.shape_cast %91 : vector<1x1x14xf32> to vector<1x14xf32>
    %c2_127 = arith.constant 2 : index
    %c14_128 = arith.constant 14 : index
    %93 = vector.load %arg5[%c2_127, %c14_128] : memref<16x196xf32, #tpu.memory_space<vmem>>, vector<1x14xf32>
    tpu.vector_store %arg5[%c2_127, %c14_128], %92 {strides = array<i32>} : memref<16x196xf32, #tpu.memory_space<vmem>>, vector<1x14xf32>,
    %c0_129 = arith.constant 0 : index
    %c2_130 = arith.constant 2 : index
    %c2_131 = arith.constant 2 : index
    %94 = vector.load %arg1[%c0_129, %c2_130, %c2_131] : memref<2x16x16xf32, #tpu.memory_space<vmem>>, vector<1x1x14xf32>
    %95 = vector.shape_cast %94 : vector<1x1x14xf32> to vector<1x14xf32>
    %c2_132 = arith.constant 2 : index
    %c28_133 = arith.constant 28 : index
    %96 = vector.load %arg5[%c2_132, %c28_133] : memref<16x196xf32, #tpu.memory_space<vmem>>, vector<1x14xf32>
    tpu.vector_store %arg5[%c2_132, %c28_133], %95 {strides = array<i32>} : memref<16x196xf32, #tpu.memory_space<vmem>>, vector<1x14xf32>,
    %c0_134 = arith.constant 0 : index
    %c3_135 = arith.constant 3 : index
    %c2_136 = arith.constant 2 : index
    %97 = vector.load %arg1[%c0_134, %c3_135, %c2_136] : memref<2x16x16xf32, #tpu.memory_space<vmem>>, vector<1x1x14xf32>
    %98 = vector.shape_cast %97 : vector<1x1x14xf32> to vector<1x14xf32>
    %c2_137 = arith.constant 2 : index
    %c42_138 = arith.constant 42 : index
    %99 = vector.load %arg5[%c2_137, %c42_138] : memref<16x196xf32, #tpu.memory_space<vmem>>, vector<1x14xf32>
    tpu.vector_store %arg5[%c2_137, %c42_138], %98 {strides = array<i32>} : memref<16x196xf32, #tpu.memory_space<vmem>>, vector<1x14xf32>,
    %c0_139 = arith.constant 0 : index
    %c4_140 = arith.constant 4 : index
    %c2_141 = arith.constant 2 : index
    %100 = vector.load %arg1[%c0_139, %c4_140, %c2_141] : memref<2x16x16xf32, #tpu.memory_space<vmem>>, vector<1x1x14xf32>
    %101 = vector.shape_cast %100 : vector<1x1x14xf32> to vector<1x14xf32>
    %c2_142 = arith.constant 2 : index
    %c56_143 = arith.constant 56 : index
    %102 = vector.load %arg5[%c2_142, %c56_143] : memref<16x196xf32, #tpu.memory_space<vmem>>, vector<1x14xf32>
    tpu.vector_store %arg5[%c2_142, %c56_143], %101 {strides = array<i32>} : memref<16x196xf32, #tpu.memory_space<vmem>>, vector<1x14xf32>,
    %c0_144 = arith.constant 0 : index
    %c5_145 = arith.constant 5 : index
    %c2_146 = arith.constant 2 : index
    %103 = vector.load %arg1[%c0_144, %c5_145, %c2_146] : memref<2x16x16xf32, #tpu.memory_space<vmem>>, vector<1x1x14xf32>
    %104 = vector.shape_cast %103 : vector<1x1x14xf32> to vector<1x14xf32>
    %c2_147 = arith.constant 2 : index
    %c70_148 = arith.constant 70 : index
    %105 = vector.load %arg5[%c2_147, %c70_148] : memref<16x196xf32, #tpu.memory_space<vmem>>, vector<1x14xf32>
    tpu.vector_store %arg5[%c2_147, %c70_148], %104 {strides = array<i32>} : memref<16x196xf32, #tpu.memory_space<vmem>>, vector<1x14xf32>,
    %c0_149 = arith.constant 0 : index
    %c6_150 = arith.constant 6 : index
    %c2_151 = arith.constant 2 : index
    %106 = vector.load %arg1[%c0_149, %c6_150, %c2_151] : memref<2x16x16xf32, #tpu.memory_space<vmem>>, vector<1x1x14xf32>
    %107 = vector.shape_cast %106 : vector<1x1x14xf32> to vector<1x14xf32>
    %c2_152 = arith.constant 2 : index
    %c84_153 = arith.constant 84 : index
    %108 = vector.load %arg5[%c2_152, %c84_153] : memref<16x196xf32, #tpu.memory_space<vmem>>, vector<1x14xf32>
    tpu.vector_store %arg5[%c2_152, %c84_153], %107 {strides = array<i32>} : memref<16x196xf32, #tpu.memory_space<vmem>>, vector<1x14xf32>,
    %c0_154 = arith.constant 0 : index
    %c7_155 = arith.constant 7 : index
    %c2_156 = arith.constant 2 : index
    %109 = vector.load %arg1[%c0_154, %c7_155, %c2_156] : memref<2x16x16xf32, #tpu.memory_space<vmem>>, vector<1x1x14xf32>
    %110 = vector.shape_cast %109 : vector<1x1x14xf32> to vector<1x14xf32>
    %c2_157 = arith.constant 2 : index
    %c98_158 = arith.constant 98 : index
    %111 = vector.load %arg5[%c2_157, %c98_158] : memref<16x196xf32, #tpu.memory_space<vmem>>, vector<1x14xf32>
    tpu.vector_store %arg5[%c2_157, %c98_158], %110 {strides = array<i32>} : memref<16x196xf32, #tpu.memory_space<vmem>>, vector<1x14xf32>,
    %c0_159 = arith.constant 0 : index
    %c8_160 = arith.constant 8 : index
    %c2_161 = arith.constant 2 : index
    %112 = vector.load %arg1[%c0_159, %c8_160, %c2_161] : memref<2x16x16xf32, #tpu.memory_space<vmem>>, vector<1x1x14xf32>
    %113 = vector.shape_cast %112 : vector<1x1x14xf32> to vector<1x14xf32>
    %c2_162 = arith.constant 2 : index
    %c112_163 = arith.constant 112 : index
    %114 = vector.load %arg5[%c2_162, %c112_163] : memref<16x196xf32, #tpu.memory_space<vmem>>, vector<1x14xf32>
    tpu.vector_store %arg5[%c2_162, %c112_163], %113 {strides = array<i32>} : memref<16x196xf32, #tpu.memory_space<vmem>>, vector<1x14xf32>,
    %c0_164 = arith.constant 0 : index
    %c9_165 = arith.constant 9 : index
    %c2_166 = arith.constant 2 : index
    %115 = vector.load %arg1[%c0_164, %c9_165, %c2_166] : memref<2x16x16xf32, #tpu.memory_space<vmem>>, vector<1x1x14xf32>
    %116 = vector.shape_cast %115 : vector<1x1x14xf32> to vector<1x14xf32>
    %c2_167 = arith.constant 2 : index
    %c126_168 = arith.constant 126 : index
    %117 = vector.load %arg5[%c2_167, %c126_168] : memref<16x196xf32, #tpu.memory_space<vmem>>, vector<1x14xf32>
    tpu.vector_store %arg5[%c2_167, %c126_168], %116 {strides = array<i32>} : memref<16x196xf32, #tpu.memory_space<vmem>>, vector<1x14xf32>,
    %c0_169 = arith.constant 0 : index
    %c10_170 = arith.constant 10 : index
    %c2_171 = arith.constant 2 : index
    %118 = vector.load %arg1[%c0_169, %c10_170, %c2_171] : memref<2x16x16xf32, #tpu.memory_space<vmem>>, vector<1x1x14xf32>
    %119 = vector.shape_cast %118 : vector<1x1x14xf32> to vector<1x14xf32>
    %c2_172 = arith.constant 2 : index
    %c140_173 = arith.constant 140 : index
    %120 = vector.load %arg5[%c2_172, %c140_173] : memref<16x196xf32, #tpu.memory_space<vmem>>, vector<1x14xf32>
    tpu.vector_store %arg5[%c2_172, %c140_173], %119 {strides = array<i32>} : memref<16x196xf32, #tpu.memory_space<vmem>>, vector<1x14xf32>,
    %c0_174 = arith.constant 0 : index
    %c11_175 = arith.constant 11 : index
    %c2_176 = arith.constant 2 : index
    %121 = vector.load %arg1[%c0_174, %c11_175, %c2_176] : memref<2x16x16xf32, #tpu.memory_space<vmem>>, vector<1x1x14xf32>
    %122 = vector.shape_cast %121 : vector<1x1x14xf32> to vector<1x14xf32>
    %c2_177 = arith.constant 2 : index
    %c154_178 = arith.constant 154 : index
    %123 = vector.load %arg5[%c2_177, %c154_178] : memref<16x196xf32, #tpu.memory_space<vmem>>, vector<1x14xf32>
    tpu.vector_store %arg5[%c2_177, %c154_178], %122 {strides = array<i32>} : memref<16x196xf32, #tpu.memory_space<vmem>>, vector<1x14xf32>,
    %c0_179 = arith.constant 0 : index
    %c12_180 = arith.constant 12 : index
    %c2_181 = arith.constant 2 : index
    %124 = vector.load %arg1[%c0_179, %c12_180, %c2_181] : memref<2x16x16xf32, #tpu.memory_space<vmem>>, vector<1x1x14xf32>
    %125 = vector.shape_cast %124 : vector<1x1x14xf32> to vector<1x14xf32>
    %c2_182 = arith.constant 2 : index
    %c168_183 = arith.constant 168 : index
    %126 = vector.load %arg5[%c2_182, %c168_183] : memref<16x196xf32, #tpu.memory_space<vmem>>, vector<1x14xf32>
    tpu.vector_store %arg5[%c2_182, %c168_183], %125 {strides = array<i32>} : memref<16x196xf32, #tpu.memory_space<vmem>>, vector<1x14xf32>,
    %c0_184 = arith.constant 0 : index
    %c13_185 = arith.constant 13 : index
    %c2_186 = arith.constant 2 : index
    %127 = vector.load %arg1[%c0_184, %c13_185, %c2_186] : memref<2x16x16xf32, #tpu.memory_space<vmem>>, vector<1x1x14xf32>
    %128 = vector.shape_cast %127 : vector<1x1x14xf32> to vector<1x14xf32>
    %c2_187 = arith.constant 2 : index
    %c182_188 = arith.constant 182 : index
    %129 = vector.load %arg5[%c2_187, %c182_188] : memref<16x196xf32, #tpu.memory_space<vmem>>, vector<1x14xf32>
    tpu.vector_store %arg5[%c2_187, %c182_188], %128 {strides = array<i32>} : memref<16x196xf32, #tpu.memory_space<vmem>>, vector<1x14xf32>,
    %c0_189 = arith.constant 0 : index
    %c1_190 = arith.constant 1 : index
    %c0_191 = arith.constant 0 : index
    %130 = vector.load %arg1[%c0_189, %c1_190, %c0_191] : memref<2x16x16xf32, #tpu.memory_space<vmem>>, vector<1x1x14xf32>
    %131 = vector.shape_cast %130 : vector<1x1x14xf32> to vector<1x14xf32>
    %c3_192 = arith.constant 3 : index
    %c0_193 = arith.constant 0 : index
    %132 = vector.load %arg5[%c3_192, %c0_193] : memref<16x196xf32, #tpu.memory_space<vmem>>, vector<1x14xf32>
    tpu.vector_store %arg5[%c3_192, %c0_193], %131 {strides = array<i32>} : memref<16x196xf32, #tpu.memory_space<vmem>>, vector<1x14xf32>,
    %c0_194 = arith.constant 0 : index
    %c2_195 = arith.constant 2 : index
    %c0_196 = arith.constant 0 : index
    %133 = vector.load %arg1[%c0_194, %c2_195, %c0_196] : memref<2x16x16xf32, #tpu.memory_space<vmem>>, vector<1x1x14xf32>
    %134 = vector.shape_cast %133 : vector<1x1x14xf32> to vector<1x14xf32>
    %c3_197 = arith.constant 3 : index
    %c14_198 = arith.constant 14 : index
    %135 = vector.load %arg5[%c3_197, %c14_198] : memref<16x196xf32, #tpu.memory_space<vmem>>, vector<1x14xf32>
    tpu.vector_store %arg5[%c3_197, %c14_198], %134 {strides = array<i32>} : memref<16x196xf32, #tpu.memory_space<vmem>>, vector<1x14xf32>,
    %c0_199 = arith.constant 0 : index
    %c3_200 = arith.constant 3 : index
    %c0_201 = arith.constant 0 : index
    %136 = vector.load %arg1[%c0_199, %c3_200, %c0_201] : memref<2x16x16xf32, #tpu.memory_space<vmem>>, vector<1x1x14xf32>
    %137 = vector.shape_cast %136 : vector<1x1x14xf32> to vector<1x14xf32>
    %c3_202 = arith.constant 3 : index
    %c28_203 = arith.constant 28 : index
    %138 = vector.load %arg5[%c3_202, %c28_203] : memref<16x196xf32, #tpu.memory_space<vmem>>, vector<1x14xf32>
    tpu.vector_store %arg5[%c3_202, %c28_203], %137 {strides = array<i32>} : memref<16x196xf32, #tpu.memory_space<vmem>>, vector<1x14xf32>,
    %c0_204 = arith.constant 0 : index
    %c4_205 = arith.constant 4 : index
    %c0_206 = arith.constant 0 : index
    %139 = vector.load %arg1[%c0_204, %c4_205, %c0_206] : memref<2x16x16xf32, #tpu.memory_space<vmem>>, vector<1x1x14xf32>
    %140 = vector.shape_cast %139 : vector<1x1x14xf32> to vector<1x14xf32>
    %c3_207 = arith.constant 3 : index
    %c42_208 = arith.constant 42 : index
    %141 = vector.load %arg5[%c3_207, %c42_208] : memref<16x196xf32, #tpu.memory_space<vmem>>, vector<1x14xf32>
    tpu.vector_store %arg5[%c3_207, %c42_208], %140 {strides = array<i32>} : memref<16x196xf32, #tpu.memory_space<vmem>>, vector<1x14xf32>,
    %c0_209 = arith.constant 0 : index
    %c5_210 = arith.constant 5 : index
    %c0_211 = arith.constant 0 : index
    %142 = vector.load %arg1[%c0_209, %c5_210, %c0_211] : memref<2x16x16xf32, #tpu.memory_space<vmem>>, vector<1x1x14xf32>
    %143 = vector.shape_cast %142 : vector<1x1x14xf32> to vector<1x14xf32>
    %c3_212 = arith.constant 3 : index
    %c56_213 = arith.constant 56 : index
    %144 = vector.load %arg5[%c3_212, %c56_213] : memref<16x196xf32, #tpu.memory_space<vmem>>, vector<1x14xf32>
    tpu.vector_store %arg5[%c3_212, %c56_213], %143 {strides = array<i32>} : memref<16x196xf32, #tpu.memory_space<vmem>>, vector<1x14xf32>,
    %c0_214 = arith.constant 0 : index
    %c6_215 = arith.constant 6 : index
    %c0_216 = arith.constant 0 : index
    %145 = vector.load %arg1[%c0_214, %c6_215, %c0_216] : memref<2x16x16xf32, #tpu.memory_space<vmem>>, vector<1x1x14xf32>
    %146 = vector.shape_cast %145 : vector<1x1x14xf32> to vector<1x14xf32>
    %c3_217 = arith.constant 3 : index
    %c70_218 = arith.constant 70 : index
    %147 = vector.load %arg5[%c3_217, %c70_218] : memref<16x196xf32, #tpu.memory_space<vmem>>, vector<1x14xf32>
    tpu.vector_store %arg5[%c3_217, %c70_218], %146 {strides = array<i32>} : memref<16x196xf32, #tpu.memory_space<vmem>>, vector<1x14xf32>,
    %c0_219 = arith.constant 0 : index
    %c7_220 = arith.constant 7 : index
    %c0_221 = arith.constant 0 : index
    %148 = vector.load %arg1[%c0_219, %c7_220, %c0_221] : memref<2x16x16xf32, #tpu.memory_space<vmem>>, vector<1x1x14xf32>
    %149 = vector.shape_cast %148 : vector<1x1x14xf32> to vector<1x14xf32>
    %c3_222 = arith.constant 3 : index
    %c84_223 = arith.constant 84 : index
    %150 = vector.load %arg5[%c3_222, %c84_223] : memref<16x196xf32, #tpu.memory_space<vmem>>, vector<1x14xf32>
    tpu.vector_store %arg5[%c3_222, %c84_223], %149 {strides = array<i32>} : memref<16x196xf32, #tpu.memory_space<vmem>>, vector<1x14xf32>,
    %c0_224 = arith.constant 0 : index
    %c8_225 = arith.constant 8 : index
    %c0_226 = arith.constant 0 : index
    %151 = vector.load %arg1[%c0_224, %c8_225, %c0_226] : memref<2x16x16xf32, #tpu.memory_space<vmem>>, vector<1x1x14xf32>
    %152 = vector.shape_cast %151 : vector<1x1x14xf32> to vector<1x14xf32>
    %c3_227 = arith.constant 3 : index
    %c98_228 = arith.constant 98 : index
    %153 = vector.load %arg5[%c3_227, %c98_228] : memref<16x196xf32, #tpu.memory_space<vmem>>, vector<1x14xf32>
    tpu.vector_store %arg5[%c3_227, %c98_228], %152 {strides = array<i32>} : memref<16x196xf32, #tpu.memory_space<vmem>>, vector<1x14xf32>,
    %c0_229 = arith.constant 0 : index
    %c9_230 = arith.constant 9 : index
    %c0_231 = arith.constant 0 : index
    %154 = vector.load %arg1[%c0_229, %c9_230, %c0_231] : memref<2x16x16xf32, #tpu.memory_space<vmem>>, vector<1x1x14xf32>
    %155 = vector.shape_cast %154 : vector<1x1x14xf32> to vector<1x14xf32>
    %c3_232 = arith.constant 3 : index
    %c112_233 = arith.constant 112 : index
    %156 = vector.load %arg5[%c3_232, %c112_233] : memref<16x196xf32, #tpu.memory_space<vmem>>, vector<1x14xf32>
    tpu.vector_store %arg5[%c3_232, %c112_233], %155 {strides = array<i32>} : memref<16x196xf32, #tpu.memory_space<vmem>>, vector<1x14xf32>,
    %c0_234 = arith.constant 0 : index
    %c10_235 = arith.constant 10 : index
    %c0_236 = arith.constant 0 : index
    %157 = vector.load %arg1[%c0_234, %c10_235, %c0_236] : memref<2x16x16xf32, #tpu.memory_space<vmem>>, vector<1x1x14xf32>
    %158 = vector.shape_cast %157 : vector<1x1x14xf32> to vector<1x14xf32>
    %c3_237 = arith.constant 3 : index
    %c126_238 = arith.constant 126 : index
    %159 = vector.load %arg5[%c3_237, %c126_238] : memref<16x196xf32, #tpu.memory_space<vmem>>, vector<1x14xf32>
    tpu.vector_store %arg5[%c3_237, %c126_238], %158 {strides = array<i32>} : memref<16x196xf32, #tpu.memory_space<vmem>>, vector<1x14xf32>,
    %c0_239 = arith.constant 0 : index
    %c11_240 = arith.constant 11 : index
    %c0_241 = arith.constant 0 : index
    %160 = vector.load %arg1[%c0_239, %c11_240, %c0_241] : memref<2x16x16xf32, #tpu.memory_space<vmem>>, vector<1x1x14xf32>
    %161 = vector.shape_cast %160 : vector<1x1x14xf32> to vector<1x14xf32>
    %c3_242 = arith.constant 3 : index
    %c140_243 = arith.constant 140 : index
    %162 = vector.load %arg5[%c3_242, %c140_243] : memref<16x196xf32, #tpu.memory_space<vmem>>, vector<1x14xf32>
    tpu.vector_store %arg5[%c3_242, %c140_243], %161 {strides = array<i32>} : memref<16x196xf32, #tpu.memory_space<vmem>>, vector<1x14xf32>,
    %c0_244 = arith.constant 0 : index
    %c12_245 = arith.constant 12 : index
    %c0_246 = arith.constant 0 : index
    %163 = vector.load %arg1[%c0_244, %c12_245, %c0_246] : memref<2x16x16xf32, #tpu.memory_space<vmem>>, vector<1x1x14xf32>
    %164 = vector.shape_cast %163 : vector<1x1x14xf32> to vector<1x14xf32>
    %c3_247 = arith.constant 3 : index
    %c154_248 = arith.constant 154 : index
    %165 = vector.load %arg5[%c3_247, %c154_248] : memref<16x196xf32, #tpu.memory_space<vmem>>, vector<1x14xf32>
    tpu.vector_store %arg5[%c3_247, %c154_248], %164 {strides = array<i32>} : memref<16x196xf32, #tpu.memory_space<vmem>>, vector<1x14xf32>,
    %c0_249 = arith.constant 0 : index
    %c13_250 = arith.constant 13 : index
    %c0_251 = arith.constant 0 : index
    %166 = vector.load %arg1[%c0_249, %c13_250, %c0_251] : memref<2x16x16xf32, #tpu.memory_space<vmem>>, vector<1x1x14xf32>
    %167 = vector.shape_cast %166 : vector<1x1x14xf32> to vector<1x14xf32>
    %c3_252 = arith.constant 3 : index
    %c168_253 = arith.constant 168 : index
    %168 = vector.load %arg5[%c3_252, %c168_253] : memref<16x196xf32, #tpu.memory_space<vmem>>, vector<1x14xf32>
    tpu.vector_store %arg5[%c3_252, %c168_253], %167 {strides = array<i32>} : memref<16x196xf32, #tpu.memory_space<vmem>>, vector<1x14xf32>,
    %c0_254 = arith.constant 0 : index
    %c14_255 = arith.constant 14 : index
    %c0_256 = arith.constant 0 : index
    %169 = vector.load %arg1[%c0_254, %c14_255, %c0_256] : memref<2x16x16xf32, #tpu.memory_space<vmem>>, vector<1x1x14xf32>
    %170 = vector.shape_cast %169 : vector<1x1x14xf32> to vector<1x14xf32>
    %c3_257 = arith.constant 3 : index
    %c182_258 = arith.constant 182 : index
    %171 = vector.load %arg5[%c3_257, %c182_258] : memref<16x196xf32, #tpu.memory_space<vmem>>, vector<1x14xf32>
    tpu.vector_store %arg5[%c3_257, %c182_258], %170 {strides = array<i32>} : memref<16x196xf32, #tpu.memory_space<vmem>>, vector<1x14xf32>,
    %c0_259 = arith.constant 0 : index
    %c1_260 = arith.constant 1 : index
    %c1_261 = arith.constant 1 : index
    %172 = vector.load %arg1[%c0_259, %c1_260, %c1_261] : memref<2x16x16xf32, #tpu.memory_space<vmem>>, vector<1x1x14xf32>
    %173 = vector.shape_cast %172 : vector<1x1x14xf32> to vector<1x14xf32>
    %c4_262 = arith.constant 4 : index
    %c0_263 = arith.constant 0 : index
    %174 = vector.load %arg5[%c4_262, %c0_263] : memref<16x196xf32, #tpu.memory_space<vmem>>, vector<1x14xf32>
    tpu.vector_store %arg5[%c4_262, %c0_263], %173 {strides = array<i32>} : memref<16x196xf32, #tpu.memory_space<vmem>>, vector<1x14xf32>,
    %c0_264 = arith.constant 0 : index
    %c2_265 = arith.constant 2 : index
    %c1_266 = arith.constant 1 : index
    %175 = vector.load %arg1[%c0_264, %c2_265, %c1_266] : memref<2x16x16xf32, #tpu.memory_space<vmem>>, vector<1x1x14xf32>
    %176 = vector.shape_cast %175 : vector<1x1x14xf32> to vector<1x14xf32>
    %c4_267 = arith.constant 4 : index
    %c14_268 = arith.constant 14 : index
    %177 = vector.load %arg5[%c4_267, %c14_268] : memref<16x196xf32, #tpu.memory_space<vmem>>, vector<1x14xf32>
    tpu.vector_store %arg5[%c4_267, %c14_268], %176 {strides = array<i32>} : memref<16x196xf32, #tpu.memory_space<vmem>>, vector<1x14xf32>,
    %c0_269 = arith.constant 0 : index
    %c3_270 = arith.constant 3 : index
    %c1_271 = arith.constant 1 : index
    %178 = vector.load %arg1[%c0_269, %c3_270, %c1_271] : memref<2x16x16xf32, #tpu.memory_space<vmem>>, vector<1x1x14xf32>
    %179 = vector.shape_cast %178 : vector<1x1x14xf32> to vector<1x14xf32>
    %c4_272 = arith.constant 4 : index
    %c28_273 = arith.constant 28 : index
    %180 = vector.load %arg5[%c4_272, %c28_273] : memref<16x196xf32, #tpu.memory_space<vmem>>, vector<1x14xf32>
    tpu.vector_store %arg5[%c4_272, %c28_273], %179 {strides = array<i32>} : memref<16x196xf32, #tpu.memory_space<vmem>>, vector<1x14xf32>,
    %c0_274 = arith.constant 0 : index
    %c4_275 = arith.constant 4 : index
    %c1_276 = arith.constant 1 : index
    %181 = vector.load %arg1[%c0_274, %c4_275, %c1_276] : memref<2x16x16xf32, #tpu.memory_space<vmem>>, vector<1x1x14xf32>
    %182 = vector.shape_cast %181 : vector<1x1x14xf32> to vector<1x14xf32>
    %c4_277 = arith.constant 4 : index
    %c42_278 = arith.constant 42 : index
    %183 = vector.load %arg5[%c4_277, %c42_278] : memref<16x196xf32, #tpu.memory_space<vmem>>, vector<1x14xf32>
    tpu.vector_store %arg5[%c4_277, %c42_278], %182 {strides = array<i32>} : memref<16x196xf32, #tpu.memory_space<vmem>>, vector<1x14xf32>,
    %c0_279 = arith.constant 0 : index
    %c5_280 = arith.constant 5 : index
    %c1_281 = arith.constant 1 : index
    %184 = vector.load %arg1[%c0_279, %c5_280, %c1_281] : memref<2x16x16xf32, #tpu.memory_space<vmem>>, vector<1x1x14xf32>
    %185 = vector.shape_cast %184 : vector<1x1x14xf32> to vector<1x14xf32>
    %c4_282 = arith.constant 4 : index
    %c56_283 = arith.constant 56 : index
    %186 = vector.load %arg5[%c4_282, %c56_283] : memref<16x196xf32, #tpu.memory_space<vmem>>, vector<1x14xf32>
    tpu.vector_store %arg5[%c4_282, %c56_283], %185 {strides = array<i32>} : memref<16x196xf32, #tpu.memory_space<vmem>>, vector<1x14xf32>,
    %c0_284 = arith.constant 0 : index
    %c6_285 = arith.constant 6 : index
    %c1_286 = arith.constant 1 : index
    %187 = vector.load %arg1[%c0_284, %c6_285, %c1_286] : memref<2x16x16xf32, #tpu.memory_space<vmem>>, vector<1x1x14xf32>
    %188 = vector.shape_cast %187 : vector<1x1x14xf32> to vector<1x14xf32>
    %c4_287 = arith.constant 4 : index
    %c70_288 = arith.constant 70 : index
    %189 = vector.load %arg5[%c4_287, %c70_288] : memref<16x196xf32, #tpu.memory_space<vmem>>, vector<1x14xf32>
    tpu.vector_store %arg5[%c4_287, %c70_288], %188 {strides = array<i32>} : memref<16x196xf32, #tpu.memory_space<vmem>>, vector<1x14xf32>,
    %c0_289 = arith.constant 0 : index
    %c7_290 = arith.constant 7 : index
    %c1_291 = arith.constant 1 : index
    %190 = vector.load %arg1[%c0_289, %c7_290, %c1_291] : memref<2x16x16xf32, #tpu.memory_space<vmem>>, vector<1x1x14xf32>
    %191 = vector.shape_cast %190 : vector<1x1x14xf32> to vector<1x14xf32>
    %c4_292 = arith.constant 4 : index
    %c84_293 = arith.constant 84 : index
    %192 = vector.load %arg5[%c4_292, %c84_293] : memref<16x196xf32, #tpu.memory_space<vmem>>, vector<1x14xf32>
    tpu.vector_store %arg5[%c4_292, %c84_293], %191 {strides = array<i32>} : memref<16x196xf32, #tpu.memory_space<vmem>>, vector<1x14xf32>,
    %c0_294 = arith.constant 0 : index
    %c8_295 = arith.constant 8 : index
    %c1_296 = arith.constant 1 : index
    %193 = vector.load %arg1[%c0_294, %c8_295, %c1_296] : memref<2x16x16xf32, #tpu.memory_space<vmem>>, vector<1x1x14xf32>
    %194 = vector.shape_cast %193 : vector<1x1x14xf32> to vector<1x14xf32>
    %c4_297 = arith.constant 4 : index
    %c98_298 = arith.constant 98 : index
    %195 = vector.load %arg5[%c4_297, %c98_298] : memref<16x196xf32, #tpu.memory_space<vmem>>, vector<1x14xf32>
    tpu.vector_store %arg5[%c4_297, %c98_298], %194 {strides = array<i32>} : memref<16x196xf32, #tpu.memory_space<vmem>>, vector<1x14xf32>,
    %c0_299 = arith.constant 0 : index
    %c9_300 = arith.constant 9 : index
    %c1_301 = arith.constant 1 : index
    %196 = vector.load %arg1[%c0_299, %c9_300, %c1_301] : memref<2x16x16xf32, #tpu.memory_space<vmem>>, vector<1x1x14xf32>
    %197 = vector.shape_cast %196 : vector<1x1x14xf32> to vector<1x14xf32>
    %c4_302 = arith.constant 4 : index
    %c112_303 = arith.constant 112 : index
    %198 = vector.load %arg5[%c4_302, %c112_303] : memref<16x196xf32, #tpu.memory_space<vmem>>, vector<1x14xf32>
    tpu.vector_store %arg5[%c4_302, %c112_303], %197 {strides = array<i32>} : memref<16x196xf32, #tpu.memory_space<vmem>>, vector<1x14xf32>,
    %c0_304 = arith.constant 0 : index
    %c10_305 = arith.constant 10 : index
    %c1_306 = arith.constant 1 : index
    %199 = vector.load %arg1[%c0_304, %c10_305, %c1_306] : memref<2x16x16xf32, #tpu.memory_space<vmem>>, vector<1x1x14xf32>
    %200 = vector.shape_cast %199 : vector<1x1x14xf32> to vector<1x14xf32>
    %c4_307 = arith.constant 4 : index
    %c126_308 = arith.constant 126 : index
    %201 = vector.load %arg5[%c4_307, %c126_308] : memref<16x196xf32, #tpu.memory_space<vmem>>, vector<1x14xf32>
    tpu.vector_store %arg5[%c4_307, %c126_308], %200 {strides = array<i32>} : memref<16x196xf32, #tpu.memory_space<vmem>>, vector<1x14xf32>,
    %c0_309 = arith.constant 0 : index
    %c11_310 = arith.constant 11 : index
    %c1_311 = arith.constant 1 : index
    %202 = vector.load %arg1[%c0_309, %c11_310, %c1_311] : memref<2x16x16xf32, #tpu.memory_space<vmem>>, vector<1x1x14xf32>
    %203 = vector.shape_cast %202 : vector<1x1x14xf32> to vector<1x14xf32>
    %c4_312 = arith.constant 4 : index
    %c140_313 = arith.constant 140 : index
    %204 = vector.load %arg5[%c4_312, %c140_313] : memref<16x196xf32, #tpu.memory_space<vmem>>, vector<1x14xf32>
    tpu.vector_store %arg5[%c4_312, %c140_313], %203 {strides = array<i32>} : memref<16x196xf32, #tpu.memory_space<vmem>>, vector<1x14xf32>,
    %c0_314 = arith.constant 0 : index
    %c12_315 = arith.constant 12 : index
    %c1_316 = arith.constant 1 : index
    %205 = vector.load %arg1[%c0_314, %c12_315, %c1_316] : memref<2x16x16xf32, #tpu.memory_space<vmem>>, vector<1x1x14xf32>
    %206 = vector.shape_cast %205 : vector<1x1x14xf32> to vector<1x14xf32>
    %c4_317 = arith.constant 4 : index
    %c154_318 = arith.constant 154 : index
    %207 = vector.load %arg5[%c4_317, %c154_318] : memref<16x196xf32, #tpu.memory_space<vmem>>, vector<1x14xf32>
    tpu.vector_store %arg5[%c4_317, %c154_318], %206 {strides = array<i32>} : memref<16x196xf32, #tpu.memory_space<vmem>>, vector<1x14xf32>,
    %c0_319 = arith.constant 0 : index
    %c13_320 = arith.constant 13 : index
    %c1_321 = arith.constant 1 : index
    %208 = vector.load %arg1[%c0_319, %c13_320, %c1_321] : memref<2x16x16xf32, #tpu.memory_space<vmem>>, vector<1x1x14xf32>
    %209 = vector.shape_cast %208 : vector<1x1x14xf32> to vector<1x14xf32>
    %c4_322 = arith.constant 4 : index
    %c168_323 = arith.constant 168 : index
    %210 = vector.load %arg5[%c4_322, %c168_323] : memref<16x196xf32, #tpu.memory_space<vmem>>, vector<1x14xf32>
    tpu.vector_store %arg5[%c4_322, %c168_323], %209 {strides = array<i32>} : memref<16x196xf32, #tpu.memory_space<vmem>>, vector<1x14xf32>,
    %c0_324 = arith.constant 0 : index
    %c14_325 = arith.constant 14 : index
    %c1_326 = arith.constant 1 : index
    %211 = vector.load %arg1[%c0_324, %c14_325, %c1_326] : memref<2x16x16xf32, #tpu.memory_space<vmem>>, vector<1x1x14xf32>
    %212 = vector.shape_cast %211 : vector<1x1x14xf32> to vector<1x14xf32>
    %c4_327 = arith.constant 4 : index
    %c182_328 = arith.constant 182 : index
    %213 = vector.load %arg5[%c4_327, %c182_328] : memref<16x196xf32, #tpu.memory_space<vmem>>, vector<1x14xf32>
    tpu.vector_store %arg5[%c4_327, %c182_328], %212 {strides = array<i32>} : memref<16x196xf32, #tpu.memory_space<vmem>>, vector<1x14xf32>,
    %c0_329 = arith.constant 0 : index
    %c1_330 = arith.constant 1 : index
    %c2_331 = arith.constant 2 : index
    %214 = vector.load %arg1[%c0_329, %c1_330, %c2_331] : memref<2x16x16xf32, #tpu.memory_space<vmem>>, vector<1x1x14xf32>
    %215 = vector.shape_cast %214 : vector<1x1x14xf32> to vector<1x14xf32>
    %c5_332 = arith.constant 5 : index
    %c0_333 = arith.constant 0 : index
    %216 = vector.load %arg5[%c5_332, %c0_333] : memref<16x196xf32, #tpu.memory_space<vmem>>, vector<1x14xf32>
    tpu.vector_store %arg5[%c5_332, %c0_333], %215 {strides = array<i32>} : memref<16x196xf32, #tpu.memory_space<vmem>>, vector<1x14xf32>,
    %c0_334 = arith.constant 0 : index
    %c2_335 = arith.constant 2 : index
    %c2_336 = arith.constant 2 : index
    %217 = vector.load %arg1[%c0_334, %c2_335, %c2_336] : memref<2x16x16xf32, #tpu.memory_space<vmem>>, vector<1x1x14xf32>
    %218 = vector.shape_cast %217 : vector<1x1x14xf32> to vector<1x14xf32>
    %c5_337 = arith.constant 5 : index
    %c14_338 = arith.constant 14 : index
    %219 = vector.load %arg5[%c5_337, %c14_338] : memref<16x196xf32, #tpu.memory_space<vmem>>, vector<1x14xf32>
    tpu.vector_store %arg5[%c5_337, %c14_338], %218 {strides = array<i32>} : memref<16x196xf32, #tpu.memory_space<vmem>>, vector<1x14xf32>,
    %c0_339 = arith.constant 0 : index
    %c3_340 = arith.constant 3 : index
    %c2_341 = arith.constant 2 : index
    %220 = vector.load %arg1[%c0_339, %c3_340, %c2_341] : memref<2x16x16xf32, #tpu.memory_space<vmem>>, vector<1x1x14xf32>
    %221 = vector.shape_cast %220 : vector<1x1x14xf32> to vector<1x14xf32>
    %c5_342 = arith.constant 5 : index
    %c28_343 = arith.constant 28 : index
    %222 = vector.load %arg5[%c5_342, %c28_343] : memref<16x196xf32, #tpu.memory_space<vmem>>, vector<1x14xf32>
    tpu.vector_store %arg5[%c5_342, %c28_343], %221 {strides = array<i32>} : memref<16x196xf32, #tpu.memory_space<vmem>>, vector<1x14xf32>,
    %c0_344 = arith.constant 0 : index
    %c4_345 = arith.constant 4 : index
    %c2_346 = arith.constant 2 : index
    %223 = vector.load %arg1[%c0_344, %c4_345, %c2_346] : memref<2x16x16xf32, #tpu.memory_space<vmem>>, vector<1x1x14xf32>
    %224 = vector.shape_cast %223 : vector<1x1x14xf32> to vector<1x14xf32>
    %c5_347 = arith.constant 5 : index
    %c42_348 = arith.constant 42 : index
    %225 = vector.load %arg5[%c5_347, %c42_348] : memref<16x196xf32, #tpu.memory_space<vmem>>, vector<1x14xf32>
    tpu.vector_store %arg5[%c5_347, %c42_348], %224 {strides = array<i32>} : memref<16x196xf32, #tpu.memory_space<vmem>>, vector<1x14xf32>,
    %c0_349 = arith.constant 0 : index
    %c5_350 = arith.constant 5 : index
    %c2_351 = arith.constant 2 : index
    %226 = vector.load %arg1[%c0_349, %c5_350, %c2_351] : memref<2x16x16xf32, #tpu.memory_space<vmem>>, vector<1x1x14xf32>
    %227 = vector.shape_cast %226 : vector<1x1x14xf32> to vector<1x14xf32>
    %c5_352 = arith.constant 5 : index
    %c56_353 = arith.constant 56 : index
    %228 = vector.load %arg5[%c5_352, %c56_353] : memref<16x196xf32, #tpu.memory_space<vmem>>, vector<1x14xf32>
    tpu.vector_store %arg5[%c5_352, %c56_353], %227 {strides = array<i32>} : memref<16x196xf32, #tpu.memory_space<vmem>>, vector<1x14xf32>,
    %c0_354 = arith.constant 0 : index
    %c6_355 = arith.constant 6 : index
    %c2_356 = arith.constant 2 : index
    %229 = vector.load %arg1[%c0_354, %c6_355, %c2_356] : memref<2x16x16xf32, #tpu.memory_space<vmem>>, vector<1x1x14xf32>
    %230 = vector.shape_cast %229 : vector<1x1x14xf32> to vector<1x14xf32>
    %c5_357 = arith.constant 5 : index
    %c70_358 = arith.constant 70 : index
    %231 = vector.load %arg5[%c5_357, %c70_358] : memref<16x196xf32, #tpu.memory_space<vmem>>, vector<1x14xf32>
    tpu.vector_store %arg5[%c5_357, %c70_358], %230 {strides = array<i32>} : memref<16x196xf32, #tpu.memory_space<vmem>>, vector<1x14xf32>,
    %c0_359 = arith.constant 0 : index
    %c7_360 = arith.constant 7 : index
    %c2_361 = arith.constant 2 : index
    %232 = vector.load %arg1[%c0_359, %c7_360, %c2_361] : memref<2x16x16xf32, #tpu.memory_space<vmem>>, vector<1x1x14xf32>
    %233 = vector.shape_cast %232 : vector<1x1x14xf32> to vector<1x14xf32>
    %c5_362 = arith.constant 5 : index
    %c84_363 = arith.constant 84 : index
    %234 = vector.load %arg5[%c5_362, %c84_363] : memref<16x196xf32, #tpu.memory_space<vmem>>, vector<1x14xf32>
    tpu.vector_store %arg5[%c5_362, %c84_363], %233 {strides = array<i32>} : memref<16x196xf32, #tpu.memory_space<vmem>>, vector<1x14xf32>,
    %c0_364 = arith.constant 0 : index
    %c8_365 = arith.constant 8 : index
    %c2_366 = arith.constant 2 : index
    %235 = vector.load %arg1[%c0_364, %c8_365, %c2_366] : memref<2x16x16xf32, #tpu.memory_space<vmem>>, vector<1x1x14xf32>
    %236 = vector.shape_cast %235 : vector<1x1x14xf32> to vector<1x14xf32>
    %c5_367 = arith.constant 5 : index
    %c98_368 = arith.constant 98 : index
    %237 = vector.load %arg5[%c5_367, %c98_368] : memref<16x196xf32, #tpu.memory_space<vmem>>, vector<1x14xf32>
    tpu.vector_store %arg5[%c5_367, %c98_368], %236 {strides = array<i32>} : memref<16x196xf32, #tpu.memory_space<vmem>>, vector<1x14xf32>,
    %c0_369 = arith.constant 0 : index
    %c9_370 = arith.constant 9 : index
    %c2_371 = arith.constant 2 : index
    %238 = vector.load %arg1[%c0_369, %c9_370, %c2_371] : memref<2x16x16xf32, #tpu.memory_space<vmem>>, vector<1x1x14xf32>
    %239 = vector.shape_cast %238 : vector<1x1x14xf32> to vector<1x14xf32>
    %c5_372 = arith.constant 5 : index
    %c112_373 = arith.constant 112 : index
    %240 = vector.load %arg5[%c5_372, %c112_373] : memref<16x196xf32, #tpu.memory_space<vmem>>, vector<1x14xf32>
    tpu.vector_store %arg5[%c5_372, %c112_373], %239 {strides = array<i32>} : memref<16x196xf32, #tpu.memory_space<vmem>>, vector<1x14xf32>,
    %c0_374 = arith.constant 0 : index
    %c10_375 = arith.constant 10 : index
    %c2_376 = arith.constant 2 : index
    %241 = vector.load %arg1[%c0_374, %c10_375, %c2_376] : memref<2x16x16xf32, #tpu.memory_space<vmem>>, vector<1x1x14xf32>
    %242 = vector.shape_cast %241 : vector<1x1x14xf32> to vector<1x14xf32>
    %c5_377 = arith.constant 5 : index
    %c126_378 = arith.constant 126 : index
    %243 = vector.load %arg5[%c5_377, %c126_378] : memref<16x196xf32, #tpu.memory_space<vmem>>, vector<1x14xf32>
    tpu.vector_store %arg5[%c5_377, %c126_378], %242 {strides = array<i32>} : memref<16x196xf32, #tpu.memory_space<vmem>>, vector<1x14xf32>,
    %c0_379 = arith.constant 0 : index
    %c11_380 = arith.constant 11 : index
    %c2_381 = arith.constant 2 : index
    %244 = vector.load %arg1[%c0_379, %c11_380, %c2_381] : memref<2x16x16xf32, #tpu.memory_space<vmem>>, vector<1x1x14xf32>
    %245 = vector.shape_cast %244 : vector<1x1x14xf32> to vector<1x14xf32>
    %c5_382 = arith.constant 5 : index
    %c140_383 = arith.constant 140 : index
    %246 = vector.load %arg5[%c5_382, %c140_383] : memref<16x196xf32, #tpu.memory_space<vmem>>, vector<1x14xf32>
    tpu.vector_store %arg5[%c5_382, %c140_383], %245 {strides = array<i32>} : memref<16x196xf32, #tpu.memory_space<vmem>>, vector<1x14xf32>,
    %c0_384 = arith.constant 0 : index
    %c12_385 = arith.constant 12 : index
    %c2_386 = arith.constant 2 : index
    %247 = vector.load %arg1[%c0_384, %c12_385, %c2_386] : memref<2x16x16xf32, #tpu.memory_space<vmem>>, vector<1x1x14xf32>
    %248 = vector.shape_cast %247 : vector<1x1x14xf32> to vector<1x14xf32>
    %c5_387 = arith.constant 5 : index
    %c154_388 = arith.constant 154 : index
    %249 = vector.load %arg5[%c5_387, %c154_388] : memref<16x196xf32, #tpu.memory_space<vmem>>, vector<1x14xf32>
    tpu.vector_store %arg5[%c5_387, %c154_388], %248 {strides = array<i32>} : memref<16x196xf32, #tpu.memory_space<vmem>>, vector<1x14xf32>,
    %c0_389 = arith.constant 0 : index
    %c13_390 = arith.constant 13 : index
    %c2_391 = arith.constant 2 : index
    %250 = vector.load %arg1[%c0_389, %c13_390, %c2_391] : memref<2x16x16xf32, #tpu.memory_space<vmem>>, vector<1x1x14xf32>
    %251 = vector.shape_cast %250 : vector<1x1x14xf32> to vector<1x14xf32>
    %c5_392 = arith.constant 5 : index
    %c168_393 = arith.constant 168 : index
    %252 = vector.load %arg5[%c5_392, %c168_393] : memref<16x196xf32, #tpu.memory_space<vmem>>, vector<1x14xf32>
    tpu.vector_store %arg5[%c5_392, %c168_393], %251 {strides = array<i32>} : memref<16x196xf32, #tpu.memory_space<vmem>>, vector<1x14xf32>,
    %c0_394 = arith.constant 0 : index
    %c14_395 = arith.constant 14 : index
    %c2_396 = arith.constant 2 : index
    %253 = vector.load %arg1[%c0_394, %c14_395, %c2_396] : memref<2x16x16xf32, #tpu.memory_space<vmem>>, vector<1x1x14xf32>
    %254 = vector.shape_cast %253 : vector<1x1x14xf32> to vector<1x14xf32>
    %c5_397 = arith.constant 5 : index
    %c182_398 = arith.constant 182 : index
    %255 = vector.load %arg5[%c5_397, %c182_398] : memref<16x196xf32, #tpu.memory_space<vmem>>, vector<1x14xf32>
    tpu.vector_store %arg5[%c5_397, %c182_398], %254 {strides = array<i32>} : memref<16x196xf32, #tpu.memory_space<vmem>>, vector<1x14xf32>,
    %c0_399 = arith.constant 0 : index
    %c2_400 = arith.constant 2 : index
    %c0_401 = arith.constant 0 : index
    %256 = vector.load %arg1[%c0_399, %c2_400, %c0_401] : memref<2x16x16xf32, #tpu.memory_space<vmem>>, vector<1x1x14xf32>
    %257 = vector.shape_cast %256 : vector<1x1x14xf32> to vector<1x14xf32>
    %c6_402 = arith.constant 6 : index
    %c0_403 = arith.constant 0 : index
    %258 = vector.load %arg5[%c6_402, %c0_403] : memref<16x196xf32, #tpu.memory_space<vmem>>, vector<1x14xf32>
    tpu.vector_store %arg5[%c6_402, %c0_403], %257 {strides = array<i32>} : memref<16x196xf32, #tpu.memory_space<vmem>>, vector<1x14xf32>,
    %c0_404 = arith.constant 0 : index
    %c3_405 = arith.constant 3 : index
    %c0_406 = arith.constant 0 : index
    %259 = vector.load %arg1[%c0_404, %c3_405, %c0_406] : memref<2x16x16xf32, #tpu.memory_space<vmem>>, vector<1x1x14xf32>
    %260 = vector.shape_cast %259 : vector<1x1x14xf32> to vector<1x14xf32>
    %c6_407 = arith.constant 6 : index
    %c14_408 = arith.constant 14 : index
    %261 = vector.load %arg5[%c6_407, %c14_408] : memref<16x196xf32, #tpu.memory_space<vmem>>, vector<1x14xf32>
    tpu.vector_store %arg5[%c6_407, %c14_408], %260 {strides = array<i32>} : memref<16x196xf32, #tpu.memory_space<vmem>>, vector<1x14xf32>,
    %c0_409 = arith.constant 0 : index
    %c4_410 = arith.constant 4 : index
    %c0_411 = arith.constant 0 : index
    %262 = vector.load %arg1[%c0_409, %c4_410, %c0_411] : memref<2x16x16xf32, #tpu.memory_space<vmem>>, vector<1x1x14xf32>
    %263 = vector.shape_cast %262 : vector<1x1x14xf32> to vector<1x14xf32>
    %c6_412 = arith.constant 6 : index
    %c28_413 = arith.constant 28 : index
    %264 = vector.load %arg5[%c6_412, %c28_413] : memref<16x196xf32, #tpu.memory_space<vmem>>, vector<1x14xf32>
    tpu.vector_store %arg5[%c6_412, %c28_413], %263 {strides = array<i32>} : memref<16x196xf32, #tpu.memory_space<vmem>>, vector<1x14xf32>,
    %c0_414 = arith.constant 0 : index
    %c5_415 = arith.constant 5 : index
    %c0_416 = arith.constant 0 : index
    %265 = vector.load %arg1[%c0_414, %c5_415, %c0_416] : memref<2x16x16xf32, #tpu.memory_space<vmem>>, vector<1x1x14xf32>
    %266 = vector.shape_cast %265 : vector<1x1x14xf32> to vector<1x14xf32>
    %c6_417 = arith.constant 6 : index
    %c42_418 = arith.constant 42 : index
    %267 = vector.load %arg5[%c6_417, %c42_418] : memref<16x196xf32, #tpu.memory_space<vmem>>, vector<1x14xf32>
    tpu.vector_store %arg5[%c6_417, %c42_418], %266 {strides = array<i32>} : memref<16x196xf32, #tpu.memory_space<vmem>>, vector<1x14xf32>,
    %c0_419 = arith.constant 0 : index
    %c6_420 = arith.constant 6 : index
    %c0_421 = arith.constant 0 : index
    %268 = vector.load %arg1[%c0_419, %c6_420, %c0_421] : memref<2x16x16xf32, #tpu.memory_space<vmem>>, vector<1x1x14xf32>
    %269 = vector.shape_cast %268 : vector<1x1x14xf32> to vector<1x14xf32>
    %c6_422 = arith.constant 6 : index
    %c56_423 = arith.constant 56 : index
    %270 = vector.load %arg5[%c6_422, %c56_423] : memref<16x196xf32, #tpu.memory_space<vmem>>, vector<1x14xf32>
    tpu.vector_store %arg5[%c6_422, %c56_423], %269 {strides = array<i32>} : memref<16x196xf32, #tpu.memory_space<vmem>>, vector<1x14xf32>,
    %c0_424 = arith.constant 0 : index
    %c7_425 = arith.constant 7 : index
    %c0_426 = arith.constant 0 : index
    %271 = vector.load %arg1[%c0_424, %c7_425, %c0_426] : memref<2x16x16xf32, #tpu.memory_space<vmem>>, vector<1x1x14xf32>
    %272 = vector.shape_cast %271 : vector<1x1x14xf32> to vector<1x14xf32>
    %c6_427 = arith.constant 6 : index
    %c70_428 = arith.constant 70 : index
    %273 = vector.load %arg5[%c6_427, %c70_428] : memref<16x196xf32, #tpu.memory_space<vmem>>, vector<1x14xf32>
    tpu.vector_store %arg5[%c6_427, %c70_428], %272 {strides = array<i32>} : memref<16x196xf32, #tpu.memory_space<vmem>>, vector<1x14xf32>,
    %c0_429 = arith.constant 0 : index
    %c8_430 = arith.constant 8 : index
    %c0_431 = arith.constant 0 : index
    %274 = vector.load %arg1[%c0_429, %c8_430, %c0_431] : memref<2x16x16xf32, #tpu.memory_space<vmem>>, vector<1x1x14xf32>
    %275 = vector.shape_cast %274 : vector<1x1x14xf32> to vector<1x14xf32>
    %c6_432 = arith.constant 6 : index
    %c84_433 = arith.constant 84 : index
    %276 = vector.load %arg5[%c6_432, %c84_433] : memref<16x196xf32, #tpu.memory_space<vmem>>, vector<1x14xf32>
    tpu.vector_store %arg5[%c6_432, %c84_433], %275 {strides = array<i32>} : memref<16x196xf32, #tpu.memory_space<vmem>>, vector<1x14xf32>,
    %c0_434 = arith.constant 0 : index
    %c9_435 = arith.constant 9 : index
    %c0_436 = arith.constant 0 : index
    %277 = vector.load %arg1[%c0_434, %c9_435, %c0_436] : memref<2x16x16xf32, #tpu.memory_space<vmem>>, vector<1x1x14xf32>
    %278 = vector.shape_cast %277 : vector<1x1x14xf32> to vector<1x14xf32>
    %c6_437 = arith.constant 6 : index
    %c98_438 = arith.constant 98 : index
    %279 = vector.load %arg5[%c6_437, %c98_438] : memref<16x196xf32, #tpu.memory_space<vmem>>, vector<1x14xf32>
    tpu.vector_store %arg5[%c6_437, %c98_438], %278 {strides = array<i32>} : memref<16x196xf32, #tpu.memory_space<vmem>>, vector<1x14xf32>,
    %c0_439 = arith.constant 0 : index
    %c10_440 = arith.constant 10 : index
    %c0_441 = arith.constant 0 : index
    %280 = vector.load %arg1[%c0_439, %c10_440, %c0_441] : memref<2x16x16xf32, #tpu.memory_space<vmem>>, vector<1x1x14xf32>
    %281 = vector.shape_cast %280 : vector<1x1x14xf32> to vector<1x14xf32>
    %c6_442 = arith.constant 6 : index
    %c112_443 = arith.constant 112 : index
    %282 = vector.load %arg5[%c6_442, %c112_443] : memref<16x196xf32, #tpu.memory_space<vmem>>, vector<1x14xf32>
    tpu.vector_store %arg5[%c6_442, %c112_443], %281 {strides = array<i32>} : memref<16x196xf32, #tpu.memory_space<vmem>>, vector<1x14xf32>,
    %c0_444 = arith.constant 0 : index
    %c11_445 = arith.constant 11 : index
    %c0_446 = arith.constant 0 : index
    %283 = vector.load %arg1[%c0_444, %c11_445, %c0_446] : memref<2x16x16xf32, #tpu.memory_space<vmem>>, vector<1x1x14xf32>
    %284 = vector.shape_cast %283 : vector<1x1x14xf32> to vector<1x14xf32>
    %c6_447 = arith.constant 6 : index
    %c126_448 = arith.constant 126 : index
    %285 = vector.load %arg5[%c6_447, %c126_448] : memref<16x196xf32, #tpu.memory_space<vmem>>, vector<1x14xf32>
    tpu.vector_store %arg5[%c6_447, %c126_448], %284 {strides = array<i32>} : memref<16x196xf32, #tpu.memory_space<vmem>>, vector<1x14xf32>,
    %c0_449 = arith.constant 0 : index
    %c12_450 = arith.constant 12 : index
    %c0_451 = arith.constant 0 : index
    %286 = vector.load %arg1[%c0_449, %c12_450, %c0_451] : memref<2x16x16xf32, #tpu.memory_space<vmem>>, vector<1x1x14xf32>
    %287 = vector.shape_cast %286 : vector<1x1x14xf32> to vector<1x14xf32>
    %c6_452 = arith.constant 6 : index
    %c140_453 = arith.constant 140 : index
    %288 = vector.load %arg5[%c6_452, %c140_453] : memref<16x196xf32, #tpu.memory_space<vmem>>, vector<1x14xf32>
    tpu.vector_store %arg5[%c6_452, %c140_453], %287 {strides = array<i32>} : memref<16x196xf32, #tpu.memory_space<vmem>>, vector<1x14xf32>,
    %c0_454 = arith.constant 0 : index
    %c13_455 = arith.constant 13 : index
    %c0_456 = arith.constant 0 : index
    %289 = vector.load %arg1[%c0_454, %c13_455, %c0_456] : memref<2x16x16xf32, #tpu.memory_space<vmem>>, vector<1x1x14xf32>
    %290 = vector.shape_cast %289 : vector<1x1x14xf32> to vector<1x14xf32>
    %c6_457 = arith.constant 6 : index
    %c154_458 = arith.constant 154 : index
    %291 = vector.load %arg5[%c6_457, %c154_458] : memref<16x196xf32, #tpu.memory_space<vmem>>, vector<1x14xf32>
    tpu.vector_store %arg5[%c6_457, %c154_458], %290 {strides = array<i32>} : memref<16x196xf32, #tpu.memory_space<vmem>>, vector<1x14xf32>,
    %c0_459 = arith.constant 0 : index
    %c14_460 = arith.constant 14 : index
    %c0_461 = arith.constant 0 : index
    %292 = vector.load %arg1[%c0_459, %c14_460, %c0_461] : memref<2x16x16xf32, #tpu.memory_space<vmem>>, vector<1x1x14xf32>
    %293 = vector.shape_cast %292 : vector<1x1x14xf32> to vector<1x14xf32>
    %c6_462 = arith.constant 6 : index
    %c168_463 = arith.constant 168 : index
    %294 = vector.load %arg5[%c6_462, %c168_463] : memref<16x196xf32, #tpu.memory_space<vmem>>, vector<1x14xf32>
    tpu.vector_store %arg5[%c6_462, %c168_463], %293 {strides = array<i32>} : memref<16x196xf32, #tpu.memory_space<vmem>>, vector<1x14xf32>,
    %c0_464 = arith.constant 0 : index
    %c15 = arith.constant 15 : index
    %c0_465 = arith.constant 0 : index
    %295 = vector.load %arg1[%c0_464, %c15, %c0_465] : memref<2x16x16xf32, #tpu.memory_space<vmem>>, vector<1x1x14xf32>
    %296 = vector.shape_cast %295 : vector<1x1x14xf32> to vector<1x14xf32>
    %c6_466 = arith.constant 6 : index
    %c182_467 = arith.constant 182 : index
    %297 = vector.load %arg5[%c6_466, %c182_467] : memref<16x196xf32, #tpu.memory_space<vmem>>, vector<1x14xf32>
    tpu.vector_store %arg5[%c6_466, %c182_467], %296 {strides = array<i32>} : memref<16x196xf32, #tpu.memory_space<vmem>>, vector<1x14xf32>,
    %c0_468 = arith.constant 0 : index
    %c2_469 = arith.constant 2 : index
    %c1_470 = arith.constant 1 : index
    %298 = vector.load %arg1[%c0_468, %c2_469, %c1_470] : memref<2x16x16xf32, #tpu.memory_space<vmem>>, vector<1x1x14xf32>
    %299 = vector.shape_cast %298 : vector<1x1x14xf32> to vector<1x14xf32>
    %c7_471 = arith.constant 7 : index
    %c0_472 = arith.constant 0 : index
    %300 = vector.load %arg5[%c7_471, %c0_472] : memref<16x196xf32, #tpu.memory_space<vmem>>, vector<1x14xf32>
    tpu.vector_store %arg5[%c7_471, %c0_472], %299 {strides = array<i32>} : memref<16x196xf32, #tpu.memory_space<vmem>>, vector<1x14xf32>,
    %c0_473 = arith.constant 0 : index
    %c3_474 = arith.constant 3 : index
    %c1_475 = arith.constant 1 : index
    %301 = vector.load %arg1[%c0_473, %c3_474, %c1_475] : memref<2x16x16xf32, #tpu.memory_space<vmem>>, vector<1x1x14xf32>
    %302 = vector.shape_cast %301 : vector<1x1x14xf32> to vector<1x14xf32>
    %c7_476 = arith.constant 7 : index
    %c14_477 = arith.constant 14 : index
    %303 = vector.load %arg5[%c7_476, %c14_477] : memref<16x196xf32, #tpu.memory_space<vmem>>, vector<1x14xf32>
    tpu.vector_store %arg5[%c7_476, %c14_477], %302 {strides = array<i32>} : memref<16x196xf32, #tpu.memory_space<vmem>>, vector<1x14xf32>,
    %c0_478 = arith.constant 0 : index
    %c4_479 = arith.constant 4 : index
    %c1_480 = arith.constant 1 : index
    %304 = vector.load %arg1[%c0_478, %c4_479, %c1_480] : memref<2x16x16xf32, #tpu.memory_space<vmem>>, vector<1x1x14xf32>
    %305 = vector.shape_cast %304 : vector<1x1x14xf32> to vector<1x14xf32>
    %c7_481 = arith.constant 7 : index
    %c28_482 = arith.constant 28 : index
    %306 = vector.load %arg5[%c7_481, %c28_482] : memref<16x196xf32, #tpu.memory_space<vmem>>, vector<1x14xf32>
    tpu.vector_store %arg5[%c7_481, %c28_482], %305 {strides = array<i32>} : memref<16x196xf32, #tpu.memory_space<vmem>>, vector<1x14xf32>,
    %c0_483 = arith.constant 0 : index
    %c5_484 = arith.constant 5 : index
    %c1_485 = arith.constant 1 : index
    %307 = vector.load %arg1[%c0_483, %c5_484, %c1_485] : memref<2x16x16xf32, #tpu.memory_space<vmem>>, vector<1x1x14xf32>
    %308 = vector.shape_cast %307 : vector<1x1x14xf32> to vector<1x14xf32>
    %c7_486 = arith.constant 7 : index
    %c42_487 = arith.constant 42 : index
    %309 = vector.load %arg5[%c7_486, %c42_487] : memref<16x196xf32, #tpu.memory_space<vmem>>, vector<1x14xf32>
    tpu.vector_store %arg5[%c7_486, %c42_487], %308 {strides = array<i32>} : memref<16x196xf32, #tpu.memory_space<vmem>>, vector<1x14xf32>,
    %c0_488 = arith.constant 0 : index
    %c6_489 = arith.constant 6 : index
    %c1_490 = arith.constant 1 : index
    %310 = vector.load %arg1[%c0_488, %c6_489, %c1_490] : memref<2x16x16xf32, #tpu.memory_space<vmem>>, vector<1x1x14xf32>
    %311 = vector.shape_cast %310 : vector<1x1x14xf32> to vector<1x14xf32>
    %c7_491 = arith.constant 7 : index
    %c56_492 = arith.constant 56 : index
    %312 = vector.load %arg5[%c7_491, %c56_492] : memref<16x196xf32, #tpu.memory_space<vmem>>, vector<1x14xf32>
    tpu.vector_store %arg5[%c7_491, %c56_492], %311 {strides = array<i32>} : memref<16x196xf32, #tpu.memory_space<vmem>>, vector<1x14xf32>,
    %c0_493 = arith.constant 0 : index
    %c7_494 = arith.constant 7 : index
    %c1_495 = arith.constant 1 : index
    %313 = vector.load %arg1[%c0_493, %c7_494, %c1_495] : memref<2x16x16xf32, #tpu.memory_space<vmem>>, vector<1x1x14xf32>
    %314 = vector.shape_cast %313 : vector<1x1x14xf32> to vector<1x14xf32>
    %c7_496 = arith.constant 7 : index
    %c70_497 = arith.constant 70 : index
    %315 = vector.load %arg5[%c7_496, %c70_497] : memref<16x196xf32, #tpu.memory_space<vmem>>, vector<1x14xf32>
    tpu.vector_store %arg5[%c7_496, %c70_497], %314 {strides = array<i32>} : memref<16x196xf32, #tpu.memory_space<vmem>>, vector<1x14xf32>,
    %c0_498 = arith.constant 0 : index
    %c8_499 = arith.constant 8 : index
    %c1_500 = arith.constant 1 : index
    %316 = vector.load %arg1[%c0_498, %c8_499, %c1_500] : memref<2x16x16xf32, #tpu.memory_space<vmem>>, vector<1x1x14xf32>
    %317 = vector.shape_cast %316 : vector<1x1x14xf32> to vector<1x14xf32>
    %c7_501 = arith.constant 7 : index
    %c84_502 = arith.constant 84 : index
    %318 = vector.load %arg5[%c7_501, %c84_502] : memref<16x196xf32, #tpu.memory_space<vmem>>, vector<1x14xf32>
    tpu.vector_store %arg5[%c7_501, %c84_502], %317 {strides = array<i32>} : memref<16x196xf32, #tpu.memory_space<vmem>>, vector<1x14xf32>,
    %c0_503 = arith.constant 0 : index
    %c9_504 = arith.constant 9 : index
    %c1_505 = arith.constant 1 : index
    %319 = vector.load %arg1[%c0_503, %c9_504, %c1_505] : memref<2x16x16xf32, #tpu.memory_space<vmem>>, vector<1x1x14xf32>
    %320 = vector.shape_cast %319 : vector<1x1x14xf32> to vector<1x14xf32>
    %c7_506 = arith.constant 7 : index
    %c98_507 = arith.constant 98 : index
    %321 = vector.load %arg5[%c7_506, %c98_507] : memref<16x196xf32, #tpu.memory_space<vmem>>, vector<1x14xf32>
    tpu.vector_store %arg5[%c7_506, %c98_507], %320 {strides = array<i32>} : memref<16x196xf32, #tpu.memory_space<vmem>>, vector<1x14xf32>,
    %c0_508 = arith.constant 0 : index
    %c10_509 = arith.constant 10 : index
    %c1_510 = arith.constant 1 : index
    %322 = vector.load %arg1[%c0_508, %c10_509, %c1_510] : memref<2x16x16xf32, #tpu.memory_space<vmem>>, vector<1x1x14xf32>
    %323 = vector.shape_cast %322 : vector<1x1x14xf32> to vector<1x14xf32>
    %c7_511 = arith.constant 7 : index
    %c112_512 = arith.constant 112 : index
    %324 = vector.load %arg5[%c7_511, %c112_512] : memref<16x196xf32, #tpu.memory_space<vmem>>, vector<1x14xf32>
    tpu.vector_store %arg5[%c7_511, %c112_512], %323 {strides = array<i32>} : memref<16x196xf32, #tpu.memory_space<vmem>>, vector<1x14xf32>,
    %c0_513 = arith.constant 0 : index
    %c11_514 = arith.constant 11 : index
    %c1_515 = arith.constant 1 : index
    %325 = vector.load %arg1[%c0_513, %c11_514, %c1_515] : memref<2x16x16xf32, #tpu.memory_space<vmem>>, vector<1x1x14xf32>
    %326 = vector.shape_cast %325 : vector<1x1x14xf32> to vector<1x14xf32>
    %c7_516 = arith.constant 7 : index
    %c126_517 = arith.constant 126 : index
    %327 = vector.load %arg5[%c7_516, %c126_517] : memref<16x196xf32, #tpu.memory_space<vmem>>, vector<1x14xf32>
    tpu.vector_store %arg5[%c7_516, %c126_517], %326 {strides = array<i32>} : memref<16x196xf32, #tpu.memory_space<vmem>>, vector<1x14xf32>,
    %c0_518 = arith.constant 0 : index
    %c12_519 = arith.constant 12 : index
    %c1_520 = arith.constant 1 : index
    %328 = vector.load %arg1[%c0_518, %c12_519, %c1_520] : memref<2x16x16xf32, #tpu.memory_space<vmem>>, vector<1x1x14xf32>
    %329 = vector.shape_cast %328 : vector<1x1x14xf32> to vector<1x14xf32>
    %c7_521 = arith.constant 7 : index
    %c140_522 = arith.constant 140 : index
    %330 = vector.load %arg5[%c7_521, %c140_522] : memref<16x196xf32, #tpu.memory_space<vmem>>, vector<1x14xf32>
    tpu.vector_store %arg5[%c7_521, %c140_522], %329 {strides = array<i32>} : memref<16x196xf32, #tpu.memory_space<vmem>>, vector<1x14xf32>,
    %c0_523 = arith.constant 0 : index
    %c13_524 = arith.constant 13 : index
    %c1_525 = arith.constant 1 : index
    %331 = vector.load %arg1[%c0_523, %c13_524, %c1_525] : memref<2x16x16xf32, #tpu.memory_space<vmem>>, vector<1x1x14xf32>
    %332 = vector.shape_cast %331 : vector<1x1x14xf32> to vector<1x14xf32>
    %c7_526 = arith.constant 7 : index
    %c154_527 = arith.constant 154 : index
    %333 = vector.load %arg5[%c7_526, %c154_527] : memref<16x196xf32, #tpu.memory_space<vmem>>, vector<1x14xf32>
    tpu.vector_store %arg5[%c7_526, %c154_527], %332 {strides = array<i32>} : memref<16x196xf32, #tpu.memory_space<vmem>>, vector<1x14xf32>,
    %c0_528 = arith.constant 0 : index
    %c14_529 = arith.constant 14 : index
    %c1_530 = arith.constant 1 : index
    %334 = vector.load %arg1[%c0_528, %c14_529, %c1_530] : memref<2x16x16xf32, #tpu.memory_space<vmem>>, vector<1x1x14xf32>
    %335 = vector.shape_cast %334 : vector<1x1x14xf32> to vector<1x14xf32>
    %c7_531 = arith.constant 7 : index
    %c168_532 = arith.constant 168 : index
    %336 = vector.load %arg5[%c7_531, %c168_532] : memref<16x196xf32, #tpu.memory_space<vmem>>, vector<1x14xf32>
    tpu.vector_store %arg5[%c7_531, %c168_532], %335 {strides = array<i32>} : memref<16x196xf32, #tpu.memory_space<vmem>>, vector<1x14xf32>,
    %c0_533 = arith.constant 0 : index
    %c15_534 = arith.constant 15 : index
    %c1_535 = arith.constant 1 : index
    %337 = vector.load %arg1[%c0_533, %c15_534, %c1_535] : memref<2x16x16xf32, #tpu.memory_space<vmem>>, vector<1x1x14xf32>
    %338 = vector.shape_cast %337 : vector<1x1x14xf32> to vector<1x14xf32>
    %c7_536 = arith.constant 7 : index
    %c182_537 = arith.constant 182 : index
    %339 = vector.load %arg5[%c7_536, %c182_537] : memref<16x196xf32, #tpu.memory_space<vmem>>, vector<1x14xf32>
    tpu.vector_store %arg5[%c7_536, %c182_537], %338 {strides = array<i32>} : memref<16x196xf32, #tpu.memory_space<vmem>>, vector<1x14xf32>,
    %c0_538 = arith.constant 0 : index
    %c2_539 = arith.constant 2 : index
    %c2_540 = arith.constant 2 : index
    %340 = vector.load %arg1[%c0_538, %c2_539, %c2_540] : memref<2x16x16xf32, #tpu.memory_space<vmem>>, vector<1x1x14xf32>
    %341 = vector.shape_cast %340 : vector<1x1x14xf32> to vector<1x14xf32>
    %c8_541 = arith.constant 8 : index
    %c0_542 = arith.constant 0 : index
    %342 = vector.load %arg5[%c8_541, %c0_542] : memref<16x196xf32, #tpu.memory_space<vmem>>, vector<1x14xf32>
    tpu.vector_store %arg5[%c8_541, %c0_542], %341 {strides = array<i32>} : memref<16x196xf32, #tpu.memory_space<vmem>>, vector<1x14xf32>,
    %c0_543 = arith.constant 0 : index
    %c3_544 = arith.constant 3 : index
    %c2_545 = arith.constant 2 : index
    %343 = vector.load %arg1[%c0_543, %c3_544, %c2_545] : memref<2x16x16xf32, #tpu.memory_space<vmem>>, vector<1x1x14xf32>
    %344 = vector.shape_cast %343 : vector<1x1x14xf32> to vector<1x14xf32>
    %c8_546 = arith.constant 8 : index
    %c14_547 = arith.constant 14 : index
    %345 = vector.load %arg5[%c8_546, %c14_547] : memref<16x196xf32, #tpu.memory_space<vmem>>, vector<1x14xf32>
    tpu.vector_store %arg5[%c8_546, %c14_547], %344 {strides = array<i32>} : memref<16x196xf32, #tpu.memory_space<vmem>>, vector<1x14xf32>,
    %c0_548 = arith.constant 0 : index
    %c4_549 = arith.constant 4 : index
    %c2_550 = arith.constant 2 : index
    %346 = vector.load %arg1[%c0_548, %c4_549, %c2_550] : memref<2x16x16xf32, #tpu.memory_space<vmem>>, vector<1x1x14xf32>
    %347 = vector.shape_cast %346 : vector<1x1x14xf32> to vector<1x14xf32>
    %c8_551 = arith.constant 8 : index
    %c28_552 = arith.constant 28 : index
    %348 = vector.load %arg5[%c8_551, %c28_552] : memref<16x196xf32, #tpu.memory_space<vmem>>, vector<1x14xf32>
    tpu.vector_store %arg5[%c8_551, %c28_552], %347 {strides = array<i32>} : memref<16x196xf32, #tpu.memory_space<vmem>>, vector<1x14xf32>,
    %c0_553 = arith.constant 0 : index
    %c5_554 = arith.constant 5 : index
    %c2_555 = arith.constant 2 : index
    %349 = vector.load %arg1[%c0_553, %c5_554, %c2_555] : memref<2x16x16xf32, #tpu.memory_space<vmem>>, vector<1x1x14xf32>
    %350 = vector.shape_cast %349 : vector<1x1x14xf32> to vector<1x14xf32>
    %c8_556 = arith.constant 8 : index
    %c42_557 = arith.constant 42 : index
    %351 = vector.load %arg5[%c8_556, %c42_557] : memref<16x196xf32, #tpu.memory_space<vmem>>, vector<1x14xf32>
    tpu.vector_store %arg5[%c8_556, %c42_557], %350 {strides = array<i32>} : memref<16x196xf32, #tpu.memory_space<vmem>>, vector<1x14xf32>,
    %c0_558 = arith.constant 0 : index
    %c6_559 = arith.constant 6 : index
    %c2_560 = arith.constant 2 : index
    %352 = vector.load %arg1[%c0_558, %c6_559, %c2_560] : memref<2x16x16xf32, #tpu.memory_space<vmem>>, vector<1x1x14xf32>
    %353 = vector.shape_cast %352 : vector<1x1x14xf32> to vector<1x14xf32>
    %c8_561 = arith.constant 8 : index
    %c56_562 = arith.constant 56 : index
    %354 = vector.load %arg5[%c8_561, %c56_562] : memref<16x196xf32, #tpu.memory_space<vmem>>, vector<1x14xf32>
    tpu.vector_store %arg5[%c8_561, %c56_562], %353 {strides = array<i32>} : memref<16x196xf32, #tpu.memory_space<vmem>>, vector<1x14xf32>,
    %c0_563 = arith.constant 0 : index
    %c7_564 = arith.constant 7 : index
    %c2_565 = arith.constant 2 : index
    %355 = vector.load %arg1[%c0_563, %c7_564, %c2_565] : memref<2x16x16xf32, #tpu.memory_space<vmem>>, vector<1x1x14xf32>
    %356 = vector.shape_cast %355 : vector<1x1x14xf32> to vector<1x14xf32>
    %c8_566 = arith.constant 8 : index
    %c70_567 = arith.constant 70 : index
    %357 = vector.load %arg5[%c8_566, %c70_567] : memref<16x196xf32, #tpu.memory_space<vmem>>, vector<1x14xf32>
    tpu.vector_store %arg5[%c8_566, %c70_567], %356 {strides = array<i32>} : memref<16x196xf32, #tpu.memory_space<vmem>>, vector<1x14xf32>,
    %c0_568 = arith.constant 0 : index
    %c8_569 = arith.constant 8 : index
    %c2_570 = arith.constant 2 : index
    %358 = vector.load %arg1[%c0_568, %c8_569, %c2_570] : memref<2x16x16xf32, #tpu.memory_space<vmem>>, vector<1x1x14xf32>
    %359 = vector.shape_cast %358 : vector<1x1x14xf32> to vector<1x14xf32>
    %c8_571 = arith.constant 8 : index
    %c84_572 = arith.constant 84 : index
    %360 = vector.load %arg5[%c8_571, %c84_572] : memref<16x196xf32, #tpu.memory_space<vmem>>, vector<1x14xf32>
    tpu.vector_store %arg5[%c8_571, %c84_572], %359 {strides = array<i32>} : memref<16x196xf32, #tpu.memory_space<vmem>>, vector<1x14xf32>,
    %c0_573 = arith.constant 0 : index
    %c9_574 = arith.constant 9 : index
    %c2_575 = arith.constant 2 : index
    %361 = vector.load %arg1[%c0_573, %c9_574, %c2_575] : memref<2x16x16xf32, #tpu.memory_space<vmem>>, vector<1x1x14xf32>
    %362 = vector.shape_cast %361 : vector<1x1x14xf32> to vector<1x14xf32>
    %c8_576 = arith.constant 8 : index
    %c98_577 = arith.constant 98 : index
    %363 = vector.load %arg5[%c8_576, %c98_577] : memref<16x196xf32, #tpu.memory_space<vmem>>, vector<1x14xf32>
    tpu.vector_store %arg5[%c8_576, %c98_577], %362 {strides = array<i32>} : memref<16x196xf32, #tpu.memory_space<vmem>>, vector<1x14xf32>,
    %c0_578 = arith.constant 0 : index
    %c10_579 = arith.constant 10 : index
    %c2_580 = arith.constant 2 : index
    %364 = vector.load %arg1[%c0_578, %c10_579, %c2_580] : memref<2x16x16xf32, #tpu.memory_space<vmem>>, vector<1x1x14xf32>
    %365 = vector.shape_cast %364 : vector<1x1x14xf32> to vector<1x14xf32>
    %c8_581 = arith.constant 8 : index
    %c112_582 = arith.constant 112 : index
    %366 = vector.load %arg5[%c8_581, %c112_582] : memref<16x196xf32, #tpu.memory_space<vmem>>, vector<1x14xf32>
    tpu.vector_store %arg5[%c8_581, %c112_582], %365 {strides = array<i32>} : memref<16x196xf32, #tpu.memory_space<vmem>>, vector<1x14xf32>,
    %c0_583 = arith.constant 0 : index
    %c11_584 = arith.constant 11 : index
    %c2_585 = arith.constant 2 : index
    %367 = vector.load %arg1[%c0_583, %c11_584, %c2_585] : memref<2x16x16xf32, #tpu.memory_space<vmem>>, vector<1x1x14xf32>
    %368 = vector.shape_cast %367 : vector<1x1x14xf32> to vector<1x14xf32>
    %c8_586 = arith.constant 8 : index
    %c126_587 = arith.constant 126 : index
    %369 = vector.load %arg5[%c8_586, %c126_587] : memref<16x196xf32, #tpu.memory_space<vmem>>, vector<1x14xf32>
    tpu.vector_store %arg5[%c8_586, %c126_587], %368 {strides = array<i32>} : memref<16x196xf32, #tpu.memory_space<vmem>>, vector<1x14xf32>,
    %c0_588 = arith.constant 0 : index
    %c12_589 = arith.constant 12 : index
    %c2_590 = arith.constant 2 : index
    %370 = vector.load %arg1[%c0_588, %c12_589, %c2_590] : memref<2x16x16xf32, #tpu.memory_space<vmem>>, vector<1x1x14xf32>
    %371 = vector.shape_cast %370 : vector<1x1x14xf32> to vector<1x14xf32>
    %c8_591 = arith.constant 8 : index
    %c140_592 = arith.constant 140 : index
    %372 = vector.load %arg5[%c8_591, %c140_592] : memref<16x196xf32, #tpu.memory_space<vmem>>, vector<1x14xf32>
    tpu.vector_store %arg5[%c8_591, %c140_592], %371 {strides = array<i32>} : memref<16x196xf32, #tpu.memory_space<vmem>>, vector<1x14xf32>,
    %c0_593 = arith.constant 0 : index
    %c13_594 = arith.constant 13 : index
    %c2_595 = arith.constant 2 : index
    %373 = vector.load %arg1[%c0_593, %c13_594, %c2_595] : memref<2x16x16xf32, #tpu.memory_space<vmem>>, vector<1x1x14xf32>
    %374 = vector.shape_cast %373 : vector<1x1x14xf32> to vector<1x14xf32>
    %c8_596 = arith.constant 8 : index
    %c154_597 = arith.constant 154 : index
    %375 = vector.load %arg5[%c8_596, %c154_597] : memref<16x196xf32, #tpu.memory_space<vmem>>, vector<1x14xf32>
    tpu.vector_store %arg5[%c8_596, %c154_597], %374 {strides = array<i32>} : memref<16x196xf32, #tpu.memory_space<vmem>>, vector<1x14xf32>,
    %c0_598 = arith.constant 0 : index
    %c14_599 = arith.constant 14 : index
    %c2_600 = arith.constant 2 : index
    %376 = vector.load %arg1[%c0_598, %c14_599, %c2_600] : memref<2x16x16xf32, #tpu.memory_space<vmem>>, vector<1x1x14xf32>
    %377 = vector.shape_cast %376 : vector<1x1x14xf32> to vector<1x14xf32>
    %c8_601 = arith.constant 8 : index
    %c168_602 = arith.constant 168 : index
    %378 = vector.load %arg5[%c8_601, %c168_602] : memref<16x196xf32, #tpu.memory_space<vmem>>, vector<1x14xf32>
    tpu.vector_store %arg5[%c8_601, %c168_602], %377 {strides = array<i32>} : memref<16x196xf32, #tpu.memory_space<vmem>>, vector<1x14xf32>,
    %c0_603 = arith.constant 0 : index
    %c15_604 = arith.constant 15 : index
    %c2_605 = arith.constant 2 : index
    %379 = vector.load %arg1[%c0_603, %c15_604, %c2_605] : memref<2x16x16xf32, #tpu.memory_space<vmem>>, vector<1x1x14xf32>
    %380 = vector.shape_cast %379 : vector<1x1x14xf32> to vector<1x14xf32>
    %c8_606 = arith.constant 8 : index
    %c182_607 = arith.constant 182 : index
    %381 = vector.load %arg5[%c8_606, %c182_607] : memref<16x196xf32, #tpu.memory_space<vmem>>, vector<1x14xf32>
    tpu.vector_store %arg5[%c8_606, %c182_607], %380 {strides = array<i32>} : memref<16x196xf32, #tpu.memory_space<vmem>>, vector<1x14xf32>,
    %c0_608 = arith.constant 0 : index
    %c0_609 = arith.constant 0 : index
    %382 = vector.load %arg5[%c0_608, %c0_609] : memref<16x196xf32, #tpu.memory_space<vmem>>, vector<16x196xf32>
    %cst_610 = arith.constant dense<0.000000e+00> : vector<32x196xf32>
    %383 = tpu.matmul %2, %382, %cst_610 {dimension_numbers = #tpu.dot_dimension_numbers<[1], [0], [0], [1], [0, 0, 1, 1], [], []>} : vector<32x16xf32>, vector<16x196xf32>, vector<32x196xf32> -> vector<32x196xf32>
    %384 = vector.broadcast %3 : vector<32x1xf32> to vector<32x196xf32>
    %385 = arith.addf %383, %384 : vector<32x196xf32>
    %c0_611 = arith.constant 0 : index
    %c0_612 = arith.constant 0 : index
    %c0_613 = arith.constant 0 : index
    %386 = vector.load %arg4[%c0_611, %c0_612, %c0_613] : memref<2x32x196xf32, #tpu.memory_space<vmem>>, vector<1x32x196xf32>
    %387 = vector.shape_cast %386 : vector<1x32x196xf32> to vector<32x196xf32>
    %388 = vector.shape_cast %385 : vector<32x196xf32> to vector<1x32x196xf32>
    tpu.vector_store %arg4[%c0_611, %c0_612, %c0_613], %388 {strides = array<i32>} : memref<2x32x196xf32, #tpu.memory_space<vmem>>, vector<1x32x196xf32>,
    %c1_614 = arith.constant 1 : index
    %c0_615 = arith.constant 0 : index
    %c0_616 = arith.constant 0 : index
    %389 = vector.load %arg1[%c1_614, %c0_615, %c0_616] : memref<2x16x16xf32, #tpu.memory_space<vmem>>, vector<1x1x14xf32>
    %390 = vector.shape_cast %389 : vector<1x1x14xf32> to vector<1x14xf32>
    %c0_617 = arith.constant 0 : index
    %c0_618 = arith.constant 0 : index
    %391 = vector.load %arg5[%c0_617, %c0_618] : memref<16x196xf32, #tpu.memory_space<vmem>>, vector<1x14xf32>
    tpu.vector_store %arg5[%c0_617, %c0_618], %390 {strides = array<i32>} : memref<16x196xf32, #tpu.memory_space<vmem>>, vector<1x14xf32>,
    %c1_619 = arith.constant 1 : index
    %c1_620 = arith.constant 1 : index
    %c0_621 = arith.constant 0 : index
    %392 = vector.load %arg1[%c1_619, %c1_620, %c0_621] : memref<2x16x16xf32, #tpu.memory_space<vmem>>, vector<1x1x14xf32>
    %393 = vector.shape_cast %392 : vector<1x1x14xf32> to vector<1x14xf32>
    %c0_622 = arith.constant 0 : index
    %c14_623 = arith.constant 14 : index
    %394 = vector.load %arg5[%c0_622, %c14_623] : memref<16x196xf32, #tpu.memory_space<vmem>>, vector<1x14xf32>
    tpu.vector_store %arg5[%c0_622, %c14_623], %393 {strides = array<i32>} : memref<16x196xf32, #tpu.memory_space<vmem>>, vector<1x14xf32>,
    %c1_624 = arith.constant 1 : index
    %c2_625 = arith.constant 2 : index
    %c0_626 = arith.constant 0 : index
    %395 = vector.load %arg1[%c1_624, %c2_625, %c0_626] : memref<2x16x16xf32, #tpu.memory_space<vmem>>, vector<1x1x14xf32>
    %396 = vector.shape_cast %395 : vector<1x1x14xf32> to vector<1x14xf32>
    %c0_627 = arith.constant 0 : index
    %c28_628 = arith.constant 28 : index
    %397 = vector.load %arg5[%c0_627, %c28_628] : memref<16x196xf32, #tpu.memory_space<vmem>>, vector<1x14xf32>
    tpu.vector_store %arg5[%c0_627, %c28_628], %396 {strides = array<i32>} : memref<16x196xf32, #tpu.memory_space<vmem>>, vector<1x14xf32>,
    %c1_629 = arith.constant 1 : index
    %c3_630 = arith.constant 3 : index
    %c0_631 = arith.constant 0 : index
    %398 = vector.load %arg1[%c1_629, %c3_630, %c0_631] : memref<2x16x16xf32, #tpu.memory_space<vmem>>, vector<1x1x14xf32>
    %399 = vector.shape_cast %398 : vector<1x1x14xf32> to vector<1x14xf32>
    %c0_632 = arith.constant 0 : index
    %c42_633 = arith.constant 42 : index
    %400 = vector.load %arg5[%c0_632, %c42_633] : memref<16x196xf32, #tpu.memory_space<vmem>>, vector<1x14xf32>
    tpu.vector_store %arg5[%c0_632, %c42_633], %399 {strides = array<i32>} : memref<16x196xf32, #tpu.memory_space<vmem>>, vector<1x14xf32>,
    %c1_634 = arith.constant 1 : index
    %c4_635 = arith.constant 4 : index
    %c0_636 = arith.constant 0 : index
    %401 = vector.load %arg1[%c1_634, %c4_635, %c0_636] : memref<2x16x16xf32, #tpu.memory_space<vmem>>, vector<1x1x14xf32>
    %402 = vector.shape_cast %401 : vector<1x1x14xf32> to vector<1x14xf32>
    %c0_637 = arith.constant 0 : index
    %c56_638 = arith.constant 56 : index
    %403 = vector.load %arg5[%c0_637, %c56_638] : memref<16x196xf32, #tpu.memory_space<vmem>>, vector<1x14xf32>
    tpu.vector_store %arg5[%c0_637, %c56_638], %402 {strides = array<i32>} : memref<16x196xf32, #tpu.memory_space<vmem>>, vector<1x14xf32>,
    %c1_639 = arith.constant 1 : index
    %c5_640 = arith.constant 5 : index
    %c0_641 = arith.constant 0 : index
    %404 = vector.load %arg1[%c1_639, %c5_640, %c0_641] : memref<2x16x16xf32, #tpu.memory_space<vmem>>, vector<1x1x14xf32>
    %405 = vector.shape_cast %404 : vector<1x1x14xf32> to vector<1x14xf32>
    %c0_642 = arith.constant 0 : index
    %c70_643 = arith.constant 70 : index
    %406 = vector.load %arg5[%c0_642, %c70_643] : memref<16x196xf32, #tpu.memory_space<vmem>>, vector<1x14xf32>
    tpu.vector_store %arg5[%c0_642, %c70_643], %405 {strides = array<i32>} : memref<16x196xf32, #tpu.memory_space<vmem>>, vector<1x14xf32>,
    %c1_644 = arith.constant 1 : index
    %c6_645 = arith.constant 6 : index
    %c0_646 = arith.constant 0 : index
    %407 = vector.load %arg1[%c1_644, %c6_645, %c0_646] : memref<2x16x16xf32, #tpu.memory_space<vmem>>, vector<1x1x14xf32>
    %408 = vector.shape_cast %407 : vector<1x1x14xf32> to vector<1x14xf32>
    %c0_647 = arith.constant 0 : index
    %c84_648 = arith.constant 84 : index
    %409 = vector.load %arg5[%c0_647, %c84_648] : memref<16x196xf32, #tpu.memory_space<vmem>>, vector<1x14xf32>
    tpu.vector_store %arg5[%c0_647, %c84_648], %408 {strides = array<i32>} : memref<16x196xf32, #tpu.memory_space<vmem>>, vector<1x14xf32>,
    %c1_649 = arith.constant 1 : index
    %c7_650 = arith.constant 7 : index
    %c0_651 = arith.constant 0 : index
    %410 = vector.load %arg1[%c1_649, %c7_650, %c0_651] : memref<2x16x16xf32, #tpu.memory_space<vmem>>, vector<1x1x14xf32>
    %411 = vector.shape_cast %410 : vector<1x1x14xf32> to vector<1x14xf32>
    %c0_652 = arith.constant 0 : index
    %c98_653 = arith.constant 98 : index
    %412 = vector.load %arg5[%c0_652, %c98_653] : memref<16x196xf32, #tpu.memory_space<vmem>>, vector<1x14xf32>
    tpu.vector_store %arg5[%c0_652, %c98_653], %411 {strides = array<i32>} : memref<16x196xf32, #tpu.memory_space<vmem>>, vector<1x14xf32>,
    %c1_654 = arith.constant 1 : index
    %c8_655 = arith.constant 8 : index
    %c0_656 = arith.constant 0 : index
    %413 = vector.load %arg1[%c1_654, %c8_655, %c0_656] : memref<2x16x16xf32, #tpu.memory_space<vmem>>, vector<1x1x14xf32>
    %414 = vector.shape_cast %413 : vector<1x1x14xf32> to vector<1x14xf32>
    %c0_657 = arith.constant 0 : index
    %c112_658 = arith.constant 112 : index
    %415 = vector.load %arg5[%c0_657, %c112_658] : memref<16x196xf32, #tpu.memory_space<vmem>>, vector<1x14xf32>
    tpu.vector_store %arg5[%c0_657, %c112_658], %414 {strides = array<i32>} : memref<16x196xf32, #tpu.memory_space<vmem>>, vector<1x14xf32>,
    %c1_659 = arith.constant 1 : index
    %c9_660 = arith.constant 9 : index
    %c0_661 = arith.constant 0 : index
    %416 = vector.load %arg1[%c1_659, %c9_660, %c0_661] : memref<2x16x16xf32, #tpu.memory_space<vmem>>, vector<1x1x14xf32>
    %417 = vector.shape_cast %416 : vector<1x1x14xf32> to vector<1x14xf32>
    %c0_662 = arith.constant 0 : index
    %c126_663 = arith.constant 126 : index
    %418 = vector.load %arg5[%c0_662, %c126_663] : memref<16x196xf32, #tpu.memory_space<vmem>>, vector<1x14xf32>
    tpu.vector_store %arg5[%c0_662, %c126_663], %417 {strides = array<i32>} : memref<16x196xf32, #tpu.memory_space<vmem>>, vector<1x14xf32>,
    %c1_664 = arith.constant 1 : index
    %c10_665 = arith.constant 10 : index
    %c0_666 = arith.constant 0 : index
    %419 = vector.load %arg1[%c1_664, %c10_665, %c0_666] : memref<2x16x16xf32, #tpu.memory_space<vmem>>, vector<1x1x14xf32>
    %420 = vector.shape_cast %419 : vector<1x1x14xf32> to vector<1x14xf32>
    %c0_667 = arith.constant 0 : index
    %c140_668 = arith.constant 140 : index
    %421 = vector.load %arg5[%c0_667, %c140_668] : memref<16x196xf32, #tpu.memory_space<vmem>>, vector<1x14xf32>
    tpu.vector_store %arg5[%c0_667, %c140_668], %420 {strides = array<i32>} : memref<16x196xf32, #tpu.memory_space<vmem>>, vector<1x14xf32>,
    %c1_669 = arith.constant 1 : index
    %c11_670 = arith.constant 11 : index
    %c0_671 = arith.constant 0 : index
    %422 = vector.load %arg1[%c1_669, %c11_670, %c0_671] : memref<2x16x16xf32, #tpu.memory_space<vmem>>, vector<1x1x14xf32>
    %423 = vector.shape_cast %422 : vector<1x1x14xf32> to vector<1x14xf32>
    %c0_672 = arith.constant 0 : index
    %c154_673 = arith.constant 154 : index
    %424 = vector.load %arg5[%c0_672, %c154_673] : memref<16x196xf32, #tpu.memory_space<vmem>>, vector<1x14xf32>
    tpu.vector_store %arg5[%c0_672, %c154_673], %423 {strides = array<i32>} : memref<16x196xf32, #tpu.memory_space<vmem>>, vector<1x14xf32>,
    %c1_674 = arith.constant 1 : index
    %c12_675 = arith.constant 12 : index
    %c0_676 = arith.constant 0 : index
    %425 = vector.load %arg1[%c1_674, %c12_675, %c0_676] : memref<2x16x16xf32, #tpu.memory_space<vmem>>, vector<1x1x14xf32>
    %426 = vector.shape_cast %425 : vector<1x1x14xf32> to vector<1x14xf32>
    %c0_677 = arith.constant 0 : index
    %c168_678 = arith.constant 168 : index
    %427 = vector.load %arg5[%c0_677, %c168_678] : memref<16x196xf32, #tpu.memory_space<vmem>>, vector<1x14xf32>
    tpu.vector_store %arg5[%c0_677, %c168_678], %426 {strides = array<i32>} : memref<16x196xf32, #tpu.memory_space<vmem>>, vector<1x14xf32>,
    %c1_679 = arith.constant 1 : index
    %c13_680 = arith.constant 13 : index
    %c0_681 = arith.constant 0 : index
    %428 = vector.load %arg1[%c1_679, %c13_680, %c0_681] : memref<2x16x16xf32, #tpu.memory_space<vmem>>, vector<1x1x14xf32>
    %429 = vector.shape_cast %428 : vector<1x1x14xf32> to vector<1x14xf32>
    %c0_682 = arith.constant 0 : index
    %c182_683 = arith.constant 182 : index
    %430 = vector.load %arg5[%c0_682, %c182_683] : memref<16x196xf32, #tpu.memory_space<vmem>>, vector<1x14xf32>
    tpu.vector_store %arg5[%c0_682, %c182_683], %429 {strides = array<i32>} : memref<16x196xf32, #tpu.memory_space<vmem>>, vector<1x14xf32>,
    %c1_684 = arith.constant 1 : index
    %c0_685 = arith.constant 0 : index
    %c1_686 = arith.constant 1 : index
    %431 = vector.load %arg1[%c1_684, %c0_685, %c1_686] : memref<2x16x16xf32, #tpu.memory_space<vmem>>, vector<1x1x14xf32>
    %432 = vector.shape_cast %431 : vector<1x1x14xf32> to vector<1x14xf32>
    %c1_687 = arith.constant 1 : index
    %c0_688 = arith.constant 0 : index
    %433 = vector.load %arg5[%c1_687, %c0_688] : memref<16x196xf32, #tpu.memory_space<vmem>>, vector<1x14xf32>
    tpu.vector_store %arg5[%c1_687, %c0_688], %432 {strides = array<i32>} : memref<16x196xf32, #tpu.memory_space<vmem>>, vector<1x14xf32>,
    %c1_689 = arith.constant 1 : index
    %c1_690 = arith.constant 1 : index
    %c1_691 = arith.constant 1 : index
    %434 = vector.load %arg1[%c1_689, %c1_690, %c1_691] : memref<2x16x16xf32, #tpu.memory_space<vmem>>, vector<1x1x14xf32>
    %435 = vector.shape_cast %434 : vector<1x1x14xf32> to vector<1x14xf32>
    %c1_692 = arith.constant 1 : index
    %c14_693 = arith.constant 14 : index
    %436 = vector.load %arg5[%c1_692, %c14_693] : memref<16x196xf32, #tpu.memory_space<vmem>>, vector<1x14xf32>
    tpu.vector_store %arg5[%c1_692, %c14_693], %435 {strides = array<i32>} : memref<16x196xf32, #tpu.memory_space<vmem>>, vector<1x14xf32>,
    %c1_694 = arith.constant 1 : index
    %c2_695 = arith.constant 2 : index
    %c1_696 = arith.constant 1 : index
    %437 = vector.load %arg1[%c1_694, %c2_695, %c1_696] : memref<2x16x16xf32, #tpu.memory_space<vmem>>, vector<1x1x14xf32>
    %438 = vector.shape_cast %437 : vector<1x1x14xf32> to vector<1x14xf32>
    %c1_697 = arith.constant 1 : index
    %c28_698 = arith.constant 28 : index
    %439 = vector.load %arg5[%c1_697, %c28_698] : memref<16x196xf32, #tpu.memory_space<vmem>>, vector<1x14xf32>
    tpu.vector_store %arg5[%c1_697, %c28_698], %438 {strides = array<i32>} : memref<16x196xf32, #tpu.memory_space<vmem>>, vector<1x14xf32>,
    %c1_699 = arith.constant 1 : index
    %c3_700 = arith.constant 3 : index
    %c1_701 = arith.constant 1 : index
    %440 = vector.load %arg1[%c1_699, %c3_700, %c1_701] : memref<2x16x16xf32, #tpu.memory_space<vmem>>, vector<1x1x14xf32>
    %441 = vector.shape_cast %440 : vector<1x1x14xf32> to vector<1x14xf32>
    %c1_702 = arith.constant 1 : index
    %c42_703 = arith.constant 42 : index
    %442 = vector.load %arg5[%c1_702, %c42_703] : memref<16x196xf32, #tpu.memory_space<vmem>>, vector<1x14xf32>
    tpu.vector_store %arg5[%c1_702, %c42_703], %441 {strides = array<i32>} : memref<16x196xf32, #tpu.memory_space<vmem>>, vector<1x14xf32>,
    %c1_704 = arith.constant 1 : index
    %c4_705 = arith.constant 4 : index
    %c1_706 = arith.constant 1 : index
    %443 = vector.load %arg1[%c1_704, %c4_705, %c1_706] : memref<2x16x16xf32, #tpu.memory_space<vmem>>, vector<1x1x14xf32>
    %444 = vector.shape_cast %443 : vector<1x1x14xf32> to vector<1x14xf32>
    %c1_707 = arith.constant 1 : index
    %c56_708 = arith.constant 56 : index
    %445 = vector.load %arg5[%c1_707, %c56_708] : memref<16x196xf32, #tpu.memory_space<vmem>>, vector<1x14xf32>
    tpu.vector_store %arg5[%c1_707, %c56_708], %444 {strides = array<i32>} : memref<16x196xf32, #tpu.memory_space<vmem>>, vector<1x14xf32>,
    %c1_709 = arith.constant 1 : index
    %c5_710 = arith.constant 5 : index
    %c1_711 = arith.constant 1 : index
    %446 = vector.load %arg1[%c1_709, %c5_710, %c1_711] : memref<2x16x16xf32, #tpu.memory_space<vmem>>, vector<1x1x14xf32>
    %447 = vector.shape_cast %446 : vector<1x1x14xf32> to vector<1x14xf32>
    %c1_712 = arith.constant 1 : index
    %c70_713 = arith.constant 70 : index
    %448 = vector.load %arg5[%c1_712, %c70_713] : memref<16x196xf32, #tpu.memory_space<vmem>>, vector<1x14xf32>
    tpu.vector_store %arg5[%c1_712, %c70_713], %447 {strides = array<i32>} : memref<16x196xf32, #tpu.memory_space<vmem>>, vector<1x14xf32>,
    %c1_714 = arith.constant 1 : index
    %c6_715 = arith.constant 6 : index
    %c1_716 = arith.constant 1 : index
    %449 = vector.load %arg1[%c1_714, %c6_715, %c1_716] : memref<2x16x16xf32, #tpu.memory_space<vmem>>, vector<1x1x14xf32>
    %450 = vector.shape_cast %449 : vector<1x1x14xf32> to vector<1x14xf32>
    %c1_717 = arith.constant 1 : index
    %c84_718 = arith.constant 84 : index
    %451 = vector.load %arg5[%c1_717, %c84_718] : memref<16x196xf32, #tpu.memory_space<vmem>>, vector<1x14xf32>
    tpu.vector_store %arg5[%c1_717, %c84_718], %450 {strides = array<i32>} : memref<16x196xf32, #tpu.memory_space<vmem>>, vector<1x14xf32>,
    %c1_719 = arith.constant 1 : index
    %c7_720 = arith.constant 7 : index
    %c1_721 = arith.constant 1 : index
    %452 = vector.load %arg1[%c1_719, %c7_720, %c1_721] : memref<2x16x16xf32, #tpu.memory_space<vmem>>, vector<1x1x14xf32>
    %453 = vector.shape_cast %452 : vector<1x1x14xf32> to vector<1x14xf32>
    %c1_722 = arith.constant 1 : index
    %c98_723 = arith.constant 98 : index
    %454 = vector.load %arg5[%c1_722, %c98_723] : memref<16x196xf32, #tpu.memory_space<vmem>>, vector<1x14xf32>
    tpu.vector_store %arg5[%c1_722, %c98_723], %453 {strides = array<i32>} : memref<16x196xf32, #tpu.memory_space<vmem>>, vector<1x14xf32>,
    %c1_724 = arith.constant 1 : index
    %c8_725 = arith.constant 8 : index
    %c1_726 = arith.constant 1 : index
    %455 = vector.load %arg1[%c1_724, %c8_725, %c1_726] : memref<2x16x16xf32, #tpu.memory_space<vmem>>, vector<1x1x14xf32>
    %456 = vector.shape_cast %455 : vector<1x1x14xf32> to vector<1x14xf32>
    %c1_727 = arith.constant 1 : index
    %c112_728 = arith.constant 112 : index
    %457 = vector.load %arg5[%c1_727, %c112_728] : memref<16x196xf32, #tpu.memory_space<vmem>>, vector<1x14xf32>
    tpu.vector_store %arg5[%c1_727, %c112_728], %456 {strides = array<i32>} : memref<16x196xf32, #tpu.memory_space<vmem>>, vector<1x14xf32>,
    %c1_729 = arith.constant 1 : index
    %c9_730 = arith.constant 9 : index
    %c1_731 = arith.constant 1 : index
    %458 = vector.load %arg1[%c1_729, %c9_730, %c1_731] : memref<2x16x16xf32, #tpu.memory_space<vmem>>, vector<1x1x14xf32>
    %459 = vector.shape_cast %458 : vector<1x1x14xf32> to vector<1x14xf32>
    %c1_732 = arith.constant 1 : index
    %c126_733 = arith.constant 126 : index
    %460 = vector.load %arg5[%c1_732, %c126_733] : memref<16x196xf32, #tpu.memory_space<vmem>>, vector<1x14xf32>
    tpu.vector_store %arg5[%c1_732, %c126_733], %459 {strides = array<i32>} : memref<16x196xf32, #tpu.memory_space<vmem>>, vector<1x14xf32>,
    %c1_734 = arith.constant 1 : index
    %c10_735 = arith.constant 10 : index
    %c1_736 = arith.constant 1 : index
    %461 = vector.load %arg1[%c1_734, %c10_735, %c1_736] : memref<2x16x16xf32, #tpu.memory_space<vmem>>, vector<1x1x14xf32>
    %462 = vector.shape_cast %461 : vector<1x1x14xf32> to vector<1x14xf32>
    %c1_737 = arith.constant 1 : index
    %c140_738 = arith.constant 140 : index
    %463 = vector.load %arg5[%c1_737, %c140_738] : memref<16x196xf32, #tpu.memory_space<vmem>>, vector<1x14xf32>
    tpu.vector_store %arg5[%c1_737, %c140_738], %462 {strides = array<i32>} : memref<16x196xf32, #tpu.memory_space<vmem>>, vector<1x14xf32>,
    %c1_739 = arith.constant 1 : index
    %c11_740 = arith.constant 11 : index
    %c1_741 = arith.constant 1 : index
    %464 = vector.load %arg1[%c1_739, %c11_740, %c1_741] : memref<2x16x16xf32, #tpu.memory_space<vmem>>, vector<1x1x14xf32>
    %465 = vector.shape_cast %464 : vector<1x1x14xf32> to vector<1x14xf32>
    %c1_742 = arith.constant 1 : index
    %c154_743 = arith.constant 154 : index
    %466 = vector.load %arg5[%c1_742, %c154_743] : memref<16x196xf32, #tpu.memory_space<vmem>>, vector<1x14xf32>
    tpu.vector_store %arg5[%c1_742, %c154_743], %465 {strides = array<i32>} : memref<16x196xf32, #tpu.memory_space<vmem>>, vector<1x14xf32>,
    %c1_744 = arith.constant 1 : index
    %c12_745 = arith.constant 12 : index
    %c1_746 = arith.constant 1 : index
    %467 = vector.load %arg1[%c1_744, %c12_745, %c1_746] : memref<2x16x16xf32, #tpu.memory_space<vmem>>, vector<1x1x14xf32>
    %468 = vector.shape_cast %467 : vector<1x1x14xf32> to vector<1x14xf32>
    %c1_747 = arith.constant 1 : index
    %c168_748 = arith.constant 168 : index
    %469 = vector.load %arg5[%c1_747, %c168_748] : memref<16x196xf32, #tpu.memory_space<vmem>>, vector<1x14xf32>
    tpu.vector_store %arg5[%c1_747, %c168_748], %468 {strides = array<i32>} : memref<16x196xf32, #tpu.memory_space<vmem>>, vector<1x14xf32>,
    %c1_749 = arith.constant 1 : index
    %c13_750 = arith.constant 13 : index
    %c1_751 = arith.constant 1 : index
    %470 = vector.load %arg1[%c1_749, %c13_750, %c1_751] : memref<2x16x16xf32, #tpu.memory_space<vmem>>, vector<1x1x14xf32>
    %471 = vector.shape_cast %470 : vector<1x1x14xf32> to vector<1x14xf32>
    %c1_752 = arith.constant 1 : index
    %c182_753 = arith.constant 182 : index
    %472 = vector.load %arg5[%c1_752, %c182_753] : memref<16x196xf32, #tpu.memory_space<vmem>>, vector<1x14xf32>
    tpu.vector_store %arg5[%c1_752, %c182_753], %471 {strides = array<i32>} : memref<16x196xf32, #tpu.memory_space<vmem>>, vector<1x14xf32>,
    %c1_754 = arith.constant 1 : index
    %c0_755 = arith.constant 0 : index
    %c2_756 = arith.constant 2 : index
    %473 = vector.load %arg1[%c1_754, %c0_755, %c2_756] : memref<2x16x16xf32, #tpu.memory_space<vmem>>, vector<1x1x14xf32>
    %474 = vector.shape_cast %473 : vector<1x1x14xf32> to vector<1x14xf32>
    %c2_757 = arith.constant 2 : index
    %c0_758 = arith.constant 0 : index
    %475 = vector.load %arg5[%c2_757, %c0_758] : memref<16x196xf32, #tpu.memory_space<vmem>>, vector<1x14xf32>
    tpu.vector_store %arg5[%c2_757, %c0_758], %474 {strides = array<i32>} : memref<16x196xf32, #tpu.memory_space<vmem>>, vector<1x14xf32>,
    %c1_759 = arith.constant 1 : index
    %c1_760 = arith.constant 1 : index
    %c2_761 = arith.constant 2 : index
    %476 = vector.load %arg1[%c1_759, %c1_760, %c2_761] : memref<2x16x16xf32, #tpu.memory_space<vmem>>, vector<1x1x14xf32>
    %477 = vector.shape_cast %476 : vector<1x1x14xf32> to vector<1x14xf32>
    %c2_762 = arith.constant 2 : index
    %c14_763 = arith.constant 14 : index
    %478 = vector.load %arg5[%c2_762, %c14_763] : memref<16x196xf32, #tpu.memory_space<vmem>>, vector<1x14xf32>
    tpu.vector_store %arg5[%c2_762, %c14_763], %477 {strides = array<i32>} : memref<16x196xf32, #tpu.memory_space<vmem>>, vector<1x14xf32>,
    %c1_764 = arith.constant 1 : index
    %c2_765 = arith.constant 2 : index
    %c2_766 = arith.constant 2 : index
    %479 = vector.load %arg1[%c1_764, %c2_765, %c2_766] : memref<2x16x16xf32, #tpu.memory_space<vmem>>, vector<1x1x14xf32>
    %480 = vector.shape_cast %479 : vector<1x1x14xf32> to vector<1x14xf32>
    %c2_767 = arith.constant 2 : index
    %c28_768 = arith.constant 28 : index
    %481 = vector.load %arg5[%c2_767, %c28_768] : memref<16x196xf32, #tpu.memory_space<vmem>>, vector<1x14xf32>
    tpu.vector_store %arg5[%c2_767, %c28_768], %480 {strides = array<i32>} : memref<16x196xf32, #tpu.memory_space<vmem>>, vector<1x14xf32>,
    %c1_769 = arith.constant 1 : index
    %c3_770 = arith.constant 3 : index
    %c2_771 = arith.constant 2 : index
    %482 = vector.load %arg1[%c1_769, %c3_770, %c2_771] : memref<2x16x16xf32, #tpu.memory_space<vmem>>, vector<1x1x14xf32>
    %483 = vector.shape_cast %482 : vector<1x1x14xf32> to vector<1x14xf32>
    %c2_772 = arith.constant 2 : index
    %c42_773 = arith.constant 42 : index
    %484 = vector.load %arg5[%c2_772, %c42_773] : memref<16x196xf32, #tpu.memory_space<vmem>>, vector<1x14xf32>
    tpu.vector_store %arg5[%c2_772, %c42_773], %483 {strides = array<i32>} : memref<16x196xf32, #tpu.memory_space<vmem>>, vector<1x14xf32>,
    %c1_774 = arith.constant 1 : index
    %c4_775 = arith.constant 4 : index
    %c2_776 = arith.constant 2 : index
    %485 = vector.load %arg1[%c1_774, %c4_775, %c2_776] : memref<2x16x16xf32, #tpu.memory_space<vmem>>, vector<1x1x14xf32>
    %486 = vector.shape_cast %485 : vector<1x1x14xf32> to vector<1x14xf32>
    %c2_777 = arith.constant 2 : index
    %c56_778 = arith.constant 56 : index
    %487 = vector.load %arg5[%c2_777, %c56_778] : memref<16x196xf32, #tpu.memory_space<vmem>>, vector<1x14xf32>
    tpu.vector_store %arg5[%c2_777, %c56_778], %486 {strides = array<i32>} : memref<16x196xf32, #tpu.memory_space<vmem>>, vector<1x14xf32>,
    %c1_779 = arith.constant 1 : index
    %c5_780 = arith.constant 5 : index
    %c2_781 = arith.constant 2 : index
    %488 = vector.load %arg1[%c1_779, %c5_780, %c2_781] : memref<2x16x16xf32, #tpu.memory_space<vmem>>, vector<1x1x14xf32>
    %489 = vector.shape_cast %488 : vector<1x1x14xf32> to vector<1x14xf32>
    %c2_782 = arith.constant 2 : index
    %c70_783 = arith.constant 70 : index
    %490 = vector.load %arg5[%c2_782, %c70_783] : memref<16x196xf32, #tpu.memory_space<vmem>>, vector<1x14xf32>
    tpu.vector_store %arg5[%c2_782, %c70_783], %489 {strides = array<i32>} : memref<16x196xf32, #tpu.memory_space<vmem>>, vector<1x14xf32>,
    %c1_784 = arith.constant 1 : index
    %c6_785 = arith.constant 6 : index
    %c2_786 = arith.constant 2 : index
    %491 = vector.load %arg1[%c1_784, %c6_785, %c2_786] : memref<2x16x16xf32, #tpu.memory_space<vmem>>, vector<1x1x14xf32>
    %492 = vector.shape_cast %491 : vector<1x1x14xf32> to vector<1x14xf32>
    %c2_787 = arith.constant 2 : index
    %c84_788 = arith.constant 84 : index
    %493 = vector.load %arg5[%c2_787, %c84_788] : memref<16x196xf32, #tpu.memory_space<vmem>>, vector<1x14xf32>
    tpu.vector_store %arg5[%c2_787, %c84_788], %492 {strides = array<i32>} : memref<16x196xf32, #tpu.memory_space<vmem>>, vector<1x14xf32>,
    %c1_789 = arith.constant 1 : index
    %c7_790 = arith.constant 7 : index
    %c2_791 = arith.constant 2 : index
    %494 = vector.load %arg1[%c1_789, %c7_790, %c2_791] : memref<2x16x16xf32, #tpu.memory_space<vmem>>, vector<1x1x14xf32>
    %495 = vector.shape_cast %494 : vector<1x1x14xf32> to vector<1x14xf32>
    %c2_792 = arith.constant 2 : index
    %c98_793 = arith.constant 98 : index
    %496 = vector.load %arg5[%c2_792, %c98_793] : memref<16x196xf32, #tpu.memory_space<vmem>>, vector<1x14xf32>
    tpu.vector_store %arg5[%c2_792, %c98_793], %495 {strides = array<i32>} : memref<16x196xf32, #tpu.memory_space<vmem>>, vector<1x14xf32>,
    %c1_794 = arith.constant 1 : index
    %c8_795 = arith.constant 8 : index
    %c2_796 = arith.constant 2 : index
    %497 = vector.load %arg1[%c1_794, %c8_795, %c2_796] : memref<2x16x16xf32, #tpu.memory_space<vmem>>, vector<1x1x14xf32>
    %498 = vector.shape_cast %497 : vector<1x1x14xf32> to vector<1x14xf32>
    %c2_797 = arith.constant 2 : index
    %c112_798 = arith.constant 112 : index
    %499 = vector.load %arg5[%c2_797, %c112_798] : memref<16x196xf32, #tpu.memory_space<vmem>>, vector<1x14xf32>
    tpu.vector_store %arg5[%c2_797, %c112_798], %498 {strides = array<i32>} : memref<16x196xf32, #tpu.memory_space<vmem>>, vector<1x14xf32>,
    %c1_799 = arith.constant 1 : index
    %c9_800 = arith.constant 9 : index
    %c2_801 = arith.constant 2 : index
    %500 = vector.load %arg1[%c1_799, %c9_800, %c2_801] : memref<2x16x16xf32, #tpu.memory_space<vmem>>, vector<1x1x14xf32>
    %501 = vector.shape_cast %500 : vector<1x1x14xf32> to vector<1x14xf32>
    %c2_802 = arith.constant 2 : index
    %c126_803 = arith.constant 126 : index
    %502 = vector.load %arg5[%c2_802, %c126_803] : memref<16x196xf32, #tpu.memory_space<vmem>>, vector<1x14xf32>
    tpu.vector_store %arg5[%c2_802, %c126_803], %501 {strides = array<i32>} : memref<16x196xf32, #tpu.memory_space<vmem>>, vector<1x14xf32>,
    %c1_804 = arith.constant 1 : index
    %c10_805 = arith.constant 10 : index
    %c2_806 = arith.constant 2 : index
    %503 = vector.load %arg1[%c1_804, %c10_805, %c2_806] : memref<2x16x16xf32, #tpu.memory_space<vmem>>, vector<1x1x14xf32>
    %504 = vector.shape_cast %503 : vector<1x1x14xf32> to vector<1x14xf32>
    %c2_807 = arith.constant 2 : index
    %c140_808 = arith.constant 140 : index
    %505 = vector.load %arg5[%c2_807, %c140_808] : memref<16x196xf32, #tpu.memory_space<vmem>>, vector<1x14xf32>
    tpu.vector_store %arg5[%c2_807, %c140_808], %504 {strides = array<i32>} : memref<16x196xf32, #tpu.memory_space<vmem>>, vector<1x14xf32>,
    %c1_809 = arith.constant 1 : index
    %c11_810 = arith.constant 11 : index
    %c2_811 = arith.constant 2 : index
    %506 = vector.load %arg1[%c1_809, %c11_810, %c2_811] : memref<2x16x16xf32, #tpu.memory_space<vmem>>, vector<1x1x14xf32>
    %507 = vector.shape_cast %506 : vector<1x1x14xf32> to vector<1x14xf32>
    %c2_812 = arith.constant 2 : index
    %c154_813 = arith.constant 154 : index
    %508 = vector.load %arg5[%c2_812, %c154_813] : memref<16x196xf32, #tpu.memory_space<vmem>>, vector<1x14xf32>
    tpu.vector_store %arg5[%c2_812, %c154_813], %507 {strides = array<i32>} : memref<16x196xf32, #tpu.memory_space<vmem>>, vector<1x14xf32>,
    %c1_814 = arith.constant 1 : index
    %c12_815 = arith.constant 12 : index
    %c2_816 = arith.constant 2 : index
    %509 = vector.load %arg1[%c1_814, %c12_815, %c2_816] : memref<2x16x16xf32, #tpu.memory_space<vmem>>, vector<1x1x14xf32>
    %510 = vector.shape_cast %509 : vector<1x1x14xf32> to vector<1x14xf32>
    %c2_817 = arith.constant 2 : index
    %c168_818 = arith.constant 168 : index
    %511 = vector.load %arg5[%c2_817, %c168_818] : memref<16x196xf32, #tpu.memory_space<vmem>>, vector<1x14xf32>
    tpu.vector_store %arg5[%c2_817, %c168_818], %510 {strides = array<i32>} : memref<16x196xf32, #tpu.memory_space<vmem>>, vector<1x14xf32>,
    %c1_819 = arith.constant 1 : index
    %c13_820 = arith.constant 13 : index
    %c2_821 = arith.constant 2 : index
    %512 = vector.load %arg1[%c1_819, %c13_820, %c2_821] : memref<2x16x16xf32, #tpu.memory_space<vmem>>, vector<1x1x14xf32>
    %513 = vector.shape_cast %512 : vector<1x1x14xf32> to vector<1x14xf32>
    %c2_822 = arith.constant 2 : index
    %c182_823 = arith.constant 182 : index
    %514 = vector.load %arg5[%c2_822, %c182_823] : memref<16x196xf32, #tpu.memory_space<vmem>>, vector<1x14xf32>
    tpu.vector_store %arg5[%c2_822, %c182_823], %513 {strides = array<i32>} : memref<16x196xf32, #tpu.memory_space<vmem>>, vector<1x14xf32>,
    %c1_824 = arith.constant 1 : index
    %c1_825 = arith.constant 1 : index
    %c0_826 = arith.constant 0 : index
    %515 = vector.load %arg1[%c1_824, %c1_825, %c0_826] : memref<2x16x16xf32, #tpu.memory_space<vmem>>, vector<1x1x14xf32>
    %516 = vector.shape_cast %515 : vector<1x1x14xf32> to vector<1x14xf32>
    %c3_827 = arith.constant 3 : index
    %c0_828 = arith.constant 0 : index
    %517 = vector.load %arg5[%c3_827, %c0_828] : memref<16x196xf32, #tpu.memory_space<vmem>>, vector<1x14xf32>
    tpu.vector_store %arg5[%c3_827, %c0_828], %516 {strides = array<i32>} : memref<16x196xf32, #tpu.memory_space<vmem>>, vector<1x14xf32>,
    %c1_829 = arith.constant 1 : index
    %c2_830 = arith.constant 2 : index
    %c0_831 = arith.constant 0 : index
    %518 = vector.load %arg1[%c1_829, %c2_830, %c0_831] : memref<2x16x16xf32, #tpu.memory_space<vmem>>, vector<1x1x14xf32>
    %519 = vector.shape_cast %518 : vector<1x1x14xf32> to vector<1x14xf32>
    %c3_832 = arith.constant 3 : index
    %c14_833 = arith.constant 14 : index
    %520 = vector.load %arg5[%c3_832, %c14_833] : memref<16x196xf32, #tpu.memory_space<vmem>>, vector<1x14xf32>
    tpu.vector_store %arg5[%c3_832, %c14_833], %519 {strides = array<i32>} : memref<16x196xf32, #tpu.memory_space<vmem>>, vector<1x14xf32>,
    %c1_834 = arith.constant 1 : index
    %c3_835 = arith.constant 3 : index
    %c0_836 = arith.constant 0 : index
    %521 = vector.load %arg1[%c1_834, %c3_835, %c0_836] : memref<2x16x16xf32, #tpu.memory_space<vmem>>, vector<1x1x14xf32>
    %522 = vector.shape_cast %521 : vector<1x1x14xf32> to vector<1x14xf32>
    %c3_837 = arith.constant 3 : index
    %c28_838 = arith.constant 28 : index
    %523 = vector.load %arg5[%c3_837, %c28_838] : memref<16x196xf32, #tpu.memory_space<vmem>>, vector<1x14xf32>
    tpu.vector_store %arg5[%c3_837, %c28_838], %522 {strides = array<i32>} : memref<16x196xf32, #tpu.memory_space<vmem>>, vector<1x14xf32>,
    %c1_839 = arith.constant 1 : index
    %c4_840 = arith.constant 4 : index
    %c0_841 = arith.constant 0 : index
    %524 = vector.load %arg1[%c1_839, %c4_840, %c0_841] : memref<2x16x16xf32, #tpu.memory_space<vmem>>, vector<1x1x14xf32>
    %525 = vector.shape_cast %524 : vector<1x1x14xf32> to vector<1x14xf32>
    %c3_842 = arith.constant 3 : index
    %c42_843 = arith.constant 42 : index
    %526 = vector.load %arg5[%c3_842, %c42_843] : memref<16x196xf32, #tpu.memory_space<vmem>>, vector<1x14xf32>
    tpu.vector_store %arg5[%c3_842, %c42_843], %525 {strides = array<i32>} : memref<16x196xf32, #tpu.memory_space<vmem>>, vector<1x14xf32>,
    %c1_844 = arith.constant 1 : index
    %c5_845 = arith.constant 5 : index
    %c0_846 = arith.constant 0 : index
    %527 = vector.load %arg1[%c1_844, %c5_845, %c0_846] : memref<2x16x16xf32, #tpu.memory_space<vmem>>, vector<1x1x14xf32>
    %528 = vector.shape_cast %527 : vector<1x1x14xf32> to vector<1x14xf32>
    %c3_847 = arith.constant 3 : index
    %c56_848 = arith.constant 56 : index
    %529 = vector.load %arg5[%c3_847, %c56_848] : memref<16x196xf32, #tpu.memory_space<vmem>>, vector<1x14xf32>
    tpu.vector_store %arg5[%c3_847, %c56_848], %528 {strides = array<i32>} : memref<16x196xf32, #tpu.memory_space<vmem>>, vector<1x14xf32>,
    %c1_849 = arith.constant 1 : index
    %c6_850 = arith.constant 6 : index
    %c0_851 = arith.constant 0 : index
    %530 = vector.load %arg1[%c1_849, %c6_850, %c0_851] : memref<2x16x16xf32, #tpu.memory_space<vmem>>, vector<1x1x14xf32>
    %531 = vector.shape_cast %530 : vector<1x1x14xf32> to vector<1x14xf32>
    %c3_852 = arith.constant 3 : index
    %c70_853 = arith.constant 70 : index
    %532 = vector.load %arg5[%c3_852, %c70_853] : memref<16x196xf32, #tpu.memory_space<vmem>>, vector<1x14xf32>
    tpu.vector_store %arg5[%c3_852, %c70_853], %531 {strides = array<i32>} : memref<16x196xf32, #tpu.memory_space<vmem>>, vector<1x14xf32>,
    %c1_854 = arith.constant 1 : index
    %c7_855 = arith.constant 7 : index
    %c0_856 = arith.constant 0 : index
    %533 = vector.load %arg1[%c1_854, %c7_855, %c0_856] : memref<2x16x16xf32, #tpu.memory_space<vmem>>, vector<1x1x14xf32>
    %534 = vector.shape_cast %533 : vector<1x1x14xf32> to vector<1x14xf32>
    %c3_857 = arith.constant 3 : index
    %c84_858 = arith.constant 84 : index
    %535 = vector.load %arg5[%c3_857, %c84_858] : memref<16x196xf32, #tpu.memory_space<vmem>>, vector<1x14xf32>
    tpu.vector_store %arg5[%c3_857, %c84_858], %534 {strides = array<i32>} : memref<16x196xf32, #tpu.memory_space<vmem>>, vector<1x14xf32>,
    %c1_859 = arith.constant 1 : index
    %c8_860 = arith.constant 8 : index
    %c0_861 = arith.constant 0 : index
    %536 = vector.load %arg1[%c1_859, %c8_860, %c0_861] : memref<2x16x16xf32, #tpu.memory_space<vmem>>, vector<1x1x14xf32>
    %537 = vector.shape_cast %536 : vector<1x1x14xf32> to vector<1x14xf32>
    %c3_862 = arith.constant 3 : index
    %c98_863 = arith.constant 98 : index
    %538 = vector.load %arg5[%c3_862, %c98_863] : memref<16x196xf32, #tpu.memory_space<vmem>>, vector<1x14xf32>
    tpu.vector_store %arg5[%c3_862, %c98_863], %537 {strides = array<i32>} : memref<16x196xf32, #tpu.memory_space<vmem>>, vector<1x14xf32>,
    %c1_864 = arith.constant 1 : index
    %c9_865 = arith.constant 9 : index
    %c0_866 = arith.constant 0 : index
    %539 = vector.load %arg1[%c1_864, %c9_865, %c0_866] : memref<2x16x16xf32, #tpu.memory_space<vmem>>, vector<1x1x14xf32>
    %540 = vector.shape_cast %539 : vector<1x1x14xf32> to vector<1x14xf32>
    %c3_867 = arith.constant 3 : index
    %c112_868 = arith.constant 112 : index
    %541 = vector.load %arg5[%c3_867, %c112_868] : memref<16x196xf32, #tpu.memory_space<vmem>>, vector<1x14xf32>
    tpu.vector_store %arg5[%c3_867, %c112_868], %540 {strides = array<i32>} : memref<16x196xf32, #tpu.memory_space<vmem>>, vector<1x14xf32>,
    %c1_869 = arith.constant 1 : index
    %c10_870 = arith.constant 10 : index
    %c0_871 = arith.constant 0 : index
    %542 = vector.load %arg1[%c1_869, %c10_870, %c0_871] : memref<2x16x16xf32, #tpu.memory_space<vmem>>, vector<1x1x14xf32>
    %543 = vector.shape_cast %542 : vector<1x1x14xf32> to vector<1x14xf32>
    %c3_872 = arith.constant 3 : index
    %c126_873 = arith.constant 126 : index
    %544 = vector.load %arg5[%c3_872, %c126_873] : memref<16x196xf32, #tpu.memory_space<vmem>>, vector<1x14xf32>
    tpu.vector_store %arg5[%c3_872, %c126_873], %543 {strides = array<i32>} : memref<16x196xf32, #tpu.memory_space<vmem>>, vector<1x14xf32>,
    %c1_874 = arith.constant 1 : index
    %c11_875 = arith.constant 11 : index
    %c0_876 = arith.constant 0 : index
    %545 = vector.load %arg1[%c1_874, %c11_875, %c0_876] : memref<2x16x16xf32, #tpu.memory_space<vmem>>, vector<1x1x14xf32>
    %546 = vector.shape_cast %545 : vector<1x1x14xf32> to vector<1x14xf32>
    %c3_877 = arith.constant 3 : index
    %c140_878 = arith.constant 140 : index
    %547 = vector.load %arg5[%c3_877, %c140_878] : memref<16x196xf32, #tpu.memory_space<vmem>>, vector<1x14xf32>
    tpu.vector_store %arg5[%c3_877, %c140_878], %546 {strides = array<i32>} : memref<16x196xf32, #tpu.memory_space<vmem>>, vector<1x14xf32>,
    %c1_879 = arith.constant 1 : index
    %c12_880 = arith.constant 12 : index
    %c0_881 = arith.constant 0 : index
    %548 = vector.load %arg1[%c1_879, %c12_880, %c0_881] : memref<2x16x16xf32, #tpu.memory_space<vmem>>, vector<1x1x14xf32>
    %549 = vector.shape_cast %548 : vector<1x1x14xf32> to vector<1x14xf32>
    %c3_882 = arith.constant 3 : index
    %c154_883 = arith.constant 154 : index
    %550 = vector.load %arg5[%c3_882, %c154_883] : memref<16x196xf32, #tpu.memory_space<vmem>>, vector<1x14xf32>
    tpu.vector_store %arg5[%c3_882, %c154_883], %549 {strides = array<i32>} : memref<16x196xf32, #tpu.memory_space<vmem>>, vector<1x14xf32>,
    %c1_884 = arith.constant 1 : index
    %c13_885 = arith.constant 13 : index
    %c0_886 = arith.constant 0 : index
    %551 = vector.load %arg1[%c1_884, %c13_885, %c0_886] : memref<2x16x16xf32, #tpu.memory_space<vmem>>, vector<1x1x14xf32>
    %552 = vector.shape_cast %551 : vector<1x1x14xf32> to vector<1x14xf32>
    %c3_887 = arith.constant 3 : index
    %c168_888 = arith.constant 168 : index
    %553 = vector.load %arg5[%c3_887, %c168_888] : memref<16x196xf32, #tpu.memory_space<vmem>>, vector<1x14xf32>
    tpu.vector_store %arg5[%c3_887, %c168_888], %552 {strides = array<i32>} : memref<16x196xf32, #tpu.memory_space<vmem>>, vector<1x14xf32>,
    %c1_889 = arith.constant 1 : index
    %c14_890 = arith.constant 14 : index
    %c0_891 = arith.constant 0 : index
    %554 = vector.load %arg1[%c1_889, %c14_890, %c0_891] : memref<2x16x16xf32, #tpu.memory_space<vmem>>, vector<1x1x14xf32>
    %555 = vector.shape_cast %554 : vector<1x1x14xf32> to vector<1x14xf32>
    %c3_892 = arith.constant 3 : index
    %c182_893 = arith.constant 182 : index
    %556 = vector.load %arg5[%c3_892, %c182_893] : memref<16x196xf32, #tpu.memory_space<vmem>>, vector<1x14xf32>
    tpu.vector_store %arg5[%c3_892, %c182_893], %555 {strides = array<i32>} : memref<16x196xf32, #tpu.memory_space<vmem>>, vector<1x14xf32>,
    %c1_894 = arith.constant 1 : index
    %c1_895 = arith.constant 1 : index
    %c1_896 = arith.constant 1 : index
    %557 = vector.load %arg1[%c1_894, %c1_895, %c1_896] : memref<2x16x16xf32, #tpu.memory_space<vmem>>, vector<1x1x14xf32>
    %558 = vector.shape_cast %557 : vector<1x1x14xf32> to vector<1x14xf32>
    %c4_897 = arith.constant 4 : index
    %c0_898 = arith.constant 0 : index
    %559 = vector.load %arg5[%c4_897, %c0_898] : memref<16x196xf32, #tpu.memory_space<vmem>>, vector<1x14xf32>
    tpu.vector_store %arg5[%c4_897, %c0_898], %558 {strides = array<i32>} : memref<16x196xf32, #tpu.memory_space<vmem>>, vector<1x14xf32>,
    %c1_899 = arith.constant 1 : index
    %c2_900 = arith.constant 2 : index
    %c1_901 = arith.constant 1 : index
    %560 = vector.load %arg1[%c1_899, %c2_900, %c1_901] : memref<2x16x16xf32, #tpu.memory_space<vmem>>, vector<1x1x14xf32>
    %561 = vector.shape_cast %560 : vector<1x1x14xf32> to vector<1x14xf32>
    %c4_902 = arith.constant 4 : index
    %c14_903 = arith.constant 14 : index
    %562 = vector.load %arg5[%c4_902, %c14_903] : memref<16x196xf32, #tpu.memory_space<vmem>>, vector<1x14xf32>
    tpu.vector_store %arg5[%c4_902, %c14_903], %561 {strides = array<i32>} : memref<16x196xf32, #tpu.memory_space<vmem>>, vector<1x14xf32>,
    %c1_904 = arith.constant 1 : index
    %c3_905 = arith.constant 3 : index
    %c1_906 = arith.constant 1 : index
    %563 = vector.load %arg1[%c1_904, %c3_905, %c1_906] : memref<2x16x16xf32, #tpu.memory_space<vmem>>, vector<1x1x14xf32>
    %564 = vector.shape_cast %563 : vector<1x1x14xf32> to vector<1x14xf32>
    %c4_907 = arith.constant 4 : index
    %c28_908 = arith.constant 28 : index
    %565 = vector.load %arg5[%c4_907, %c28_908] : memref<16x196xf32, #tpu.memory_space<vmem>>, vector<1x14xf32>
    tpu.vector_store %arg5[%c4_907, %c28_908], %564 {strides = array<i32>} : memref<16x196xf32, #tpu.memory_space<vmem>>, vector<1x14xf32>,
    %c1_909 = arith.constant 1 : index
    %c4_910 = arith.constant 4 : index
    %c1_911 = arith.constant 1 : index
    %566 = vector.load %arg1[%c1_909, %c4_910, %c1_911] : memref<2x16x16xf32, #tpu.memory_space<vmem>>, vector<1x1x14xf32>
    %567 = vector.shape_cast %566 : vector<1x1x14xf32> to vector<1x14xf32>
    %c4_912 = arith.constant 4 : index
    %c42_913 = arith.constant 42 : index
    %568 = vector.load %arg5[%c4_912, %c42_913] : memref<16x196xf32, #tpu.memory_space<vmem>>, vector<1x14xf32>
    tpu.vector_store %arg5[%c4_912, %c42_913], %567 {strides = array<i32>} : memref<16x196xf32, #tpu.memory_space<vmem>>, vector<1x14xf32>,
    %c1_914 = arith.constant 1 : index
    %c5_915 = arith.constant 5 : index
    %c1_916 = arith.constant 1 : index
    %569 = vector.load %arg1[%c1_914, %c5_915, %c1_916] : memref<2x16x16xf32, #tpu.memory_space<vmem>>, vector<1x1x14xf32>
    %570 = vector.shape_cast %569 : vector<1x1x14xf32> to vector<1x14xf32>
    %c4_917 = arith.constant 4 : index
    %c56_918 = arith.constant 56 : index
    %571 = vector.load %arg5[%c4_917, %c56_918] : memref<16x196xf32, #tpu.memory_space<vmem>>, vector<1x14xf32>
    tpu.vector_store %arg5[%c4_917, %c56_918], %570 {strides = array<i32>} : memref<16x196xf32, #tpu.memory_space<vmem>>, vector<1x14xf32>,
    %c1_919 = arith.constant 1 : index
    %c6_920 = arith.constant 6 : index
    %c1_921 = arith.constant 1 : index
    %572 = vector.load %arg1[%c1_919, %c6_920, %c1_921] : memref<2x16x16xf32, #tpu.memory_space<vmem>>, vector<1x1x14xf32>
    %573 = vector.shape_cast %572 : vector<1x1x14xf32> to vector<1x14xf32>
    %c4_922 = arith.constant 4 : index
    %c70_923 = arith.constant 70 : index
    %574 = vector.load %arg5[%c4_922, %c70_923] : memref<16x196xf32, #tpu.memory_space<vmem>>, vector<1x14xf32>
    tpu.vector_store %arg5[%c4_922, %c70_923], %573 {strides = array<i32>} : memref<16x196xf32, #tpu.memory_space<vmem>>, vector<1x14xf32>,
    %c1_924 = arith.constant 1 : index
    %c7_925 = arith.constant 7 : index
    %c1_926 = arith.constant 1 : index
    %575 = vector.load %arg1[%c1_924, %c7_925, %c1_926] : memref<2x16x16xf32, #tpu.memory_space<vmem>>, vector<1x1x14xf32>
    %576 = vector.shape_cast %575 : vector<1x1x14xf32> to vector<1x14xf32>
    %c4_927 = arith.constant 4 : index
    %c84_928 = arith.constant 84 : index
    %577 = vector.load %arg5[%c4_927, %c84_928] : memref<16x196xf32, #tpu.memory_space<vmem>>, vector<1x14xf32>
    tpu.vector_store %arg5[%c4_927, %c84_928], %576 {strides = array<i32>} : memref<16x196xf32, #tpu.memory_space<vmem>>, vector<1x14xf32>,
    %c1_929 = arith.constant 1 : index
    %c8_930 = arith.constant 8 : index
    %c1_931 = arith.constant 1 : index
    %578 = vector.load %arg1[%c1_929, %c8_930, %c1_931] : memref<2x16x16xf32, #tpu.memory_space<vmem>>, vector<1x1x14xf32>
    %579 = vector.shape_cast %578 : vector<1x1x14xf32> to vector<1x14xf32>
    %c4_932 = arith.constant 4 : index
    %c98_933 = arith.constant 98 : index
    %580 = vector.load %arg5[%c4_932, %c98_933] : memref<16x196xf32, #tpu.memory_space<vmem>>, vector<1x14xf32>
    tpu.vector_store %arg5[%c4_932, %c98_933], %579 {strides = array<i32>} : memref<16x196xf32, #tpu.memory_space<vmem>>, vector<1x14xf32>,
    %c1_934 = arith.constant 1 : index
    %c9_935 = arith.constant 9 : index
    %c1_936 = arith.constant 1 : index
    %581 = vector.load %arg1[%c1_934, %c9_935, %c1_936] : memref<2x16x16xf32, #tpu.memory_space<vmem>>, vector<1x1x14xf32>
    %582 = vector.shape_cast %581 : vector<1x1x14xf32> to vector<1x14xf32>
    %c4_937 = arith.constant 4 : index
    %c112_938 = arith.constant 112 : index
    %583 = vector.load %arg5[%c4_937, %c112_938] : memref<16x196xf32, #tpu.memory_space<vmem>>, vector<1x14xf32>
    tpu.vector_store %arg5[%c4_937, %c112_938], %582 {strides = array<i32>} : memref<16x196xf32, #tpu.memory_space<vmem>>, vector<1x14xf32>,
    %c1_939 = arith.constant 1 : index
    %c10_940 = arith.constant 10 : index
    %c1_941 = arith.constant 1 : index
    %584 = vector.load %arg1[%c1_939, %c10_940, %c1_941] : memref<2x16x16xf32, #tpu.memory_space<vmem>>, vector<1x1x14xf32>
    %585 = vector.shape_cast %584 : vector<1x1x14xf32> to vector<1x14xf32>
    %c4_942 = arith.constant 4 : index
    %c126_943 = arith.constant 126 : index
    %586 = vector.load %arg5[%c4_942, %c126_943] : memref<16x196xf32, #tpu.memory_space<vmem>>, vector<1x14xf32>
    tpu.vector_store %arg5[%c4_942, %c126_943], %585 {strides = array<i32>} : memref<16x196xf32, #tpu.memory_space<vmem>>, vector<1x14xf32>,
    %c1_944 = arith.constant 1 : index
    %c11_945 = arith.constant 11 : index
    %c1_946 = arith.constant 1 : index
    %587 = vector.load %arg1[%c1_944, %c11_945, %c1_946] : memref<2x16x16xf32, #tpu.memory_space<vmem>>, vector<1x1x14xf32>
    %588 = vector.shape_cast %587 : vector<1x1x14xf32> to vector<1x14xf32>
    %c4_947 = arith.constant 4 : index
    %c140_948 = arith.constant 140 : index
    %589 = vector.load %arg5[%c4_947, %c140_948] : memref<16x196xf32, #tpu.memory_space<vmem>>, vector<1x14xf32>
    tpu.vector_store %arg5[%c4_947, %c140_948], %588 {strides = array<i32>} : memref<16x196xf32, #tpu.memory_space<vmem>>, vector<1x14xf32>,
    %c1_949 = arith.constant 1 : index
    %c12_950 = arith.constant 12 : index
    %c1_951 = arith.constant 1 : index
    %590 = vector.load %arg1[%c1_949, %c12_950, %c1_951] : memref<2x16x16xf32, #tpu.memory_space<vmem>>, vector<1x1x14xf32>
    %591 = vector.shape_cast %590 : vector<1x1x14xf32> to vector<1x14xf32>
    %c4_952 = arith.constant 4 : index
    %c154_953 = arith.constant 154 : index
    %592 = vector.load %arg5[%c4_952, %c154_953] : memref<16x196xf32, #tpu.memory_space<vmem>>, vector<1x14xf32>
    tpu.vector_store %arg5[%c4_952, %c154_953], %591 {strides = array<i32>} : memref<16x196xf32, #tpu.memory_space<vmem>>, vector<1x14xf32>,
    %c1_954 = arith.constant 1 : index
    %c13_955 = arith.constant 13 : index
    %c1_956 = arith.constant 1 : index
    %593 = vector.load %arg1[%c1_954, %c13_955, %c1_956] : memref<2x16x16xf32, #tpu.memory_space<vmem>>, vector<1x1x14xf32>
    %594 = vector.shape_cast %593 : vector<1x1x14xf32> to vector<1x14xf32>
    %c4_957 = arith.constant 4 : index
    %c168_958 = arith.constant 168 : index
    %595 = vector.load %arg5[%c4_957, %c168_958] : memref<16x196xf32, #tpu.memory_space<vmem>>, vector<1x14xf32>
    tpu.vector_store %arg5[%c4_957, %c168_958], %594 {strides = array<i32>} : memref<16x196xf32, #tpu.memory_space<vmem>>, vector<1x14xf32>,
    %c1_959 = arith.constant 1 : index
    %c14_960 = arith.constant 14 : index
    %c1_961 = arith.constant 1 : index
    %596 = vector.load %arg1[%c1_959, %c14_960, %c1_961] : memref<2x16x16xf32, #tpu.memory_space<vmem>>, vector<1x1x14xf32>
    %597 = vector.shape_cast %596 : vector<1x1x14xf32> to vector<1x14xf32>
    %c4_962 = arith.constant 4 : index
    %c182_963 = arith.constant 182 : index
    %598 = vector.load %arg5[%c4_962, %c182_963] : memref<16x196xf32, #tpu.memory_space<vmem>>, vector<1x14xf32>
    tpu.vector_store %arg5[%c4_962, %c182_963], %597 {strides = array<i32>} : memref<16x196xf32, #tpu.memory_space<vmem>>, vector<1x14xf32>,
    %c1_964 = arith.constant 1 : index
    %c1_965 = arith.constant 1 : index
    %c2_966 = arith.constant 2 : index
    %599 = vector.load %arg1[%c1_964, %c1_965, %c2_966] : memref<2x16x16xf32, #tpu.memory_space<vmem>>, vector<1x1x14xf32>
    %600 = vector.shape_cast %599 : vector<1x1x14xf32> to vector<1x14xf32>
    %c5_967 = arith.constant 5 : index
    %c0_968 = arith.constant 0 : index
    %601 = vector.load %arg5[%c5_967, %c0_968] : memref<16x196xf32, #tpu.memory_space<vmem>>, vector<1x14xf32>
    tpu.vector_store %arg5[%c5_967, %c0_968], %600 {strides = array<i32>} : memref<16x196xf32, #tpu.memory_space<vmem>>, vector<1x14xf32>,
    %c1_969 = arith.constant 1 : index
    %c2_970 = arith.constant 2 : index
    %c2_971 = arith.constant 2 : index
    %602 = vector.load %arg1[%c1_969, %c2_970, %c2_971] : memref<2x16x16xf32, #tpu.memory_space<vmem>>, vector<1x1x14xf32>
    %603 = vector.shape_cast %602 : vector<1x1x14xf32> to vector<1x14xf32>
    %c5_972 = arith.constant 5 : index
    %c14_973 = arith.constant 14 : index
    %604 = vector.load %arg5[%c5_972, %c14_973] : memref<16x196xf32, #tpu.memory_space<vmem>>, vector<1x14xf32>
    tpu.vector_store %arg5[%c5_972, %c14_973], %603 {strides = array<i32>} : memref<16x196xf32, #tpu.memory_space<vmem>>, vector<1x14xf32>,
    %c1_974 = arith.constant 1 : index
    %c3_975 = arith.constant 3 : index
    %c2_976 = arith.constant 2 : index
    %605 = vector.load %arg1[%c1_974, %c3_975, %c2_976] : memref<2x16x16xf32, #tpu.memory_space<vmem>>, vector<1x1x14xf32>
    %606 = vector.shape_cast %605 : vector<1x1x14xf32> to vector<1x14xf32>
    %c5_977 = arith.constant 5 : index
    %c28_978 = arith.constant 28 : index
    %607 = vector.load %arg5[%c5_977, %c28_978] : memref<16x196xf32, #tpu.memory_space<vmem>>, vector<1x14xf32>
    tpu.vector_store %arg5[%c5_977, %c28_978], %606 {strides = array<i32>} : memref<16x196xf32, #tpu.memory_space<vmem>>, vector<1x14xf32>,
    %c1_979 = arith.constant 1 : index
    %c4_980 = arith.constant 4 : index
    %c2_981 = arith.constant 2 : index
    %608 = vector.load %arg1[%c1_979, %c4_980, %c2_981] : memref<2x16x16xf32, #tpu.memory_space<vmem>>, vector<1x1x14xf32>
    %609 = vector.shape_cast %608 : vector<1x1x14xf32> to vector<1x14xf32>
    %c5_982 = arith.constant 5 : index
    %c42_983 = arith.constant 42 : index
    %610 = vector.load %arg5[%c5_982, %c42_983] : memref<16x196xf32, #tpu.memory_space<vmem>>, vector<1x14xf32>
    tpu.vector_store %arg5[%c5_982, %c42_983], %609 {strides = array<i32>} : memref<16x196xf32, #tpu.memory_space<vmem>>, vector<1x14xf32>,
    %c1_984 = arith.constant 1 : index
    %c5_985 = arith.constant 5 : index
    %c2_986 = arith.constant 2 : index
    %611 = vector.load %arg1[%c1_984, %c5_985, %c2_986] : memref<2x16x16xf32, #tpu.memory_space<vmem>>, vector<1x1x14xf32>
    %612 = vector.shape_cast %611 : vector<1x1x14xf32> to vector<1x14xf32>
    %c5_987 = arith.constant 5 : index
    %c56_988 = arith.constant 56 : index
    %613 = vector.load %arg5[%c5_987, %c56_988] : memref<16x196xf32, #tpu.memory_space<vmem>>, vector<1x14xf32>
    tpu.vector_store %arg5[%c5_987, %c56_988], %612 {strides = array<i32>} : memref<16x196xf32, #tpu.memory_space<vmem>>, vector<1x14xf32>,
    %c1_989 = arith.constant 1 : index
    %c6_990 = arith.constant 6 : index
    %c2_991 = arith.constant 2 : index
    %614 = vector.load %arg1[%c1_989, %c6_990, %c2_991] : memref<2x16x16xf32, #tpu.memory_space<vmem>>, vector<1x1x14xf32>
    %615 = vector.shape_cast %614 : vector<1x1x14xf32> to vector<1x14xf32>
    %c5_992 = arith.constant 5 : index
    %c70_993 = arith.constant 70 : index
    %616 = vector.load %arg5[%c5_992, %c70_993] : memref<16x196xf32, #tpu.memory_space<vmem>>, vector<1x14xf32>
    tpu.vector_store %arg5[%c5_992, %c70_993], %615 {strides = array<i32>} : memref<16x196xf32, #tpu.memory_space<vmem>>, vector<1x14xf32>,
    %c1_994 = arith.constant 1 : index
    %c7_995 = arith.constant 7 : index
    %c2_996 = arith.constant 2 : index
    %617 = vector.load %arg1[%c1_994, %c7_995, %c2_996] : memref<2x16x16xf32, #tpu.memory_space<vmem>>, vector<1x1x14xf32>
    %618 = vector.shape_cast %617 : vector<1x1x14xf32> to vector<1x14xf32>
    %c5_997 = arith.constant 5 : index
    %c84_998 = arith.constant 84 : index
    %619 = vector.load %arg5[%c5_997, %c84_998] : memref<16x196xf32, #tpu.memory_space<vmem>>, vector<1x14xf32>
    tpu.vector_store %arg5[%c5_997, %c84_998], %618 {strides = array<i32>} : memref<16x196xf32, #tpu.memory_space<vmem>>, vector<1x14xf32>,
    %c1_999 = arith.constant 1 : index
    %c8_1000 = arith.constant 8 : index
    %c2_1001 = arith.constant 2 : index
    %620 = vector.load %arg1[%c1_999, %c8_1000, %c2_1001] : memref<2x16x16xf32, #tpu.memory_space<vmem>>, vector<1x1x14xf32>
    %621 = vector.shape_cast %620 : vector<1x1x14xf32> to vector<1x14xf32>
    %c5_1002 = arith.constant 5 : index
    %c98_1003 = arith.constant 98 : index
    %622 = vector.load %arg5[%c5_1002, %c98_1003] : memref<16x196xf32, #tpu.memory_space<vmem>>, vector<1x14xf32>
    tpu.vector_store %arg5[%c5_1002, %c98_1003], %621 {strides = array<i32>} : memref<16x196xf32, #tpu.memory_space<vmem>>, vector<1x14xf32>,
    %c1_1004 = arith.constant 1 : index
    %c9_1005 = arith.constant 9 : index
    %c2_1006 = arith.constant 2 : index
    %623 = vector.load %arg1[%c1_1004, %c9_1005, %c2_1006] : memref<2x16x16xf32, #tpu.memory_space<vmem>>, vector<1x1x14xf32>
    %624 = vector.shape_cast %623 : vector<1x1x14xf32> to vector<1x14xf32>
    %c5_1007 = arith.constant 5 : index
    %c112_1008 = arith.constant 112 : index
    %625 = vector.load %arg5[%c5_1007, %c112_1008] : memref<16x196xf32, #tpu.memory_space<vmem>>, vector<1x14xf32>
    tpu.vector_store %arg5[%c5_1007, %c112_1008], %624 {strides = array<i32>} : memref<16x196xf32, #tpu.memory_space<vmem>>, vector<1x14xf32>,
    %c1_1009 = arith.constant 1 : index
    %c10_1010 = arith.constant 10 : index
    %c2_1011 = arith.constant 2 : index
    %626 = vector.load %arg1[%c1_1009, %c10_1010, %c2_1011] : memref<2x16x16xf32, #tpu.memory_space<vmem>>, vector<1x1x14xf32>
    %627 = vector.shape_cast %626 : vector<1x1x14xf32> to vector<1x14xf32>
    %c5_1012 = arith.constant 5 : index
    %c126_1013 = arith.constant 126 : index
    %628 = vector.load %arg5[%c5_1012, %c126_1013] : memref<16x196xf32, #tpu.memory_space<vmem>>, vector<1x14xf32>
    tpu.vector_store %arg5[%c5_1012, %c126_1013], %627 {strides = array<i32>} : memref<16x196xf32, #tpu.memory_space<vmem>>, vector<1x14xf32>,
    %c1_1014 = arith.constant 1 : index
    %c11_1015 = arith.constant 11 : index
    %c2_1016 = arith.constant 2 : index
    %629 = vector.load %arg1[%c1_1014, %c11_1015, %c2_1016] : memref<2x16x16xf32, #tpu.memory_space<vmem>>, vector<1x1x14xf32>
    %630 = vector.shape_cast %629 : vector<1x1x14xf32> to vector<1x14xf32>
    %c5_1017 = arith.constant 5 : index
    %c140_1018 = arith.constant 140 : index
    %631 = vector.load %arg5[%c5_1017, %c140_1018] : memref<16x196xf32, #tpu.memory_space<vmem>>, vector<1x14xf32>
    tpu.vector_store %arg5[%c5_1017, %c140_1018], %630 {strides = array<i32>} : memref<16x196xf32, #tpu.memory_space<vmem>>, vector<1x14xf32>,
    %c1_1019 = arith.constant 1 : index
    %c12_1020 = arith.constant 12 : index
    %c2_1021 = arith.constant 2 : index
    %632 = vector.load %arg1[%c1_1019, %c12_1020, %c2_1021] : memref<2x16x16xf32, #tpu.memory_space<vmem>>, vector<1x1x14xf32>
    %633 = vector.shape_cast %632 : vector<1x1x14xf32> to vector<1x14xf32>
    %c5_1022 = arith.constant 5 : index
    %c154_1023 = arith.constant 154 : index
    %634 = vector.load %arg5[%c5_1022, %c154_1023] : memref<16x196xf32, #tpu.memory_space<vmem>>, vector<1x14xf32>
    tpu.vector_store %arg5[%c5_1022, %c154_1023], %633 {strides = array<i32>} : memref<16x196xf32, #tpu.memory_space<vmem>>, vector<1x14xf32>,
    %c1_1024 = arith.constant 1 : index
    %c13_1025 = arith.constant 13 : index
    %c2_1026 = arith.constant 2 : index
    %635 = vector.load %arg1[%c1_1024, %c13_1025, %c2_1026] : memref<2x16x16xf32, #tpu.memory_space<vmem>>, vector<1x1x14xf32>
    %636 = vector.shape_cast %635 : vector<1x1x14xf32> to vector<1x14xf32>
    %c5_1027 = arith.constant 5 : index
    %c168_1028 = arith.constant 168 : index
    %637 = vector.load %arg5[%c5_1027, %c168_1028] : memref<16x196xf32, #tpu.memory_space<vmem>>, vector<1x14xf32>
    tpu.vector_store %arg5[%c5_1027, %c168_1028], %636 {strides = array<i32>} : memref<16x196xf32, #tpu.memory_space<vmem>>, vector<1x14xf32>,
    %c1_1029 = arith.constant 1 : index
    %c14_1030 = arith.constant 14 : index
    %c2_1031 = arith.constant 2 : index
    %638 = vector.load %arg1[%c1_1029, %c14_1030, %c2_1031] : memref<2x16x16xf32, #tpu.memory_space<vmem>>, vector<1x1x14xf32>
    %639 = vector.shape_cast %638 : vector<1x1x14xf32> to vector<1x14xf32>
    %c5_1032 = arith.constant 5 : index
    %c182_1033 = arith.constant 182 : index
    %640 = vector.load %arg5[%c5_1032, %c182_1033] : memref<16x196xf32, #tpu.memory_space<vmem>>, vector<1x14xf32>
    tpu.vector_store %arg5[%c5_1032, %c182_1033], %639 {strides = array<i32>} : memref<16x196xf32, #tpu.memory_space<vmem>>, vector<1x14xf32>,
    %c1_1034 = arith.constant 1 : index
    %c2_1035 = arith.constant 2 : index
    %c0_1036 = arith.constant 0 : index
    %641 = vector.load %arg1[%c1_1034, %c2_1035, %c0_1036] : memref<2x16x16xf32, #tpu.memory_space<vmem>>, vector<1x1x14xf32>
    %642 = vector.shape_cast %641 : vector<1x1x14xf32> to vector<1x14xf32>
    %c6_1037 = arith.constant 6 : index
    %c0_1038 = arith.constant 0 : index
    %643 = vector.load %arg5[%c6_1037, %c0_1038] : memref<16x196xf32, #tpu.memory_space<vmem>>, vector<1x14xf32>
    tpu.vector_store %arg5[%c6_1037, %c0_1038], %642 {strides = array<i32>} : memref<16x196xf32, #tpu.memory_space<vmem>>, vector<1x14xf32>,
    %c1_1039 = arith.constant 1 : index
    %c3_1040 = arith.constant 3 : index
    %c0_1041 = arith.constant 0 : index
    %644 = vector.load %arg1[%c1_1039, %c3_1040, %c0_1041] : memref<2x16x16xf32, #tpu.memory_space<vmem>>, vector<1x1x14xf32>
    %645 = vector.shape_cast %644 : vector<1x1x14xf32> to vector<1x14xf32>
    %c6_1042 = arith.constant 6 : index
    %c14_1043 = arith.constant 14 : index
    %646 = vector.load %arg5[%c6_1042, %c14_1043] : memref<16x196xf32, #tpu.memory_space<vmem>>, vector<1x14xf32>
    tpu.vector_store %arg5[%c6_1042, %c14_1043], %645 {strides = array<i32>} : memref<16x196xf32, #tpu.memory_space<vmem>>, vector<1x14xf32>,
    %c1_1044 = arith.constant 1 : index
    %c4_1045 = arith.constant 4 : index
    %c0_1046 = arith.constant 0 : index
    %647 = vector.load %arg1[%c1_1044, %c4_1045, %c0_1046] : memref<2x16x16xf32, #tpu.memory_space<vmem>>, vector<1x1x14xf32>
    %648 = vector.shape_cast %647 : vector<1x1x14xf32> to vector<1x14xf32>
    %c6_1047 = arith.constant 6 : index
    %c28_1048 = arith.constant 28 : index
    %649 = vector.load %arg5[%c6_1047, %c28_1048] : memref<16x196xf32, #tpu.memory_space<vmem>>, vector<1x14xf32>
    tpu.vector_store %arg5[%c6_1047, %c28_1048], %648 {strides = array<i32>} : memref<16x196xf32, #tpu.memory_space<vmem>>, vector<1x14xf32>,
    %c1_1049 = arith.constant 1 : index
    %c5_1050 = arith.constant 5 : index
    %c0_1051 = arith.constant 0 : index
    %650 = vector.load %arg1[%c1_1049, %c5_1050, %c0_1051] : memref<2x16x16xf32, #tpu.memory_space<vmem>>, vector<1x1x14xf32>
    %651 = vector.shape_cast %650 : vector<1x1x14xf32> to vector<1x14xf32>
    %c6_1052 = arith.constant 6 : index
    %c42_1053 = arith.constant 42 : index
    %652 = vector.load %arg5[%c6_1052, %c42_1053] : memref<16x196xf32, #tpu.memory_space<vmem>>, vector<1x14xf32>
    tpu.vector_store %arg5[%c6_1052, %c42_1053], %651 {strides = array<i32>} : memref<16x196xf32, #tpu.memory_space<vmem>>, vector<1x14xf32>,
    %c1_1054 = arith.constant 1 : index
    %c6_1055 = arith.constant 6 : index
    %c0_1056 = arith.constant 0 : index
    %653 = vector.load %arg1[%c1_1054, %c6_1055, %c0_1056] : memref<2x16x16xf32, #tpu.memory_space<vmem>>, vector<1x1x14xf32>
    %654 = vector.shape_cast %653 : vector<1x1x14xf32> to vector<1x14xf32>
    %c6_1057 = arith.constant 6 : index
    %c56_1058 = arith.constant 56 : index
    %655 = vector.load %arg5[%c6_1057, %c56_1058] : memref<16x196xf32, #tpu.memory_space<vmem>>, vector<1x14xf32>
    tpu.vector_store %arg5[%c6_1057, %c56_1058], %654 {strides = array<i32>} : memref<16x196xf32, #tpu.memory_space<vmem>>, vector<1x14xf32>,
    %c1_1059 = arith.constant 1 : index
    %c7_1060 = arith.constant 7 : index
    %c0_1061 = arith.constant 0 : index
    %656 = vector.load %arg1[%c1_1059, %c7_1060, %c0_1061] : memref<2x16x16xf32, #tpu.memory_space<vmem>>, vector<1x1x14xf32>
    %657 = vector.shape_cast %656 : vector<1x1x14xf32> to vector<1x14xf32>
    %c6_1062 = arith.constant 6 : index
    %c70_1063 = arith.constant 70 : index
    %658 = vector.load %arg5[%c6_1062, %c70_1063] : memref<16x196xf32, #tpu.memory_space<vmem>>, vector<1x14xf32>
    tpu.vector_store %arg5[%c6_1062, %c70_1063], %657 {strides = array<i32>} : memref<16x196xf32, #tpu.memory_space<vmem>>, vector<1x14xf32>,
    %c1_1064 = arith.constant 1 : index
    %c8_1065 = arith.constant 8 : index
    %c0_1066 = arith.constant 0 : index
    %659 = vector.load %arg1[%c1_1064, %c8_1065, %c0_1066] : memref<2x16x16xf32, #tpu.memory_space<vmem>>, vector<1x1x14xf32>
    %660 = vector.shape_cast %659 : vector<1x1x14xf32> to vector<1x14xf32>
    %c6_1067 = arith.constant 6 : index
    %c84_1068 = arith.constant 84 : index
    %661 = vector.load %arg5[%c6_1067, %c84_1068] : memref<16x196xf32, #tpu.memory_space<vmem>>, vector<1x14xf32>
    tpu.vector_store %arg5[%c6_1067, %c84_1068], %660 {strides = array<i32>} : memref<16x196xf32, #tpu.memory_space<vmem>>, vector<1x14xf32>,
    %c1_1069 = arith.constant 1 : index
    %c9_1070 = arith.constant 9 : index
    %c0_1071 = arith.constant 0 : index
    %662 = vector.load %arg1[%c1_1069, %c9_1070, %c0_1071] : memref<2x16x16xf32, #tpu.memory_space<vmem>>, vector<1x1x14xf32>
    %663 = vector.shape_cast %662 : vector<1x1x14xf32> to vector<1x14xf32>
    %c6_1072 = arith.constant 6 : index
    %c98_1073 = arith.constant 98 : index
    %664 = vector.load %arg5[%c6_1072, %c98_1073] : memref<16x196xf32, #tpu.memory_space<vmem>>, vector<1x14xf32>
    tpu.vector_store %arg5[%c6_1072, %c98_1073], %663 {strides = array<i32>} : memref<16x196xf32, #tpu.memory_space<vmem>>, vector<1x14xf32>,
    %c1_1074 = arith.constant 1 : index
    %c10_1075 = arith.constant 10 : index
    %c0_1076 = arith.constant 0 : index
    %665 = vector.load %arg1[%c1_1074, %c10_1075, %c0_1076] : memref<2x16x16xf32, #tpu.memory_space<vmem>>, vector<1x1x14xf32>
    %666 = vector.shape_cast %665 : vector<1x1x14xf32> to vector<1x14xf32>
    %c6_1077 = arith.constant 6 : index
    %c112_1078 = arith.constant 112 : index
    %667 = vector.load %arg5[%c6_1077, %c112_1078] : memref<16x196xf32, #tpu.memory_space<vmem>>, vector<1x14xf32>
    tpu.vector_store %arg5[%c6_1077, %c112_1078], %666 {strides = array<i32>} : memref<16x196xf32, #tpu.memory_space<vmem>>, vector<1x14xf32>,
    %c1_1079 = arith.constant 1 : index
    %c11_1080 = arith.constant 11 : index
    %c0_1081 = arith.constant 0 : index
    %668 = vector.load %arg1[%c1_1079, %c11_1080, %c0_1081] : memref<2x16x16xf32, #tpu.memory_space<vmem>>, vector<1x1x14xf32>
    %669 = vector.shape_cast %668 : vector<1x1x14xf32> to vector<1x14xf32>
    %c6_1082 = arith.constant 6 : index
    %c126_1083 = arith.constant 126 : index
    %670 = vector.load %arg5[%c6_1082, %c126_1083] : memref<16x196xf32, #tpu.memory_space<vmem>>, vector<1x14xf32>
    tpu.vector_store %arg5[%c6_1082, %c126_1083], %669 {strides = array<i32>} : memref<16x196xf32, #tpu.memory_space<vmem>>, vector<1x14xf32>,
    %c1_1084 = arith.constant 1 : index
    %c12_1085 = arith.constant 12 : index
    %c0_1086 = arith.constant 0 : index
    %671 = vector.load %arg1[%c1_1084, %c12_1085, %c0_1086] : memref<2x16x16xf32, #tpu.memory_space<vmem>>, vector<1x1x14xf32>
    %672 = vector.shape_cast %671 : vector<1x1x14xf32> to vector<1x14xf32>
    %c6_1087 = arith.constant 6 : index
    %c140_1088 = arith.constant 140 : index
    %673 = vector.load %arg5[%c6_1087, %c140_1088] : memref<16x196xf32, #tpu.memory_space<vmem>>, vector<1x14xf32>
    tpu.vector_store %arg5[%c6_1087, %c140_1088], %672 {strides = array<i32>} : memref<16x196xf32, #tpu.memory_space<vmem>>, vector<1x14xf32>,
    %c1_1089 = arith.constant 1 : index
    %c13_1090 = arith.constant 13 : index
    %c0_1091 = arith.constant 0 : index
    %674 = vector.load %arg1[%c1_1089, %c13_1090, %c0_1091] : memref<2x16x16xf32, #tpu.memory_space<vmem>>, vector<1x1x14xf32>
    %675 = vector.shape_cast %674 : vector<1x1x14xf32> to vector<1x14xf32>
    %c6_1092 = arith.constant 6 : index
    %c154_1093 = arith.constant 154 : index
    %676 = vector.load %arg5[%c6_1092, %c154_1093] : memref<16x196xf32, #tpu.memory_space<vmem>>, vector<1x14xf32>
    tpu.vector_store %arg5[%c6_1092, %c154_1093], %675 {strides = array<i32>} : memref<16x196xf32, #tpu.memory_space<vmem>>, vector<1x14xf32>,
    %c1_1094 = arith.constant 1 : index
    %c14_1095 = arith.constant 14 : index
    %c0_1096 = arith.constant 0 : index
    %677 = vector.load %arg1[%c1_1094, %c14_1095, %c0_1096] : memref<2x16x16xf32, #tpu.memory_space<vmem>>, vector<1x1x14xf32>
    %678 = vector.shape_cast %677 : vector<1x1x14xf32> to vector<1x14xf32>
    %c6_1097 = arith.constant 6 : index
    %c168_1098 = arith.constant 168 : index
    %679 = vector.load %arg5[%c6_1097, %c168_1098] : memref<16x196xf32, #tpu.memory_space<vmem>>, vector<1x14xf32>
    tpu.vector_store %arg5[%c6_1097, %c168_1098], %678 {strides = array<i32>} : memref<16x196xf32, #tpu.memory_space<vmem>>, vector<1x14xf32>,
    %c1_1099 = arith.constant 1 : index
    %c15_1100 = arith.constant 15 : index
    %c0_1101 = arith.constant 0 : index
    %680 = vector.load %arg1[%c1_1099, %c15_1100, %c0_1101] : memref<2x16x16xf32, #tpu.memory_space<vmem>>, vector<1x1x14xf32>
    %681 = vector.shape_cast %680 : vector<1x1x14xf32> to vector<1x14xf32>
    %c6_1102 = arith.constant 6 : index
    %c182_1103 = arith.constant 182 : index
    %682 = vector.load %arg5[%c6_1102, %c182_1103] : memref<16x196xf32, #tpu.memory_space<vmem>>, vector<1x14xf32>
    tpu.vector_store %arg5[%c6_1102, %c182_1103], %681 {strides = array<i32>} : memref<16x196xf32, #tpu.memory_space<vmem>>, vector<1x14xf32>,
    %c1_1104 = arith.constant 1 : index
    %c2_1105 = arith.constant 2 : index
    %c1_1106 = arith.constant 1 : index
    %683 = vector.load %arg1[%c1_1104, %c2_1105, %c1_1106] : memref<2x16x16xf32, #tpu.memory_space<vmem>>, vector<1x1x14xf32>
    %684 = vector.shape_cast %683 : vector<1x1x14xf32> to vector<1x14xf32>
    %c7_1107 = arith.constant 7 : index
    %c0_1108 = arith.constant 0 : index
    %685 = vector.load %arg5[%c7_1107, %c0_1108] : memref<16x196xf32, #tpu.memory_space<vmem>>, vector<1x14xf32>
    tpu.vector_store %arg5[%c7_1107, %c0_1108], %684 {strides = array<i32>} : memref<16x196xf32, #tpu.memory_space<vmem>>, vector<1x14xf32>,
    %c1_1109 = arith.constant 1 : index
    %c3_1110 = arith.constant 3 : index
    %c1_1111 = arith.constant 1 : index
    %686 = vector.load %arg1[%c1_1109, %c3_1110, %c1_1111] : memref<2x16x16xf32, #tpu.memory_space<vmem>>, vector<1x1x14xf32>
    %687 = vector.shape_cast %686 : vector<1x1x14xf32> to vector<1x14xf32>
    %c7_1112 = arith.constant 7 : index
    %c14_1113 = arith.constant 14 : index
    %688 = vector.load %arg5[%c7_1112, %c14_1113] : memref<16x196xf32, #tpu.memory_space<vmem>>, vector<1x14xf32>
    tpu.vector_store %arg5[%c7_1112, %c14_1113], %687 {strides = array<i32>} : memref<16x196xf32, #tpu.memory_space<vmem>>, vector<1x14xf32>,
    %c1_1114 = arith.constant 1 : index
    %c4_1115 = arith.constant 4 : index
    %c1_1116 = arith.constant 1 : index
    %689 = vector.load %arg1[%c1_1114, %c4_1115, %c1_1116] : memref<2x16x16xf32, #tpu.memory_space<vmem>>, vector<1x1x14xf32>
    %690 = vector.shape_cast %689 : vector<1x1x14xf32> to vector<1x14xf32>
    %c7_1117 = arith.constant 7 : index
    %c28_1118 = arith.constant 28 : index
    %691 = vector.load %arg5[%c7_1117, %c28_1118] : memref<16x196xf32, #tpu.memory_space<vmem>>, vector<1x14xf32>
    tpu.vector_store %arg5[%c7_1117, %c28_1118], %690 {strides = array<i32>} : memref<16x196xf32, #tpu.memory_space<vmem>>, vector<1x14xf32>,
    %c1_1119 = arith.constant 1 : index
    %c5_1120 = arith.constant 5 : index
    %c1_1121 = arith.constant 1 : index
    %692 = vector.load %arg1[%c1_1119, %c5_1120, %c1_1121] : memref<2x16x16xf32, #tpu.memory_space<vmem>>, vector<1x1x14xf32>
    %693 = vector.shape_cast %692 : vector<1x1x14xf32> to vector<1x14xf32>
    %c7_1122 = arith.constant 7 : index
    %c42_1123 = arith.constant 42 : index
    %694 = vector.load %arg5[%c7_1122, %c42_1123] : memref<16x196xf32, #tpu.memory_space<vmem>>, vector<1x14xf32>
    tpu.vector_store %arg5[%c7_1122, %c42_1123], %693 {strides = array<i32>} : memref<16x196xf32, #tpu.memory_space<vmem>>, vector<1x14xf32>,
    %c1_1124 = arith.constant 1 : index
    %c6_1125 = arith.constant 6 : index
    %c1_1126 = arith.constant 1 : index
    %695 = vector.load %arg1[%c1_1124, %c6_1125, %c1_1126] : memref<2x16x16xf32, #tpu.memory_space<vmem>>, vector<1x1x14xf32>
    %696 = vector.shape_cast %695 : vector<1x1x14xf32> to vector<1x14xf32>
    %c7_1127 = arith.constant 7 : index
    %c56_1128 = arith.constant 56 : index
    %697 = vector.load %arg5[%c7_1127, %c56_1128] : memref<16x196xf32, #tpu.memory_space<vmem>>, vector<1x14xf32>
    tpu.vector_store %arg5[%c7_1127, %c56_1128], %696 {strides = array<i32>} : memref<16x196xf32, #tpu.memory_space<vmem>>, vector<1x14xf32>,
    %c1_1129 = arith.constant 1 : index
    %c7_1130 = arith.constant 7 : index
    %c1_1131 = arith.constant 1 : index
    %698 = vector.load %arg1[%c1_1129, %c7_1130, %c1_1131] : memref<2x16x16xf32, #tpu.memory_space<vmem>>, vector<1x1x14xf32>
    %699 = vector.shape_cast %698 : vector<1x1x14xf32> to vector<1x14xf32>
    %c7_1132 = arith.constant 7 : index
    %c70_1133 = arith.constant 70 : index
    %700 = vector.load %arg5[%c7_1132, %c70_1133] : memref<16x196xf32, #tpu.memory_space<vmem>>, vector<1x14xf32>
    tpu.vector_store %arg5[%c7_1132, %c70_1133], %699 {strides = array<i32>} : memref<16x196xf32, #tpu.memory_space<vmem>>, vector<1x14xf32>,
    %c1_1134 = arith.constant 1 : index
    %c8_1135 = arith.constant 8 : index
    %c1_1136 = arith.constant 1 : index
    %701 = vector.load %arg1[%c1_1134, %c8_1135, %c1_1136] : memref<2x16x16xf32, #tpu.memory_space<vmem>>, vector<1x1x14xf32>
    %702 = vector.shape_cast %701 : vector<1x1x14xf32> to vector<1x14xf32>
    %c7_1137 = arith.constant 7 : index
    %c84_1138 = arith.constant 84 : index
    %703 = vector.load %arg5[%c7_1137, %c84_1138] : memref<16x196xf32, #tpu.memory_space<vmem>>, vector<1x14xf32>
    tpu.vector_store %arg5[%c7_1137, %c84_1138], %702 {strides = array<i32>} : memref<16x196xf32, #tpu.memory_space<vmem>>, vector<1x14xf32>,
    %c1_1139 = arith.constant 1 : index
    %c9_1140 = arith.constant 9 : index
    %c1_1141 = arith.constant 1 : index
    %704 = vector.load %arg1[%c1_1139, %c9_1140, %c1_1141] : memref<2x16x16xf32, #tpu.memory_space<vmem>>, vector<1x1x14xf32>
    %705 = vector.shape_cast %704 : vector<1x1x14xf32> to vector<1x14xf32>
    %c7_1142 = arith.constant 7 : index
    %c98_1143 = arith.constant 98 : index
    %706 = vector.load %arg5[%c7_1142, %c98_1143] : memref<16x196xf32, #tpu.memory_space<vmem>>, vector<1x14xf32>
    tpu.vector_store %arg5[%c7_1142, %c98_1143], %705 {strides = array<i32>} : memref<16x196xf32, #tpu.memory_space<vmem>>, vector<1x14xf32>,
    %c1_1144 = arith.constant 1 : index
    %c10_1145 = arith.constant 10 : index
    %c1_1146 = arith.constant 1 : index
    %707 = vector.load %arg1[%c1_1144, %c10_1145, %c1_1146] : memref<2x16x16xf32, #tpu.memory_space<vmem>>, vector<1x1x14xf32>
    %708 = vector.shape_cast %707 : vector<1x1x14xf32> to vector<1x14xf32>
    %c7_1147 = arith.constant 7 : index
    %c112_1148 = arith.constant 112 : index
    %709 = vector.load %arg5[%c7_1147, %c112_1148] : memref<16x196xf32, #tpu.memory_space<vmem>>, vector<1x14xf32>
    tpu.vector_store %arg5[%c7_1147, %c112_1148], %708 {strides = array<i32>} : memref<16x196xf32, #tpu.memory_space<vmem>>, vector<1x14xf32>,
    %c1_1149 = arith.constant 1 : index
    %c11_1150 = arith.constant 11 : index
    %c1_1151 = arith.constant 1 : index
    %710 = vector.load %arg1[%c1_1149, %c11_1150, %c1_1151] : memref<2x16x16xf32, #tpu.memory_space<vmem>>, vector<1x1x14xf32>
    %711 = vector.shape_cast %710 : vector<1x1x14xf32> to vector<1x14xf32>
    %c7_1152 = arith.constant 7 : index
    %c126_1153 = arith.constant 126 : index
    %712 = vector.load %arg5[%c7_1152, %c126_1153] : memref<16x196xf32, #tpu.memory_space<vmem>>, vector<1x14xf32>
    tpu.vector_store %arg5[%c7_1152, %c126_1153], %711 {strides = array<i32>} : memref<16x196xf32, #tpu.memory_space<vmem>>, vector<1x14xf32>,
    %c1_1154 = arith.constant 1 : index
    %c12_1155 = arith.constant 12 : index
    %c1_1156 = arith.constant 1 : index
    %713 = vector.load %arg1[%c1_1154, %c12_1155, %c1_1156] : memref<2x16x16xf32, #tpu.memory_space<vmem>>, vector<1x1x14xf32>
    %714 = vector.shape_cast %713 : vector<1x1x14xf32> to vector<1x14xf32>
    %c7_1157 = arith.constant 7 : index
    %c140_1158 = arith.constant 140 : index
    %715 = vector.load %arg5[%c7_1157, %c140_1158] : memref<16x196xf32, #tpu.memory_space<vmem>>, vector<1x14xf32>
    tpu.vector_store %arg5[%c7_1157, %c140_1158], %714 {strides = array<i32>} : memref<16x196xf32, #tpu.memory_space<vmem>>, vector<1x14xf32>,
    %c1_1159 = arith.constant 1 : index
    %c13_1160 = arith.constant 13 : index
    %c1_1161 = arith.constant 1 : index
    %716 = vector.load %arg1[%c1_1159, %c13_1160, %c1_1161] : memref<2x16x16xf32, #tpu.memory_space<vmem>>, vector<1x1x14xf32>
    %717 = vector.shape_cast %716 : vector<1x1x14xf32> to vector<1x14xf32>
    %c7_1162 = arith.constant 7 : index
    %c154_1163 = arith.constant 154 : index
    %718 = vector.load %arg5[%c7_1162, %c154_1163] : memref<16x196xf32, #tpu.memory_space<vmem>>, vector<1x14xf32>
    tpu.vector_store %arg5[%c7_1162, %c154_1163], %717 {strides = array<i32>} : memref<16x196xf32, #tpu.memory_space<vmem>>, vector<1x14xf32>,
    %c1_1164 = arith.constant 1 : index
    %c14_1165 = arith.constant 14 : index
    %c1_1166 = arith.constant 1 : index
    %719 = vector.load %arg1[%c1_1164, %c14_1165, %c1_1166] : memref<2x16x16xf32, #tpu.memory_space<vmem>>, vector<1x1x14xf32>
    %720 = vector.shape_cast %719 : vector<1x1x14xf32> to vector<1x14xf32>
    %c7_1167 = arith.constant 7 : index
    %c168_1168 = arith.constant 168 : index
    %721 = vector.load %arg5[%c7_1167, %c168_1168] : memref<16x196xf32, #tpu.memory_space<vmem>>, vector<1x14xf32>
    tpu.vector_store %arg5[%c7_1167, %c168_1168], %720 {strides = array<i32>} : memref<16x196xf32, #tpu.memory_space<vmem>>, vector<1x14xf32>,
    %c1_1169 = arith.constant 1 : index
    %c15_1170 = arith.constant 15 : index
    %c1_1171 = arith.constant 1 : index
    %722 = vector.load %arg1[%c1_1169, %c15_1170, %c1_1171] : memref<2x16x16xf32, #tpu.memory_space<vmem>>, vector<1x1x14xf32>
    %723 = vector.shape_cast %722 : vector<1x1x14xf32> to vector<1x14xf32>
    %c7_1172 = arith.constant 7 : index
    %c182_1173 = arith.constant 182 : index
    %724 = vector.load %arg5[%c7_1172, %c182_1173] : memref<16x196xf32, #tpu.memory_space<vmem>>, vector<1x14xf32>
    tpu.vector_store %arg5[%c7_1172, %c182_1173], %723 {strides = array<i32>} : memref<16x196xf32, #tpu.memory_space<vmem>>, vector<1x14xf32>,
    %c1_1174 = arith.constant 1 : index
    %c2_1175 = arith.constant 2 : index
    %c2_1176 = arith.constant 2 : index
    %725 = vector.load %arg1[%c1_1174, %c2_1175, %c2_1176] : memref<2x16x16xf32, #tpu.memory_space<vmem>>, vector<1x1x14xf32>
    %726 = vector.shape_cast %725 : vector<1x1x14xf32> to vector<1x14xf32>
    %c8_1177 = arith.constant 8 : index
    %c0_1178 = arith.constant 0 : index
    %727 = vector.load %arg5[%c8_1177, %c0_1178] : memref<16x196xf32, #tpu.memory_space<vmem>>, vector<1x14xf32>
    tpu.vector_store %arg5[%c8_1177, %c0_1178], %726 {strides = array<i32>} : memref<16x196xf32, #tpu.memory_space<vmem>>, vector<1x14xf32>,
    %c1_1179 = arith.constant 1 : index
    %c3_1180 = arith.constant 3 : index
    %c2_1181 = arith.constant 2 : index
    %728 = vector.load %arg1[%c1_1179, %c3_1180, %c2_1181] : memref<2x16x16xf32, #tpu.memory_space<vmem>>, vector<1x1x14xf32>
    %729 = vector.shape_cast %728 : vector<1x1x14xf32> to vector<1x14xf32>
    %c8_1182 = arith.constant 8 : index
    %c14_1183 = arith.constant 14 : index
    %730 = vector.load %arg5[%c8_1182, %c14_1183] : memref<16x196xf32, #tpu.memory_space<vmem>>, vector<1x14xf32>
    tpu.vector_store %arg5[%c8_1182, %c14_1183], %729 {strides = array<i32>} : memref<16x196xf32, #tpu.memory_space<vmem>>, vector<1x14xf32>,
    %c1_1184 = arith.constant 1 : index
    %c4_1185 = arith.constant 4 : index
    %c2_1186 = arith.constant 2 : index
    %731 = vector.load %arg1[%c1_1184, %c4_1185, %c2_1186] : memref<2x16x16xf32, #tpu.memory_space<vmem>>, vector<1x1x14xf32>
    %732 = vector.shape_cast %731 : vector<1x1x14xf32> to vector<1x14xf32>
    %c8_1187 = arith.constant 8 : index
    %c28_1188 = arith.constant 28 : index
    %733 = vector.load %arg5[%c8_1187, %c28_1188] : memref<16x196xf32, #tpu.memory_space<vmem>>, vector<1x14xf32>
    tpu.vector_store %arg5[%c8_1187, %c28_1188], %732 {strides = array<i32>} : memref<16x196xf32, #tpu.memory_space<vmem>>, vector<1x14xf32>,
    %c1_1189 = arith.constant 1 : index
    %c5_1190 = arith.constant 5 : index
    %c2_1191 = arith.constant 2 : index
    %734 = vector.load %arg1[%c1_1189, %c5_1190, %c2_1191] : memref<2x16x16xf32, #tpu.memory_space<vmem>>, vector<1x1x14xf32>
    %735 = vector.shape_cast %734 : vector<1x1x14xf32> to vector<1x14xf32>
    %c8_1192 = arith.constant 8 : index
    %c42_1193 = arith.constant 42 : index
    %736 = vector.load %arg5[%c8_1192, %c42_1193] : memref<16x196xf32, #tpu.memory_space<vmem>>, vector<1x14xf32>
    tpu.vector_store %arg5[%c8_1192, %c42_1193], %735 {strides = array<i32>} : memref<16x196xf32, #tpu.memory_space<vmem>>, vector<1x14xf32>,
    %c1_1194 = arith.constant 1 : index
    %c6_1195 = arith.constant 6 : index
    %c2_1196 = arith.constant 2 : index
    %737 = vector.load %arg1[%c1_1194, %c6_1195, %c2_1196] : memref<2x16x16xf32, #tpu.memory_space<vmem>>, vector<1x1x14xf32>
    %738 = vector.shape_cast %737 : vector<1x1x14xf32> to vector<1x14xf32>
    %c8_1197 = arith.constant 8 : index
    %c56_1198 = arith.constant 56 : index
    %739 = vector.load %arg5[%c8_1197, %c56_1198] : memref<16x196xf32, #tpu.memory_space<vmem>>, vector<1x14xf32>
    tpu.vector_store %arg5[%c8_1197, %c56_1198], %738 {strides = array<i32>} : memref<16x196xf32, #tpu.memory_space<vmem>>, vector<1x14xf32>,
    %c1_1199 = arith.constant 1 : index
    %c7_1200 = arith.constant 7 : index
    %c2_1201 = arith.constant 2 : index
    %740 = vector.load %arg1[%c1_1199, %c7_1200, %c2_1201] : memref<2x16x16xf32, #tpu.memory_space<vmem>>, vector<1x1x14xf32>
    %741 = vector.shape_cast %740 : vector<1x1x14xf32> to vector<1x14xf32>
    %c8_1202 = arith.constant 8 : index
    %c70_1203 = arith.constant 70 : index
    %742 = vector.load %arg5[%c8_1202, %c70_1203] : memref<16x196xf32, #tpu.memory_space<vmem>>, vector<1x14xf32>
    tpu.vector_store %arg5[%c8_1202, %c70_1203], %741 {strides = array<i32>} : memref<16x196xf32, #tpu.memory_space<vmem>>, vector<1x14xf32>,
    %c1_1204 = arith.constant 1 : index
    %c8_1205 = arith.constant 8 : index
    %c2_1206 = arith.constant 2 : index
    %743 = vector.load %arg1[%c1_1204, %c8_1205, %c2_1206] : memref<2x16x16xf32, #tpu.memory_space<vmem>>, vector<1x1x14xf32>
    %744 = vector.shape_cast %743 : vector<1x1x14xf32> to vector<1x14xf32>
    %c8_1207 = arith.constant 8 : index
    %c84_1208 = arith.constant 84 : index
    %745 = vector.load %arg5[%c8_1207, %c84_1208] : memref<16x196xf32, #tpu.memory_space<vmem>>, vector<1x14xf32>
    tpu.vector_store %arg5[%c8_1207, %c84_1208], %744 {strides = array<i32>} : memref<16x196xf32, #tpu.memory_space<vmem>>, vector<1x14xf32>,
    %c1_1209 = arith.constant 1 : index
    %c9_1210 = arith.constant 9 : index
    %c2_1211 = arith.constant 2 : index
    %746 = vector.load %arg1[%c1_1209, %c9_1210, %c2_1211] : memref<2x16x16xf32, #tpu.memory_space<vmem>>, vector<1x1x14xf32>
    %747 = vector.shape_cast %746 : vector<1x1x14xf32> to vector<1x14xf32>
    %c8_1212 = arith.constant 8 : index
    %c98_1213 = arith.constant 98 : index
    %748 = vector.load %arg5[%c8_1212, %c98_1213] : memref<16x196xf32, #tpu.memory_space<vmem>>, vector<1x14xf32>
    tpu.vector_store %arg5[%c8_1212, %c98_1213], %747 {strides = array<i32>} : memref<16x196xf32, #tpu.memory_space<vmem>>, vector<1x14xf32>,
    %c1_1214 = arith.constant 1 : index
    %c10_1215 = arith.constant 10 : index
    %c2_1216 = arith.constant 2 : index
    %749 = vector.load %arg1[%c1_1214, %c10_1215, %c2_1216] : memref<2x16x16xf32, #tpu.memory_space<vmem>>, vector<1x1x14xf32>
    %750 = vector.shape_cast %749 : vector<1x1x14xf32> to vector<1x14xf32>
    %c8_1217 = arith.constant 8 : index
    %c112_1218 = arith.constant 112 : index
    %751 = vector.load %arg5[%c8_1217, %c112_1218] : memref<16x196xf32, #tpu.memory_space<vmem>>, vector<1x14xf32>
    tpu.vector_store %arg5[%c8_1217, %c112_1218], %750 {strides = array<i32>} : memref<16x196xf32, #tpu.memory_space<vmem>>, vector<1x14xf32>,
    %c1_1219 = arith.constant 1 : index
    %c11_1220 = arith.constant 11 : index
    %c2_1221 = arith.constant 2 : index
    %752 = vector.load %arg1[%c1_1219, %c11_1220, %c2_1221] : memref<2x16x16xf32, #tpu.memory_space<vmem>>, vector<1x1x14xf32>
    %753 = vector.shape_cast %752 : vector<1x1x14xf32> to vector<1x14xf32>
    %c8_1222 = arith.constant 8 : index
    %c126_1223 = arith.constant 126 : index
    %754 = vector.load %arg5[%c8_1222, %c126_1223] : memref<16x196xf32, #tpu.memory_space<vmem>>, vector<1x14xf32>
    tpu.vector_store %arg5[%c8_1222, %c126_1223], %753 {strides = array<i32>} : memref<16x196xf32, #tpu.memory_space<vmem>>, vector<1x14xf32>,
    %c1_1224 = arith.constant 1 : index
    %c12_1225 = arith.constant 12 : index
    %c2_1226 = arith.constant 2 : index
    %755 = vector.load %arg1[%c1_1224, %c12_1225, %c2_1226] : memref<2x16x16xf32, #tpu.memory_space<vmem>>, vector<1x1x14xf32>
    %756 = vector.shape_cast %755 : vector<1x1x14xf32> to vector<1x14xf32>
    %c8_1227 = arith.constant 8 : index
    %c140_1228 = arith.constant 140 : index
    %757 = vector.load %arg5[%c8_1227, %c140_1228] : memref<16x196xf32, #tpu.memory_space<vmem>>, vector<1x14xf32>
    tpu.vector_store %arg5[%c8_1227, %c140_1228], %756 {strides = array<i32>} : memref<16x196xf32, #tpu.memory_space<vmem>>, vector<1x14xf32>,
    %c1_1229 = arith.constant 1 : index
    %c13_1230 = arith.constant 13 : index
    %c2_1231 = arith.constant 2 : index
    %758 = vector.load %arg1[%c1_1229, %c13_1230, %c2_1231] : memref<2x16x16xf32, #tpu.memory_space<vmem>>, vector<1x1x14xf32>
    %759 = vector.shape_cast %758 : vector<1x1x14xf32> to vector<1x14xf32>
    %c8_1232 = arith.constant 8 : index
    %c154_1233 = arith.constant 154 : index
    %760 = vector.load %arg5[%c8_1232, %c154_1233] : memref<16x196xf32, #tpu.memory_space<vmem>>, vector<1x14xf32>
    tpu.vector_store %arg5[%c8_1232, %c154_1233], %759 {strides = array<i32>} : memref<16x196xf32, #tpu.memory_space<vmem>>, vector<1x14xf32>,
    %c1_1234 = arith.constant 1 : index
    %c14_1235 = arith.constant 14 : index
    %c2_1236 = arith.constant 2 : index
    %761 = vector.load %arg1[%c1_1234, %c14_1235, %c2_1236] : memref<2x16x16xf32, #tpu.memory_space<vmem>>, vector<1x1x14xf32>
    %762 = vector.shape_cast %761 : vector<1x1x14xf32> to vector<1x14xf32>
    %c8_1237 = arith.constant 8 : index
    %c168_1238 = arith.constant 168 : index
    %763 = vector.load %arg5[%c8_1237, %c168_1238] : memref<16x196xf32, #tpu.memory_space<vmem>>, vector<1x14xf32>
    tpu.vector_store %arg5[%c8_1237, %c168_1238], %762 {strides = array<i32>} : memref<16x196xf32, #tpu.memory_space<vmem>>, vector<1x14xf32>,
    %c1_1239 = arith.constant 1 : index
    %c15_1240 = arith.constant 15 : index
    %c2_1241 = arith.constant 2 : index
    %764 = vector.load %arg1[%c1_1239, %c15_1240, %c2_1241] : memref<2x16x16xf32, #tpu.memory_space<vmem>>, vector<1x1x14xf32>
    %765 = vector.shape_cast %764 : vector<1x1x14xf32> to vector<1x14xf32>
    %c8_1242 = arith.constant 8 : index
    %c182_1243 = arith.constant 182 : index
    %766 = vector.load %arg5[%c8_1242, %c182_1243] : memref<16x196xf32, #tpu.memory_space<vmem>>, vector<1x14xf32>
    tpu.vector_store %arg5[%c8_1242, %c182_1243], %765 {strides = array<i32>} : memref<16x196xf32, #tpu.memory_space<vmem>>, vector<1x14xf32>,
    %c0_1244 = arith.constant 0 : index
    %c0_1245 = arith.constant 0 : index
    %767 = vector.load %arg5[%c0_1244, %c0_1245] : memref<16x196xf32, #tpu.memory_space<vmem>>, vector<16x196xf32>
    %cst_1246 = arith.constant dense<0.000000e+00> : vector<32x196xf32>
    %768 = tpu.matmul %2, %767, %cst_1246 {dimension_numbers = #tpu.dot_dimension_numbers<[1], [0], [0], [1], [0, 0, 1, 1], [], []>} : vector<32x16xf32>, vector<16x196xf32>, vector<32x196xf32> -> vector<32x196xf32>
    %769 = vector.broadcast %3 : vector<32x1xf32> to vector<32x196xf32>
    %770 = arith.addf %768, %769 : vector<32x196xf32>
    %c1_1247 = arith.constant 1 : index
    %c0_1248 = arith.constant 0 : index
    %c0_1249 = arith.constant 0 : index
    %771 = vector.load %arg4[%c1_1247, %c0_1248, %c0_1249] : memref<2x32x196xf32, #tpu.memory_space<vmem>>, vector<1x32x196xf32>
    %772 = vector.shape_cast %771 : vector<1x32x196xf32> to vector<32x196xf32>
    %773 = vector.shape_cast %770 : vector<32x196xf32> to vector<1x32x196xf32>
    tpu.vector_store %arg4[%c1_1247, %c0_1248, %c0_1249], %773 {strides = array<i32>} : memref<2x32x196xf32, #tpu.memory_space<vmem>>, vector<1x32x196xf32>,
    return
  }
  func.func @transform_0(%arg0: i32) -> (i32, i32, i32) {
    %c0_i32 = arith.constant 0 : i32
    %c0_i32_0 = arith.constant 0 : i32
    %c0_i32_1 = arith.constant 0 : i32
    return %arg0, %c0_i32, %c0_i32_0 : i32, i32, i32
  }
  func.func @transform_1(%arg0: i32) -> (i32, i32) {
    %c0_i32 = arith.constant 0 : i32
    %c0_i32_0 = arith.constant 0 : i32
    %c0_i32_1 = arith.constant 0 : i32
    return %c0_i32, %c0_i32_0 : i32, i32
  }
  func.func @transform_2(%arg0: i32) -> (i32, i32) {
    %c0_i32 = arith.constant 0 : i32
    %c0_i32_0 = arith.constant 0 : i32
    %c0_i32_1 = arith.constant 0 : i32
    return %c0_i32, %c0_i32_0 : i32, i32
  }
  func.func @transform_3(%arg0: i32) -> (i32, i32, i32) {
    %c0_i32 = arith.constant 0 : i32
    %c0_i32_0 = arith.constant 0 : i32
    %c0_i32_1 = arith.constant 0 : i32
    return %arg0, %c0_i32, %c0_i32_0 : i32, i32, i32
  }
}

</mosaic_0001>

<bundles_post_ra>
// kernel: tpu_custom_call.1
= control target key start
LH: loop header
LB: loop body
LE: loop exit
PB: predicated region body
PF: predicated region fallthrough
CT: control target
= control target key end

     0   :  { %s3443_s0 = inlined_call_operand.vmem [shape: f32[2,16,16], index: 0, kind: input, shape index: {}]   ;;  %s3444_s1 = inlined_call_operand.vmem [shape: f32[32,16], index: 1, kind: input, shape index: {}]   ;;  %s3445_s2 = inlined_call_operand.vmem [shape: f32[32,1], index: 2, kind: input, shape index: {}]   ;;  %s3446_s3 = inlined_call_operand.hbm [shape: f32[2,32,196], index: 3, kind: output, shape index: {}]  }
   0x1   :  { %3524 = sst [smem:[#allocation6_spill]] %s3444_s1 }
   0x2   :  { %3525 = sst [smem:[#allocation7_spill]] %s3445_s2 }
   0x3   :  { %3526 = sst [smem:[#allocation8_spill]] %s3446_s3 }
   0x4   :  { %v45_v0 = vld [vmem:[%s3443_s0 + $0x3] sm:$0x1]  ;;  %v31_v1 = vld [vmem:[%s3443_s0 + $0x1] sm:$0x1]  ;;  %s3507_s16 = smov 42   ;;  %s3515_s17 = smov 14  }
   0x5   :  { %47 = vrot.lane.b32.xlu1 %v45_v0, %s3507_s16  ;;  %33 = vrot.lane.b32.xlu0 %v31_v1, %s3515_s17  ;;  %v52_v2 = vld [vmem:[%s3443_s0 + $0x4] sm:$0x1]  ;;  %v38_v3 = vld [vmem:[%s3443_s0 + $0x2] sm:$0x1]  ;;  %s3513_s22 = smov 56   ;;  %s3511_s23 = smov 28  }
   0x6   :  { %v66_v4 = vld [vmem:[%s3443_s0 + $0x6] sm:$0x1]  ;;  %v59_v5 = vld [vmem:[%s3443_s0 + $0x5] sm:$0x1]  ;;  %s3495_s28 = smov 84   ;;  %s3493_s29 = smov 70  }
   0x7   :  { %v80_v6 = vld [vmem:[%s3443_s0 + $0x8] sm:$0x1]  ;;  %v73_v7 = vld [vmem:[%s3443_s0 + $0x7] sm:$0x1]  ;;  %s3491_s7 = smov 112   ;;  %s3489_s8 = smov 98  }
   0x8   :  { %v96_v8 = vld [vmem:[%s3443_s0 + $0xa] sm:$0x1]  ;;  %v87_v9 = vld [vmem:[%s3443_s0 + $0x9] sm:$0x1]  ;;  %s3505_s13 = smov 12   ;;  %s3503_s14 = smov 126  }
   0x9   :  { %54 = vrot.lane.b32.xlu1 %v52_v2, %s3513_s22  ;;  %40 = vrot.lane.b32.xlu0 %v38_v3, %s3511_s23  ;;  %v110_v10 = vld [vmem:[%s3443_s0 + $0xc] sm:$0x1]  ;;  %v103_v11 = vld [vmem:[%s3443_s0 + $0xb] sm:$0x1]  ;;  %s3499_s21 = smov 40   ;;  %s3497_s24 = smov 26  }
   0xa   :  { %v124_v12 = vld [vmem:[%s3443_s0] sm:$0x1]  ;;  %v117_v13 = vld [vmem:[%s3443_s0 + $0xd] sm:$0x1]  ;;  %v2013_v14 = vmov 0.0   ;;  %s3487_s4 = smov 127  }
   0xb   :  { %15 = vst [vmem:[#allocation2] sm:$0xff] %v2013_v14  ;;  %18 = vst [vmem:[#allocation2 + $0x10] sm:$0xff] %v2013_v14  ;;  %897 = vmatprep.mubr.f32.mxu0 %v2013_v14  ;;  %1752 = vmatprep.mubr.f32.mxu1 %v2013_v14  ;;  %s3501_s5 = smov 54   ;;  %v136_v15 = vld [vmem:[%s3443_s0 + $0x2] sm:$0x1]  ;;  %vm29_vm0 = vcmask 106496  }
   0xc   :  { %v130_v16 = vld [vmem:[%s3443_s0 + $0x1] sm:$0x1]  ;;  %v28_v17 = vld [vmem:[%s3443_s0] sm:$0x1]  ;;  %s3485_s18 = smov 27   ;;  %s3483_s19 = smov 13  }
   0xd   :  { %68 = vrot.lane.b32.xlu1 %v66_v4, %s3495_s28  ;;  %61 = vrot.lane.b32.xlu0 %v59_v5, %s3493_s29  ;;  %30 = vst.msk [vmem:[#allocation2] sm:$0x1] %vm29_vm0, %v28_v17  ;;  %v148_v18 = vld [vmem:[%s3443_s0 + $0x4] sm:$0x1]  ;;  %v142_v19 = vld [vmem:[%s3443_s0 + $0x3] sm:$0x1] }
   0xe   :  { %vm16_vm1 = vcmask 556032   ;;  %s3447_s30 = smov 55   ;;  %s3481_s6 = smov 41   ;;  %v160_v20 = vld [vmem:[%s3443_s0 + $0x6] sm:$0x1] }
   0xf   :  { %17 = vst.msk [vmem:[#allocation2 + $0x8] sm:$0xff] %vm16_vm1, %v2013_v14  ;;  %19 = vst.msk [vmem:[#allocation2 + $0x18] sm:$0xff] %vm16_vm1, %v2013_v14  ;;  %v154_v21 = vld [vmem:[%s3443_s0 + $0x5] sm:$0x1]  ;;  %s3449_s15 = smov 83   ;;  %s3451_s20 = smov 69  }
  0x10   :  { %v172_v22 = vld [vmem:[%s3443_s0 + $0x8] sm:$0x1]  ;;  %v166_v23 = vld [vmem:[%s3443_s0 + $0x7] sm:$0x1] }
  0x11   :  { %82 = vrot.lane.b32.xlu1 %v80_v6, %s3491_s7  ;;  %75 = vrot.lane.b32.xlu0 %v73_v7, %s3489_s8 }
  0x15   :  { %98 = vrot.lane.b32.xlu1 %v96_v8, %s3505_s13  ;;  %89 = vrot.lane.b32.xlu0 %v87_v9, %s3503_s14 }
  0x19   :  { %112 = vrot.lane.b32.xlu1 %v110_v10, %s3499_s21  ;;  %105 = vrot.lane.b32.xlu0 %v103_v11, %s3497_s24 }
  0x1d   :  { %126 = vrot.lane.b32.xlu1 %v124_v12, %s3487_s4  ;;  %119 = vrot.lane.b32.xlu0 %v117_v13, %s3501_s5 }
  0x21   :  { %138 = vrot.lane.b32.xlu1 %v136_v15, %s3485_s18  ;;  %132 = vrot.lane.b32.xlu0 %v130_v16, %s3483_s19 }
  0x25   :  { %150 = vrot.lane.b32.xlu1 %v148_v18, %s3447_s30  ;;  %144 = vrot.lane.b32.xlu0 %v142_v19, %s3481_s6 }
  0x29   :  { %162 = vrot.lane.b32.xlu1 %v160_v20, %s3449_s15  ;;  %156 = vrot.lane.b32.xlu0 %v154_v21, %s3451_s20 }
  0x2a   :  { %8 = vsyncpa [#allocation4], 0  ;;  %s3453_s9 = smov 111   ;;  %s3455_s10 = smov 97   ;;  %v185_v24 = vld [vmem:[%s3443_s0 + $0xa] sm:$0x1] }
  0x2b   :  { %v178_v25 = vld [vmem:[%s3443_s0 + $0x9] sm:$0x1]  ;;  %s3457_s25 = smov 11   ;;  %s3459_s30 = smov 125   ;;  %v197_v26 = vld [vmem:[%s3443_s0 + $0xc] sm:$0x1] }
  0x2c   :  { %v191_v27 = vld [vmem:[%s3443_s0 + $0xb] sm:$0x1]  ;;  %s3461_s11 = smov 39   ;;  %s3465_s12 = smov 25   ;;  %v209_v28 = vld [vmem:[%s3443_s0] sm:$0x1] }
  0x2d   :  { %174 = vrot.lane.b32.xlu1 %v172_v22, %s3453_s9  ;;  %168 = vrot.lane.b32.xlu0 %v166_v23, %s3455_s10  ;;  %v203_v29 = vld [vmem:[%s3443_s0 + $0xd] sm:$0x1]  ;;  %s3463_s26 = smov 53   ;;  %v221_v30 = vld [vmem:[%s3443_s0 + $0x2] sm:$0x1]  ;;  %s3469_s15 = smov 68  }
  0x2e   :  { %v215_v31 = vld [vmem:[%s3443_s0 + $0x1] sm:$0x1]  ;;  %v233_v32 = vld [vmem:[%s3443_s0 + $0x4] sm:$0x1]  ;;  %v227_v33 = vld [vmem:[%s3443_s0 + $0x3] sm:$0x1] }
  0x2f   :  { %v245_v34 = vld [vmem:[%s3443_s0 + $0x6] sm:$0x1]  ;;  %v239_v35 = vld [vmem:[%s3443_s0 + $0x5] sm:$0x1]  ;;  %v294_v36 = vld [vmem:[%s3443_s0 + $0x1] sm:$0x1] }
  0x30   :  { %v257_v37 = vld [vmem:[%s3443_s0 + $0x8] sm:$0x1]  ;;  %v251_v38 = vld [vmem:[%s3443_s0 + $0x7] sm:$0x1]  ;;  %295 = vst.msk [vmem:[#allocation2 + $0x3] sm:$0x1] %vm29_vm0, %v294_v36 }
  0x31   :  { %187 = vrot.lane.b32.xlu1 %v185_v24, %s3457_s25  ;;  %180 = vrot.lane.b32.xlu0 %v178_v25, %s3459_s30  ;;  %s3473_s27 = smov 96   ;;  %v270_v39 = vld [vmem:[%s3443_s0 + $0xa] sm:$0x1]  ;;  %v263_v40 = vld [vmem:[%s3443_s0 + $0x9] sm:$0x1]  ;;  %s3477_s20 = smov 124  }
  0x32   :  { %v282_v41 = vld [vmem:[%s3443_s0 + $0xc] sm:$0x1]  ;;  %v276_v42 = vld [vmem:[%s3443_s0 + $0xb] sm:$0x1]  ;;  %v296_v43 = vld [vmem:[%s3443_s0 + $0x2] sm:$0x1] }
  0x33   :  { %v288_v44 = vld [vmem:[%s3443_s0 + $0xd] sm:$0x1]  ;;  %s3517_s9 = smov 52   ;;  %v308_v45 = vld [vmem:[%s3443_s0 + $0x4] sm:$0x1]  ;;  %vm36_vm2 = vcmask 221296  }
  0x34   :  { %v302_v46 = vld [vmem:[%s3443_s0 + $0x3] sm:$0x1]  ;;  %v320_v47 = vld [vmem:[%s3443_s0 + $0x6] sm:$0x1]  ;;  %v314_v48 = vld [vmem:[%s3443_s0 + $0x5] sm:$0x1] }
  0x35   :  { %199 = vrot.lane.b32.xlu1 %v197_v26, %s3461_s11  ;;  %193 = vrot.lane.b32.xlu0 %v191_v27, %s3465_s12  ;;  %s3471_s11 = smov 110   ;;  %s3475_s12 = smov 10   ;;  %v332_v49 = vld [vmem:[%s3443_s0 + $0x8] sm:$0x1]  ;;  %v326_v50 = vld [vmem:[%s3443_s0 + $0x7] sm:$0x1] }
  0x36   :  { %v344_v51 = vld [vmem:[%s3443_s0 + $0xa] sm:$0x1]  ;;  %v338_v52 = vld [vmem:[%s3443_s0 + $0x9] sm:$0x1]  ;;  %v357_v53 = vld [vmem:[%s3443_s0 + $0xc] sm:$0x1] }
  0x37   :  { %v351_v54 = vld [vmem:[%s3443_s0 + $0xb] sm:$0x1]  ;;  %v369_v55 = vld [vmem:[%s3443_s0 + $0xe] sm:$0x1]  ;;  %v363_v56 = vld [vmem:[%s3443_s0 + $0xd] sm:$0x1] }
  0x38   :  { %v381_v57 = vld [vmem:[%s3443_s0 + $0x2] sm:$0x1]  ;;  %v375_v58 = vld [vmem:[%s3443_s0 + $0x1] sm:$0x1]  ;;  %v393_v59 = vld [vmem:[%s3443_s0 + $0x4] sm:$0x1] }
  0x39   :  { %211 = vrot.lane.b32.xlu1 %v209_v28, %s3503_s14  ;;  %205 = vrot.lane.b32.xlu0 %v203_v29, %s3463_s26  ;;  %s3467_s26 = smov 82   ;;  %v387_v60 = vld [vmem:[%s3443_s0 + $0x3] sm:$0x1]  ;;  %v405_v61 = vld [vmem:[%s3443_s0 + $0x6] sm:$0x1]  ;;  %s3527_s25 = smov 69  }
  0x3a   :  { %v399_v62 = vld [vmem:[%s3443_s0 + $0x5] sm:$0x1]  ;;  %vm43_vm3 = vcmask 336096   ;;  %vm50_vm4 = vcmask 450896   ;;  %v417_v1 = vld [vmem:[%s3443_s0 + $0x8] sm:$0x1] }
  0x3b   :  { %v411_v2 = vld [vmem:[%s3443_s0 + $0x7] sm:$0x1]  ;;  %vm57_vm5 = vcmask 565696   ;;  %s3530_s10 = smov 83   ;;  %vm64_vm6 = vcmask 680496   ;;  %vm71_vm7 = vcmask 795296  }
  0x3c   :  { %v429_v5 = vld [vmem:[%s3443_s0 + $0xa] sm:$0x1]  ;;  %v423_v6 = vld [vmem:[%s3443_s0 + $0x9] sm:$0x1]  ;;  %vm78_vm8 = vcmask 910096   ;;  %vm85_vm9 = vcmask 1024896  }
  0x3d   :  { %223 = vrot.lane.b32.xlu1 %v221_v30, %s3497_s24  ;;  %217 = vrot.lane.b32.xlu0 %v215_v31, %s3505_s13  ;;  %v442_v9 = vld [vmem:[%s3443_s0 + $0xc] sm:$0x1]  ;;  %v436_v10 = vld [vmem:[%s3443_s0 + $0xb] sm:$0x1]  ;;  %vm92_vm10 = vcmask 1041392   ;;  %vm94_vm11 = vcmask 90112  }
  0x3e   :  { %v454_v13 = vld [vmem:[%s3443_s0 + $0xe] sm:$0x1]  ;;  %v448_v15 = vld [vmem:[%s3443_s0 + $0xd] sm:$0x1]  ;;  %vm101_vm12 = vcmask 204896   ;;  %s3535_s30 = smov 53  }
  0x3f   :  { %vm108_vm13 = vcmask 319696   ;;  %v466_v18 = vld [vmem:[%s3443_s0 + $0x2] sm:$0x1]  ;;  %v460_v19 = vld [vmem:[%s3443_s0 + $0x1] sm:$0x1]  ;;  %vm115_vm14 = vcmask 434496  }
  0x40   :  { %vm122_vm15 = vcmask 549296   ;;  %v478_v22 = vld [vmem:[%s3443_s0 + $0x4] sm:$0x1]  ;;  %v472_v23 = vld [vmem:[%s3443_s0 + $0x3] sm:$0x1]  ;;  %s3553_s3 = smov 127  }
  0x41   :  { %235 = vrot.lane.b32.xlu1 %v233_v32, %s3501_s5  ;;  %229 = vrot.lane.b32.xlu0 %v227_v33, %s3499_s21  ;;  %v490_v26 = vld [vmem:[%s3443_s0 + $0x6] sm:$0x1]  ;;  %v484_v27 = vld [vmem:[%s3443_s0 + $0x5] sm:$0x1]  ;;  %s3555_s1 = smov 27   ;;  %s3556_s2 = smov 13  }
  0x42   :  { %v502_v30 = vld [vmem:[%s3443_s0 + $0x8] sm:$0x1]  ;;  %v496_v31 = vld [vmem:[%s3443_s0 + $0x7] sm:$0x1]  ;;  %v545_v36 = vld [vmem:[%s3443_s0 + $0x2] sm:$0x1] }
  0x43   :  { %546 = vst.msk [vmem:[#allocation2 + $0x6] sm:$0x1] %vm29_vm0, %v545_v36  ;;  %v753_v36 = vld [vmem:[%s3443_s0 + $0x9] sm:$0x1] }
  0x45   :  { %247 = vrot.lane.b32.xlu1 %v245_v34, %s3467_s26  ;;  %241 = vrot.lane.b32.xlu0 %v239_v35, %s3469_s15  ;;  %s3479_s26 = smov 38   ;;  %s3509_s15 = smov 24   ;;  %v514_v34 = vld [vmem:[%s3443_s0 + $0xa] sm:$0x1]  ;;  %v508_v35 = vld [vmem:[%s3443_s0 + $0x9] sm:$0x1] }
  0x49   :  { %259 = vrot.lane.b32.xlu1 %v257_v37, %s3471_s11  ;;  %253 = vrot.lane.b32.xlu0 %v251_v38, %s3473_s27  ;;  %s3533_s27 = smov 25   ;;  %s3536_s11 = smov 39  }
  0x4d   :  { %272 = vrot.lane.b32.xlu1 %v270_v39, %s3475_s12  ;;  %265 = vrot.lane.b32.xlu0 %v263_v40, %s3477_s20  ;;  %s3528_s12 = smov 55   ;;  %v527_v39 = vld [vmem:[%s3443_s0 + $0xc] sm:$0x1]  ;;  %v521_v40 = vld [vmem:[%s3443_s0 + $0xb] sm:$0x1]  ;;  %s3550_s20 = smov 126  }
  0x51   :  { %284 = vrot.lane.b32.xlu1 %v282_v41, %s3479_s26  ;;  %278 = vrot.lane.b32.xlu0 %v276_v42, %s3509_s15  ;;  %s3529_s26 = smov 97  }
  0x55   :  { %298 = vrot.lane.b32.xlu1 %v296_v43, %s3515_s17  ;;  %290 = vrot.lane.b32.xlu0 %v288_v44, %s3517_s9  ;;  %v539_v43 = vld [vmem:[%s3443_s0 + $0xe] sm:$0x1]  ;;  %v533_v44 = vld [vmem:[%s3443_s0 + $0xd] sm:$0x1] }
  0x59   :  { %310 = vrot.lane.b32.xlu1 %v308_v45, %s3507_s16  ;;  %304 = vrot.lane.b32.xlu0 %v302_v46, %s3511_s23  ;;  %s3544_s16 = smov 42  }
  0x5d   :  { %322 = vrot.lane.b32.xlu1 %v320_v47, %s3493_s29  ;;  %316 = vrot.lane.b32.xlu0 %v314_v48, %s3513_s22  ;;  %s3539_s29 = smov 82   ;;  %v553_v47 = vld [vmem:[%s3443_s0 + $0x4] sm:$0x1]  ;;  %v547_v48 = vld [vmem:[%s3443_s0 + $0x3] sm:$0x1] }
  0x61   :  { %334 = vrot.lane.b32.xlu1 %v332_v49, %s3489_s8  ;;  %328 = vrot.lane.b32.xlu0 %v326_v50, %s3495_s28  ;;  %s3538_s28 = smov 96   ;;  %s3546_s8 = smov 70  }
  0x65   :  { %346 = vrot.lane.b32.xlu1 %v344_v51, %s3503_s14  ;;  %340 = vrot.lane.b32.xlu0 %v338_v52, %s3491_s7  ;;  %s3537_s7 = smov 68   ;;  %v565_v51 = vld [vmem:[%s3443_s0 + $0x6] sm:$0x1]  ;;  %v559_v52 = vld [vmem:[%s3443_s0 + $0x5] sm:$0x1] }
  0x69   :  { %359 = vrot.lane.b32.xlu1 %v357_v53, %s3497_s24  ;;  %353 = vrot.lane.b32.xlu0 %v351_v54, %s3505_s13 }
  0x6d   :  { %371 = vrot.lane.b32.xlu1 %v369_v55, %s3501_s5  ;;  %365 = vrot.lane.b32.xlu0 %v363_v56, %s3499_s21  ;;  %v577_v55 = vld [vmem:[%s3443_s0 + $0x8] sm:$0x1]  ;;  %v571_v56 = vld [vmem:[%s3443_s0 + $0x7] sm:$0x1] }
  0x71   :  { %383 = vrot.lane.b32.xlu1 %v381_v57, %s3483_s19  ;;  %377 = vrot.lane.b32.xlu0 %v375_v58, %s3487_s4  ;;  %s3532_s19 = smov 111   ;;  %s3534_s4 = smov 11  }
  0x75   :  { %395 = vrot.lane.b32.xlu1 %v393_v59, %s3481_s6  ;;  %389 = vrot.lane.b32.xlu0 %v387_v60, %s3485_s18  ;;  %s3531_s6 = smov 125   ;;  %s3542_s18 = smov 10   ;;  %v589_v59 = vld [vmem:[%s3443_s0 + $0xa] sm:$0x1]  ;;  %v583_v60 = vld [vmem:[%s3443_s0 + $0x9] sm:$0x1] }
  0x77   :  { %v48_v63 = vpop.permute.xlu1 %47  ;;  %v34_v0 = vpop.permute.xlu0 %33 }
  0x78   :  { %37 = vst.msk [vmem:[#allocation2] sm:$0x1] %vm36_vm2, %v34_v0  ;;  %v595_v0 = vld [vmem:[%s3443_s0 + $0xb] sm:$0x1] }
  0x79   :  { %407 = vrot.lane.b32.xlu1 %v405_v61, %s3527_s25  ;;  %401 = vrot.lane.b32.xlu0 %v399_v62, %s3528_s12 }
  0x7b   :  { %v55_v3 = vpop.permute.xlu1 %54  ;;  %v41_v4 = vpop.permute.xlu0 %40 }
  0x7c   :  { %44 = vst.msk [vmem:[#allocation2] sm:$0x1] %vm43_vm3, %v41_v4  ;;  %v608_v4 = vld [vmem:[%s3443_s0 + $0xd] sm:$0x1] }
  0x7d   :  { %51 = vst.msk [vmem:[#allocation2] sm:$0x1] %vm50_vm4, %v48_v63  ;;  %419 = vrot.lane.b32.xlu1 %v417_v1, %s3529_s26  ;;  %413 = vrot.lane.b32.xlu0 %v411_v2, %s3530_s10  ;;  %v602_v63 = vld [vmem:[%s3443_s0 + $0xc] sm:$0x1] }
  0x7e   :  { %58 = vst.msk [vmem:[#allocation2] sm:$0x1] %vm57_vm5, %v55_v3  ;;  %v614_v3 = vld [vmem:[%s3443_s0 + $0xe] sm:$0x1] }
  0x7f   :  { %v69_v7 = vpop.permute.xlu1 %68  ;;  %v62_v8 = vpop.permute.xlu0 %61 }
  0x80   :  { %65 = vst.msk [vmem:[#allocation2] sm:$0x1] %vm64_vm6, %v62_v8  ;;  %v620_v8 = vld [vmem:[%s3443_s0 + $0xf] sm:$0x1] }
  0x81   :  { %431 = vrot.lane.b32.xlu1 %v429_v5, %s3531_s6  ;;  %425 = vrot.lane.b32.xlu0 %v423_v6, %s3532_s19  ;;  %72 = vst.msk [vmem:[#allocation2] sm:$0x1] %vm71_vm7, %v69_v7  ;;  %v626_v7 = vld [vmem:[%s3443_s0 + $0x2] sm:$0x1] }
  0x83   :  { %v83_v11 = vpop.permute.xlu1 %82  ;;  %v76_v12 = vpop.permute.xlu0 %75 }
  0x84   :  { %79 = vst.msk [vmem:[#allocation2] sm:$0x1] %vm78_vm8, %v76_v12  ;;  %v632_v12 = vld [vmem:[%s3443_s0 + $0x3] sm:$0x1] }
  0x85   :  { %86 = vst.msk [vmem:[#allocation2] sm:$0x1] %vm85_vm9, %v83_v11  ;;  %444 = vrot.lane.b32.xlu1 %v442_v9, %s3533_s27  ;;  %438 = vrot.lane.b32.xlu0 %v436_v10, %s3534_s4  ;;  %v638_v11 = vld [vmem:[%s3443_s0 + $0x4] sm:$0x1] }
  0x87   :  { %v99_v16 = vpop.permute.xlu1 %98  ;;  %v90_v17 = vpop.permute.xlu0 %89 }
  0x88   :  { %93 = vst.msk [vmem:[#allocation2] sm:$0x1] %vm92_vm10, %v90_v17 }
  0x89   :  { %95 = vst.msk [vmem:[#allocation2 + $0x8] sm:$0x1] %vm94_vm11, %v90_v17  ;;  %456 = vrot.lane.b32.xlu1 %v454_v13, %s3535_s30  ;;  %450 = vrot.lane.b32.xlu0 %v448_v15, %s3536_s11  ;;  %v644_v17 = vld [vmem:[%s3443_s0 + $0x5] sm:$0x1] }
  0x8a   :  { %102 = vst.msk [vmem:[#allocation2 + $0x8] sm:$0x1] %vm101_vm12, %v99_v16  ;;  %v650_v16 = vld [vmem:[%s3443_s0 + $0x6] sm:$0x1] }
  0x8b   :  { %v113_v20 = vpop.permute.xlu1 %112  ;;  %v106_v21 = vpop.permute.xlu0 %105 }
  0x8c   :  { %109 = vst.msk [vmem:[#allocation2 + $0x8] sm:$0x1] %vm108_vm13, %v106_v21  ;;  %v656_v21 = vld [vmem:[%s3443_s0 + $0x7] sm:$0x1] }
  0x8d   :  { %468 = vrot.lane.b32.xlu1 %v466_v18, %s3505_s13  ;;  %462 = vrot.lane.b32.xlu0 %v460_v19, %s3503_s14  ;;  %116 = vst.msk [vmem:[#allocation2 + $0x8] sm:$0x1] %vm115_vm14, %v113_v20  ;;  %s3540_s14 = smov 124   ;;  %s3547_s13 = smov 112   ;;  %v662_v20 = vld [vmem:[%s3443_s0 + $0x8] sm:$0x1] }
  0x8f   :  { %v127_v24 = vpop.permute.xlu1 %126  ;;  %v120_v25 = vpop.permute.xlu0 %119 }
  0x90   :  { %129 = vst.msk [vmem:[#allocation2 + $0x1] sm:$0x1] %vm29_vm0, %v127_v24  ;;  %v717_v24 = vld [vmem:[%s3443_s0 + $0x3] sm:$0x1] }
  0x91   :  { %123 = vst.msk [vmem:[#allocation2 + $0x8] sm:$0x1] %vm122_vm15, %v120_v25  ;;  %480 = vrot.lane.b32.xlu1 %v478_v22, %s3499_s21  ;;  %474 = vrot.lane.b32.xlu0 %v472_v23, %s3497_s24  ;;  %s3541_s21 = smov 110   ;;  %s3543_s24 = smov 38   ;;  %v711_v25 = vld [vmem:[%s3443_s0 + $0x2] sm:$0x1] }
  0x93   :  { %v139_v28 = vpop.permute.xlu1 %138  ;;  %v133_v29 = vpop.permute.xlu0 %132 }
  0x94   :  { %135 = vst.msk [vmem:[#allocation2 + $0x1] sm:$0x1] %vm36_vm2, %v133_v29  ;;  %v723_v29 = vld [vmem:[%s3443_s0 + $0x4] sm:$0x1] }
  0x95   :  { %141 = vst.msk [vmem:[#allocation2 + $0x1] sm:$0x1] %vm43_vm3, %v139_v28  ;;  %492 = vrot.lane.b32.xlu1 %v490_v26, %s3537_s7  ;;  %486 = vrot.lane.b32.xlu0 %v484_v27, %s3501_s5  ;;  %s3548_s5 = smov 98   ;;  %v729_v28 = vld [vmem:[%s3443_s0 + $0x5] sm:$0x1] }
  0x97   :  { %v151_v32 = vpop.permute.xlu1 %150  ;;  %v145_v33 = vpop.permute.xlu0 %144 }
  0x98   :  { %147 = vst.msk [vmem:[#allocation2 + $0x1] sm:$0x1] %vm50_vm4, %v145_v33  ;;  %v735_v33 = vld [vmem:[%s3443_s0 + $0x6] sm:$0x1] }
  0x99   :  { %153 = vst.msk [vmem:[#allocation2 + $0x1] sm:$0x1] %vm57_vm5, %v151_v32  ;;  %504 = vrot.lane.b32.xlu1 %v502_v30, %s3538_s28  ;;  %498 = vrot.lane.b32.xlu0 %v496_v31, %s3539_s29  ;;  %v741_v32 = vld [vmem:[%s3443_s0 + $0x7] sm:$0x1] }
  0x9b   :  { %v163_v37 = vpop.permute.xlu1 %162  ;;  %v157_v38 = vpop.permute.xlu0 %156 }
  0x9c   :  { %159 = vst.msk [vmem:[#allocation2 + $0x1] sm:$0x1] %vm64_vm6, %v157_v38 }
  0x9d   :  { %165 = vst.msk [vmem:[#allocation2 + $0x1] sm:$0x1] %vm71_vm7, %v163_v37  ;;  %516 = vrot.lane.b32.xlu1 %v514_v34, %s3540_s14  ;;  %510 = vrot.lane.b32.xlu0 %v508_v35, %s3541_s21  ;;  %v747_v37 = vld [vmem:[%s3443_s0 + $0x8] sm:$0x1] }
  0x9f   :  { %v175_v41 = vpop.permute.xlu1 %174  ;;  %v169_v42 = vpop.permute.xlu0 %168 }
  0xa0   :  { %171 = vst.msk [vmem:[#allocation2 + $0x1] sm:$0x1] %vm78_vm8, %v169_v42 }
  0xa1   :  { %177 = vst.msk [vmem:[#allocation2 + $0x1] sm:$0x1] %vm85_vm9, %v175_v41  ;;  %529 = vrot.lane.b32.xlu1 %v527_v39, %s3509_s15  ;;  %523 = vrot.lane.b32.xlu0 %v521_v40, %s3542_s18  ;;  %s3545_s15 = smov 84   ;;  %v668_v40 = vld [vmem:[%s3443_s0 + $0x9] sm:$0x1] }
  0xa2   :  { %v759_v41 = vld [vmem:[%s3443_s0 + $0xa] sm:$0x1] }
  0xa3   :  { %v188_v45 = vpop.permute.xlu1 %187  ;;  %v181_v46 = vpop.permute.xlu0 %180 }
  0xa4   :  { %183 = vst.msk [vmem:[#allocation2 + $0x1] sm:$0x1] %vm92_vm10, %v181_v46 }
  0xa5   :  { %184 = vst.msk [vmem:[#allocation2 + $0x9] sm:$0x1] %vm94_vm11, %v181_v46  ;;  %541 = vrot.lane.b32.xlu1 %v539_v43, %s3517_s9  ;;  %535 = vrot.lane.b32.xlu0 %v533_v44, %s3543_s24  ;;  %s3554_s9 = smov 54   ;;  %v674_v44 = vld [vmem:[%s3443_s0 + $0xa] sm:$0x1] }
  0xa6   :  { %190 = vst.msk [vmem:[#allocation2 + $0x9] sm:$0x1] %vm101_vm12, %v188_v45  ;;  %v765_v45 = vld [vmem:[%s3443_s0 + $0xb] sm:$0x1] }
  0xa7   :  { %v200_v49 = vpop.permute.xlu1 %199  ;;  %v194_v50 = vpop.permute.xlu0 %193 }
  0xa8   :  { %196 = vst.msk [vmem:[#allocation2 + $0x9] sm:$0x1] %vm108_vm13, %v194_v50 }
  0xa9   :  { %202 = vst.msk [vmem:[#allocation2 + $0x9] sm:$0x1] %vm115_vm14, %v200_v49  ;;  %555 = vrot.lane.b32.xlu1 %v553_v47, %s3511_s23  ;;  %549 = vrot.lane.b32.xlu0 %v547_v48, %s3515_s17  ;;  %s3549_s23 = smov 12   ;;  %s3551_s17 = smov 40   ;;  %v680_v48 = vld [vmem:[%s3443_s0 + $0xb] sm:$0x1] }
  0xaa   :  { %v772_v49 = vld [vmem:[%s3443_s0 + $0xc] sm:$0x1] }
  0xab   :  { %v212_v53 = vpop.permute.xlu1 %211  ;;  %v206_v54 = vpop.permute.xlu0 %205 }
  0xac   :  { %214 = vst.msk [vmem:[#allocation2 + $0x2] sm:$0x1] %vm29_vm0, %v212_v53  ;;  %v778_v53 = vld [vmem:[%s3443_s0 + $0xd] sm:$0x1] }
  0xad   :  { %208 = vst.msk [vmem:[#allocation2 + $0x9] sm:$0x1] %vm122_vm15, %v206_v54  ;;  %567 = vrot.lane.b32.xlu1 %v565_v51, %s3513_s22  ;;  %561 = vrot.lane.b32.xlu0 %v559_v52, %s3544_s16  ;;  %s3552_s22 = smov 26   ;;  %v687_v52 = vld [vmem:[%s3443_s0 + $0xc] sm:$0x1]  ;;  %s3559_s16 = smov 52  }
  0xaf   :  { %v224_v57 = vpop.permute.xlu1 %223  ;;  %v218_v58 = vpop.permute.xlu0 %217 }
  0xb0   :  { %220 = vst.msk [vmem:[#allocation2 + $0x2] sm:$0x1] %vm36_vm2, %v218_v58 }
  0xb1   :  { %226 = vst.msk [vmem:[#allocation2 + $0x2] sm:$0x1] %vm43_vm3, %v224_v57  ;;  %579 = vrot.lane.b32.xlu1 %v577_v55, %s3545_s15  ;;  %573 = vrot.lane.b32.xlu0 %v571_v56, %s3546_s8  ;;  %v693_v56 = vld [vmem:[%s3443_s0 + $0xd] sm:$0x1]  ;;  %v784_v57 = vld [vmem:[%s3443_s0 + $0xe] sm:$0x1] }
  0xb2   :  { %s3560_s15 = smov 127   ;;  %s3562_s8 = smov 27  }
  0xb3   :  { %v236_v61 = vpop.permute.xlu1 %235  ;;  %v230_v62 = vpop.permute.xlu0 %229 }
  0xb4   :  { %232 = vst.msk [vmem:[#allocation2 + $0x2] sm:$0x1] %vm50_vm4, %v230_v62 }
  0xb5   :  { %238 = vst.msk [vmem:[#allocation2 + $0x2] sm:$0x1] %vm57_vm5, %v236_v61  ;;  %591 = vrot.lane.b32.xlu1 %v589_v59, %s3547_s13  ;;  %585 = vrot.lane.b32.xlu0 %v583_v60, %s3548_s5  ;;  %s3557_s13 = smov 41   ;;  %v699_v60 = vld [vmem:[%s3443_s0 + $0xe] sm:$0x1]  ;;  %s3564_s5 = smov 42  }
  0xb6   :  { %v790_v61 = vld [vmem:[%s3443_s0 + $0xf] sm:$0x1] }
  0xb7   :  { %v248_v1 = vpop.permute.xlu1 %247  ;;  %v242_v2 = vpop.permute.xlu0 %241 }
  0xb8   :  { %244 = vst.msk [vmem:[#allocation2 + $0x2] sm:$0x1] %vm64_vm6, %v242_v2 }
  0xb9   :  { %250 = vst.msk [vmem:[#allocation2 + $0x2] sm:$0x1] %vm71_vm7, %v248_v1  ;;  %604 = vrot.lane.b32.xlu1 %v602_v63, %s3549_s23  ;;  %597 = vrot.lane.b32.xlu0 %v595_v0, %s3550_s20  ;;  %v1918_v0 = vld [vmem:[%s3443_s0 + $0x12] sm:$0x1]  ;;  %v705_v1 = vld [vmem:[%s3443_s0 + $0xf] sm:$0x1] }
  0xbb   :  { %v260_v5 = vpop.permute.xlu1 %259  ;;  %v254_v6 = vpop.permute.xlu0 %253 }
  0xbc   :  { %256 = vst.msk [vmem:[#allocation2 + $0x2] sm:$0x1] %vm78_vm8, %v254_v6 }
  0xbd   :  { %262 = vst.msk [vmem:[#allocation2 + $0x2] sm:$0x1] %vm85_vm9, %v260_v5  ;;  %616 = vrot.lane.b32.xlu1 %v614_v3, %s3551_s17  ;;  %610 = vrot.lane.b32.xlu0 %v608_v4, %s3552_s22  ;;  %v1820_v4 = vld [vmem:[%s3443_s0 + $0x10] sm:$0x1]  ;;  %v1919_v5 = vld [vmem:[%s3443_s0 + $0x13] sm:$0x1] }
  0xbf   :  { %v273_v9 = vpop.permute.xlu1 %272  ;;  %v266_v10 = vpop.permute.xlu0 %265 }
  0xc0   :  { %268 = vst.msk [vmem:[#allocation2 + $0x2] sm:$0x1] %vm92_vm10, %v266_v10 }
  0xc1   :  { %269 = vst.msk [vmem:[#allocation2 + $0xa] sm:$0x1] %vm94_vm11, %v266_v10  ;;  %628 = vrot.lane.b32.xlu1 %v626_v7, %s3553_s3  ;;  %622 = vrot.lane.b32.xlu0 %v620_v8, %s3554_s9  ;;  %v1862_v8 = vld [vmem:[%s3443_s0 + $0x11] sm:$0x1]  ;;  %s3567_s3 = smov 84  }
  0xc2   :  { %275 = vst.msk [vmem:[#allocation2 + $0xa] sm:$0x1] %vm101_vm12, %v273_v9  ;;  %v1834_v9 = vld [vmem:[%s3443_s0 + $0x10] sm:$0x1] }
  0xc3   :  { %v285_v13 = vpop.permute.xlu1 %284  ;;  %v279_v15 = vpop.permute.xlu0 %278 }
  0xc4   :  { %281 = vst.msk [vmem:[#allocation2 + $0xa] sm:$0x1] %vm108_vm13, %v279_v15 }
  0xc5   :  { %287 = vst.msk [vmem:[#allocation2 + $0xa] sm:$0x1] %vm115_vm14, %v285_v13  ;;  %640 = vrot.lane.b32.xlu1 %v638_v11, %s3555_s1  ;;  %634 = vrot.lane.b32.xlu0 %v632_v12, %s3556_s2  ;;  %s3558_s1 = smov 24   ;;  %v1904_v12 = vld [vmem:[%s3443_s0 + $0x12] sm:$0x1] }
  0xc6   :  { %v1876_v13 = vld [vmem:[%s3443_s0 + $0x11] sm:$0x1] }
  0xc7   :  { %v299_v18 = vpop.permute.xlu1 %298  ;;  %v291_v19 = vpop.permute.xlu0 %290 }
  0xc8   :  { %301 = vst.msk [vmem:[#allocation2 + $0x3] sm:$0x1] %vm36_vm2, %v299_v18  ;;  %v1920_v18 = vld [vmem:[%s3443_s0 + $0x14] sm:$0x1] }
  0xc9   :  { %293 = vst.msk [vmem:[#allocation2 + $0xa] sm:$0x1] %vm122_vm15, %v291_v19  ;;  %652 = vrot.lane.b32.xlu1 %v650_v16, %s3528_s12  ;;  %646 = vrot.lane.b32.xlu0 %v644_v17, %s3557_s13  ;;  %v1807_v17 = vld [vmem:[%s3443_s0 + $0x11] sm:$0x1] }
  0xcb   :  { %v311_v22 = vpop.permute.xlu1 %310  ;;  %v305_v23 = vpop.permute.xlu0 %304 }
  0xcc   :  { %307 = vst.msk [vmem:[#allocation2 + $0x3] sm:$0x1] %vm43_vm3, %v305_v23 }
  0xcd   :  { %313 = vst.msk [vmem:[#allocation2 + $0x3] sm:$0x1] %vm50_vm4, %v311_v22  ;;  %664 = vrot.lane.b32.xlu1 %v662_v20, %s3530_s10  ;;  %658 = vrot.lane.b32.xlu0 %v656_v21, %s3527_s25  ;;  %v1835_v21 = vld [vmem:[%s3443_s0 + $0x11] sm:$0x1] }
  0xce   :  { %v1821_v22 = vld [vmem:[%s3443_s0 + $0x11] sm:$0x1] }
  0xcf   :  { %v323_v26 = vpop.permute.xlu1 %322  ;;  %v317_v27 = vpop.permute.xlu0 %316 }
  0xd0   :  { %319 = vst.msk [vmem:[#allocation2 + $0x3] sm:$0x1] %vm57_vm5, %v317_v27 }
  0xd1   :  { %325 = vst.msk [vmem:[#allocation2 + $0x3] sm:$0x1] %vm64_vm6, %v323_v26  ;;  %719 = vrot.lane.b32.xlu1 %v717_v24, %s3549_s23  ;;  %713 = vrot.lane.b32.xlu0 %v711_v25, %s3550_s20  ;;  %v1863_v25 = vld [vmem:[%s3443_s0 + $0x12] sm:$0x1] }
  0xd2   :  { %v1849_v26 = vld [vmem:[%s3443_s0 + $0x12] sm:$0x1] }
  0xd3   :  { %v335_v30 = vpop.permute.xlu1 %334  ;;  %v329_v31 = vpop.permute.xlu0 %328 }
  0xd4   :  { %331 = vst.msk [vmem:[#allocation2 + $0x3] sm:$0x1] %vm71_vm7, %v329_v31 }
  0xd5   :  { %337 = vst.msk [vmem:[#allocation2 + $0x3] sm:$0x1] %vm78_vm8, %v335_v30  ;;  %731 = vrot.lane.b32.xlu1 %v729_v28, %s3551_s17  ;;  %725 = vrot.lane.b32.xlu0 %v723_v29, %s3552_s22  ;;  %v1891_v29 = vld [vmem:[%s3443_s0 + $0x13] sm:$0x1]  ;;  %v1877_v30 = vld [vmem:[%s3443_s0 + $0x12] sm:$0x1] }
  0xd7   :  { %v347_v34 = vpop.permute.xlu1 %346  ;;  %v341_v35 = vpop.permute.xlu0 %340 }
  0xd8   :  { %350 = vst.msk [vmem:[#allocation2 + $0xb] sm:$0x1] %vm94_vm11, %v347_v34 }
  0xd9   :  { %343 = vst.msk [vmem:[#allocation2 + $0x3] sm:$0x1] %vm85_vm9, %v341_v35  ;;  %743 = vrot.lane.b32.xlu1 %v741_v32, %s3537_s7  ;;  %737 = vrot.lane.b32.xlu0 %v735_v33, %s3554_s9  ;;  %v1921_v33 = vld [vmem:[%s3443_s0 + $0x15] sm:$0x1] }
  0xda   :  { %349 = vst.msk [vmem:[#allocation2 + $0x3] sm:$0x1] %vm92_vm10, %v347_v34  ;;  %v1905_v34 = vld [vmem:[%s3443_s0 + $0x13] sm:$0x1] }
  0xdb   :  { %v360_v38 = vpop.permute.xlu1 %359  ;;  %v354_v39 = vpop.permute.xlu0 %353 }
  0xdc   :  { %356 = vst.msk [vmem:[#allocation2 + $0xb] sm:$0x1] %vm101_vm12, %v354_v39 }
  0xdd   :  { %362 = vst.msk [vmem:[#allocation2 + $0xb] sm:$0x1] %vm108_vm13, %v360_v38  ;;  %755 = vrot.lane.b32.xlu1 %v753_v36, %s3538_s28  ;;  %749 = vrot.lane.b32.xlu0 %v747_v37, %s3539_s29  ;;  %v1822_v37 = vld [vmem:[%s3443_s0 + $0x12] sm:$0x1] }
  0xde   :  { %v1808_v38 = vld [vmem:[%s3443_s0 + $0x12] sm:$0x1] }
  0xdf   :  { %v372_v42 = vpop.permute.xlu1 %371  ;;  %v366_v43 = vpop.permute.xlu0 %365 }
  0xe0   :  { %368 = vst.msk [vmem:[#allocation2 + $0xb] sm:$0x1] %vm115_vm14, %v366_v43 }
  0xe1   :  { %374 = vst.msk [vmem:[#allocation2 + $0xb] sm:$0x1] %vm122_vm15, %v372_v42  ;;  %670 = vrot.lane.b32.xlu1 %v668_v40, %s3529_s26  ;;  %761 = vrot.lane.b32.xlu0 %v759_v41, %s3541_s21  ;;  %v1850_v41 = vld [vmem:[%s3443_s0 + $0x13] sm:$0x1]  ;;  %v1836_v42 = vld [vmem:[%s3443_s0 + $0x12] sm:$0x1] }
  0xe3   :  { %v384_v46 = vpop.permute.xlu1 %383  ;;  %v378_v47 = vpop.permute.xlu0 %377 }
  0xe4   :  { %380 = vst.msk [vmem:[#allocation2 + $0x4] sm:$0x1] %vm29_vm0, %v378_v47 }
  0xe5   :  { %386 = vst.msk [vmem:[#allocation2 + $0x4] sm:$0x1] %vm36_vm2, %v384_v46  ;;  %676 = vrot.lane.b32.xlu1 %v674_v44, %s3532_s19  ;;  %767 = vrot.lane.b32.xlu0 %v765_v45, %s3540_s14  ;;  %s3563_s19 = smov 28   ;;  %v1878_v45 = vld [vmem:[%s3443_s0 + $0x13] sm:$0x1] }
  0xe6   :  { %v1864_v46 = vld [vmem:[%s3443_s0 + $0x13] sm:$0x1] }
  0xe7   :  { %v396_v50 = vpop.permute.xlu1 %395  ;;  %v390_v51 = vpop.permute.xlu0 %389 }
  0xe8   :  { %392 = vst.msk [vmem:[#allocation2 + $0x4] sm:$0x1] %vm43_vm3, %v390_v51 }
  0xe9   :  { %398 = vst.msk [vmem:[#allocation2 + $0x4] sm:$0x1] %vm50_vm4, %v396_v50  ;;  %682 = vrot.lane.b32.xlu1 %v680_v48, %s3531_s6  ;;  %774 = vrot.lane.b32.xlu0 %v772_v49, %s3542_s18  ;;  %v1906_v49 = vld [vmem:[%s3443_s0 + $0x14] sm:$0x1] }
  0xea   :  { %v1892_v50 = vld [vmem:[%s3443_s0 + $0x14] sm:$0x1] }
  0xeb   :  { %v408_v54 = vpop.permute.xlu1 %407  ;;  %v402_v55 = vpop.permute.xlu0 %401 }
  0xec   :  { %404 = vst.msk [vmem:[#allocation2 + $0x4] sm:$0x1] %vm57_vm5, %v402_v55 }
  0xed   :  { %410 = vst.msk [vmem:[#allocation2 + $0x4] sm:$0x1] %vm64_vm6, %v408_v54  ;;  %689 = vrot.lane.b32.xlu1 %v687_v52, %s3534_s4  ;;  %780 = vrot.lane.b32.xlu0 %v778_v53, %s3558_s1  ;;  %v1927_v53 = vld [vmem:[%s3443_s0 + $0x1b] sm:$0x1]  ;;  %v1922_v54 = vld [vmem:[%s3443_s0 + $0x16] sm:$0x1] }
  0xef   :  { %v420_v58 = vpop.permute.xlu1 %419  ;;  %v414_v59 = vpop.permute.xlu0 %413 }
  0xf0   :  { %416 = vst.msk [vmem:[#allocation2 + $0x4] sm:$0x1] %vm71_vm7, %v414_v59 }
  0xf1   :  { %422 = vst.msk [vmem:[#allocation2 + $0x4] sm:$0x1] %vm78_vm8, %v420_v58  ;;  %695 = vrot.lane.b32.xlu1 %v693_v56, %s3533_s27  ;;  %786 = vrot.lane.b32.xlu0 %v784_v57, %s3543_s24  ;;  %v1823_v57 = vld [vmem:[%s3443_s0 + $0x13] sm:$0x1] }
  0xf2   :  { %v1809_v58 = vld [vmem:[%s3443_s0 + $0x13] sm:$0x1] }
  0xf3   :  { %v432_v62 = vpop.permute.xlu1 %431  ;;  %v426_v63 = vpop.permute.xlu0 %425 }
  0xf4   :  { %435 = vst.msk [vmem:[#allocation2 + $0xc] sm:$0x1] %vm94_vm11, %v432_v62 }
  0xf5   :  { %428 = vst.msk [vmem:[#allocation2 + $0x4] sm:$0x1] %vm85_vm9, %v426_v63  ;;  %701 = vrot.lane.b32.xlu1 %v699_v60, %s3536_s11  ;;  %792 = vrot.lane.b32.xlu0 %v790_v61, %s3559_s16  ;;  %v1851_v61 = vld [vmem:[%s3443_s0 + $0x14] sm:$0x1] }
  0xf6   :  { %434 = vst.msk [vmem:[#allocation2 + $0x4] sm:$0x1] %vm92_vm10, %v432_v62  ;;  %v1837_v62 = vld [vmem:[%s3443_s0 + $0x13] sm:$0x1] }
  0xf7   :  { %v445_v2 = vpop.permute.xlu1 %444  ;;  %v439_v3 = vpop.permute.xlu0 %438 }
  0xf8   :  { %441 = vst.msk [vmem:[#allocation2 + $0xc] sm:$0x1] %vm101_vm12, %v439_v3 }
  0xf9   :  { %447 = vst.msk [vmem:[#allocation2 + $0xc] sm:$0x1] %vm108_vm13, %v445_v2  ;;  %1601 = vrot.lane.b32.xlu1 %v1918_v0, %s3550_s20  ;;  %707 = vrot.lane.b32.xlu0 %v705_v1, %s3535_s30  ;;  %s3561_s30 = smov 14   ;;  %v1879_v1 = vld [vmem:[%s3443_s0 + $0x14] sm:$0x1] }
  0xfa   :  { %v1865_v2 = vld [vmem:[%s3443_s0 + $0x14] sm:$0x1] }
  0xfb   :  { %v457_v6 = vpop.permute.xlu1 %456  ;;  %v451_v7 = vpop.permute.xlu0 %450 }
  0xfc   :  { %453 = vst.msk [vmem:[#allocation2 + $0xc] sm:$0x1] %vm115_vm14, %v451_v7 }
  0xfd   :  { %459 = vst.msk [vmem:[#allocation2 + $0xc] sm:$0x1] %vm122_vm15, %v457_v6  ;;  %1014 = vrot.lane.b32.xlu1 %v1820_v4, %s3560_s15  ;;  %1607 = vrot.lane.b32.xlu0 %v1919_v5, %s3549_s23  ;;  %v1907_v5 = vld [vmem:[%s3443_s0 + $0x15] sm:$0x1] }
  0xfe   :  { %v1893_v6 = vld [vmem:[%s3443_s0 + $0x15] sm:$0x1] }
  0xff   :  { %v469_v10 = vpop.permute.xlu1 %468  ;;  %v463_v11 = vpop.permute.xlu0 %462 }
 0x100   :  { %465 = vst.msk [vmem:[#allocation2 + $0x5] sm:$0x1] %vm29_vm0, %v463_v11 }
 0x101   :  { %471 = vst.msk [vmem:[#allocation2 + $0x5] sm:$0x1] %vm36_vm2, %v469_v10  ;;  %1265 = vrot.lane.b32.xlu1 %v1862_v8, %s3560_s15  ;;  %1099 = vrot.lane.b32.xlu0 %v1834_v9, %s3550_s20  ;;  %v1928_v9 = vld [vmem:[%s3443_s0 + $0x1c] sm:$0x1]  ;;  %v1923_v10 = vld [vmem:[%s3443_s0 + $0x17] sm:$0x1] }
 0x103   :  { %v481_v15 = vpop.permute.xlu1 %480  ;;  %v475_v16 = vpop.permute.xlu0 %474 }
 0x104   :  { %477 = vst.msk [vmem:[#allocation2 + $0x5] sm:$0x1] %vm43_vm3, %v475_v16 }
 0x105   :  { %483 = vst.msk [vmem:[#allocation2 + $0x5] sm:$0x1] %vm50_vm4, %v481_v15  ;;  %1516 = vrot.lane.b32.xlu1 %v1904_v12, %s3560_s15  ;;  %1350 = vrot.lane.b32.xlu0 %v1876_v13, %s3550_s20  ;;  %v1815_v13 = vld [vmem:[%s3443_s0 + $0x19] sm:$0x1]  ;;  %v1810_v15 = vld [vmem:[%s3443_s0 + $0x14] sm:$0x1] }
 0x106   :  { %s3573_s15 = sld [smem:[#allocation6_spill]] }
 0x107   :  { %v493_v19 = vpop.permute.xlu1 %492  ;;  %v487_v20 = vpop.permute.xlu0 %486 }
 0x108   :  { %489 = vst.msk [vmem:[#allocation2 + $0x5] sm:$0x1] %vm57_vm5, %v487_v20 }
 0x109   :  { %495 = vst.msk [vmem:[#allocation2 + $0x5] sm:$0x1] %vm64_vm6, %v493_v19  ;;  %935 = vrot.lane.b32.xlu1 %v1807_v17, %s3561_s30  ;;  %1613 = vrot.lane.b32.xlu0 %v1920_v18, %s3552_s22  ;;  %v1829_v18 = vld [vmem:[%s3443_s0 + $0x19] sm:$0x1]  ;;  %v1824_v19 = vld [vmem:[%s3443_s0 + $0x14] sm:$0x1] }
 0x10b   :  { %v505_v23 = vpop.permute.xlu1 %504  ;;  %v499_v24 = vpop.permute.xlu0 %498 }
 0x10c   :  { %501 = vst.msk [vmem:[#allocation2 + $0x5] sm:$0x1] %vm71_vm7, %v499_v24 }
 0x10d   :  { %507 = vst.msk [vmem:[#allocation2 + $0x5] sm:$0x1] %vm78_vm8, %v505_v23  ;;  %1105 = vrot.lane.b32.xlu1 %v1835_v21, %s3549_s23  ;;  %1020 = vrot.lane.b32.xlu0 %v1821_v22, %s3556_s2  ;;  %v1843_v22 = vld [vmem:[%s3443_s0 + $0x19] sm:$0x1]  ;;  %v1838_v23 = vld [vmem:[%s3443_s0 + $0x14] sm:$0x1] }
 0x10f   :  { %v517_v27 = vpop.permute.xlu1 %516  ;;  %v511_v28 = vpop.permute.xlu0 %510 }
 0x110   :  { %520 = vst.msk [vmem:[#allocation2 + $0xd] sm:$0x1] %vm94_vm11, %v517_v27 }
 0x111   :  { %513 = vst.msk [vmem:[#allocation2 + $0x5] sm:$0x1] %vm85_vm9, %v511_v28  ;;  %1271 = vrot.lane.b32.xlu1 %v1863_v25, %s3556_s2  ;;  %1186 = vrot.lane.b32.xlu0 %v1849_v26, %s3561_s30  ;;  %v1857_v26 = vld [vmem:[%s3443_s0 + $0x1a] sm:$0x1] }
 0x112   :  { %519 = vst.msk [vmem:[#allocation2 + $0x5] sm:$0x1] %vm92_vm10, %v517_v27  ;;  %v1852_v27 = vld [vmem:[%s3443_s0 + $0x15] sm:$0x1] }
 0x113   :  { %v530_v31 = vpop.permute.xlu1 %529  ;;  %v524_v32 = vpop.permute.xlu0 %523 }
 0x114   :  { %526 = vst.msk [vmem:[#allocation2 + $0xd] sm:$0x1] %vm101_vm12, %v524_v32 }
 0x115   :  { %532 = vst.msk [vmem:[#allocation2 + $0xd] sm:$0x1] %vm108_vm13, %v530_v31  ;;  %1437 = vrot.lane.b32.xlu1 %v1891_v29, %s3561_s30  ;;  %1356 = vrot.lane.b32.xlu0 %v1877_v30, %s3549_s23  ;;  %v1871_v30 = vld [vmem:[%s3443_s0 + $0x1a] sm:$0x1]  ;;  %v1866_v31 = vld [vmem:[%s3443_s0 + $0x15] sm:$0x1] }
 0x117   :  { %v542_v35 = vpop.permute.xlu1 %541  ;;  %v536_v36 = vpop.permute.xlu0 %535 }
 0x118   :  { %538 = vst.msk [vmem:[#allocation2 + $0xd] sm:$0x1] %vm115_vm14, %v536_v36 }
 0x119   :  { %544 = vst.msk [vmem:[#allocation2 + $0xd] sm:$0x1] %vm122_vm15, %v542_v35  ;;  %1619 = vrot.lane.b32.xlu1 %v1921_v33, %s3551_s17  ;;  %1522 = vrot.lane.b32.xlu0 %v1905_v34, %s3556_s2  ;;  %v1885_v34 = vld [vmem:[%s3443_s0 + $0x1a] sm:$0x1]  ;;  %v1880_v35 = vld [vmem:[%s3443_s0 + $0x15] sm:$0x1] }
 0x11b   :  { %v556_v39 = vpop.permute.xlu1 %555  ;;  %v550_v40 = vpop.permute.xlu0 %549 }
 0x11c   :  { %552 = vst.msk [vmem:[#allocation2 + $0x6] sm:$0x1] %vm36_vm2, %v550_v40 }
 0x11d   :  { %558 = vst.msk [vmem:[#allocation2 + $0x6] sm:$0x1] %vm43_vm3, %v556_v39  ;;  %1026 = vrot.lane.b32.xlu1 %v1822_v37, %s3562_s8  ;;  %941 = vrot.lane.b32.xlu0 %v1808_v38, %s3563_s19  ;;  %v1899_v38 = vld [vmem:[%s3443_s0 + $0x1b] sm:$0x1]  ;;  %v1894_v39 = vld [vmem:[%s3443_s0 + $0x16] sm:$0x1] }
 0x11f   :  { %v568_v43 = vpop.permute.xlu1 %567  ;;  %v562_v44 = vpop.permute.xlu0 %561 }
 0x120   :  { %564 = vst.msk [vmem:[#allocation2 + $0x6] sm:$0x1] %vm50_vm4, %v562_v44 }
 0x121   :  { %570 = vst.msk [vmem:[#allocation2 + $0x6] sm:$0x1] %vm57_vm5, %v568_v43  ;;  %1192 = vrot.lane.b32.xlu1 %v1850_v41, %s3563_s19  ;;  %1111 = vrot.lane.b32.xlu0 %v1836_v42, %s3552_s22  ;;  %v1913_v42 = vld [vmem:[%s3443_s0 + $0x1b] sm:$0x1]  ;;  %v1908_v43 = vld [vmem:[%s3443_s0 + $0x16] sm:$0x1] }
 0x123   :  { %v580_v47 = vpop.permute.xlu1 %579  ;;  %v574_v48 = vpop.permute.xlu0 %573 }
 0x124   :  { %576 = vst.msk [vmem:[#allocation2 + $0x6] sm:$0x1] %vm64_vm6, %v574_v48  ;;  %v1890_v48 = vld [vmem:[%s3443_s0 + $0x12] sm:$0x1] }
 0x125   :  { %582 = vst.msk [vmem:[#allocation2 + $0x6] sm:$0x1] %vm71_vm7, %v580_v47  ;;  %1362 = vrot.lane.b32.xlu1 %v1878_v45, %s3552_s22  ;;  %1277 = vrot.lane.b32.xlu0 %v1864_v46, %s3562_s8  ;;  %v1806_v46 = vld [vmem:[%s3443_s0 + $0x10] sm:$0x1]  ;;  %v1848_v47 = vld [vmem:[%s3443_s0 + $0x11] sm:$0x1] }
 0x127   :  { %v592_v51 = vpop.permute.xlu1 %591  ;;  %v586_v52 = vpop.permute.xlu0 %585 }
 0x128   :  { %588 = vst.msk [vmem:[#allocation2 + $0x6] sm:$0x1] %vm78_vm8, %v586_v52 }
 0x129   :  { %594 = vst.msk [vmem:[#allocation2 + $0x6] sm:$0x1] %vm85_vm9, %v592_v51  ;;  %1528 = vrot.lane.b32.xlu1 %v1906_v49, %s3562_s8  ;;  %1443 = vrot.lane.b32.xlu0 %v1892_v50, %s3563_s19  ;;  %s3565_s19 = smov 56   ;;  %v1929_v49 = vld [vmem:[%s3443_s0 + $0x1d] sm:$0x1] }
 0x12a   :  { %v1924_v50 = vld [vmem:[%s3443_s0 + $0x18] sm:$0x1] }
 0x12b   :  { %v605_v55 = vpop.permute.xlu1 %604  ;;  %v598_v56 = vpop.permute.xlu0 %597 }
 0x12c   :  { %600 = vst.msk [vmem:[#allocation2 + $0x6] sm:$0x1] %vm92_vm10, %v598_v56 }
 0x12d   :  { %601 = vst.msk [vmem:[#allocation2 + $0xe] sm:$0x1] %vm94_vm11, %v598_v56  ;;  %1655 = vrot.lane.b32.xlu1 %v1927_v53, %s3540_s14  ;;  %1625 = vrot.lane.b32.xlu0 %v1922_v54, %s3554_s9  ;;  %v1816_v54 = vld [vmem:[%s3443_s0 + $0x1a] sm:$0x1] }
 0x12e   :  { %607 = vst.msk [vmem:[#allocation2 + $0xe] sm:$0x1] %vm101_vm12, %v605_v55  ;;  %v1811_v55 = vld [vmem:[%s3443_s0 + $0x15] sm:$0x1] }
 0x12f   :  { %v617_v59 = vpop.permute.xlu1 %616  ;;  %v611_v60 = vpop.permute.xlu0 %610 }
 0x130   :  { %613 = vst.msk [vmem:[#allocation2 + $0xe] sm:$0x1] %vm108_vm13, %v611_v60 }
 0x131   :  { %619 = vst.msk [vmem:[#allocation2 + $0xe] sm:$0x1] %vm115_vm14, %v617_v59  ;;  %1032 = vrot.lane.b32.xlu1 %v1823_v57, %s3557_s13  ;;  %947 = vrot.lane.b32.xlu0 %v1809_v58, %s3564_s5  ;;  %v1830_v58 = vld [vmem:[%s3443_s0 + $0x1a] sm:$0x1]  ;;  %v1825_v59 = vld [vmem:[%s3443_s0 + $0x15] sm:$0x1] }
 0x133   :  { %v629_v63 = vpop.permute.xlu1 %628  ;;  %v623_v0 = vpop.permute.xlu0 %622 }
 0x134   :  { %631 = vst.msk [vmem:[#allocation2 + $0x7] sm:$0x1] %vm29_vm0, %v629_v63  ;;  %v1844_v63 = vld [vmem:[%s3443_s0 + $0x1a] sm:$0x1] }
 0x135   :  { %625 = vst.msk [vmem:[#allocation2 + $0xe] sm:$0x1] %vm122_vm15, %v623_v0  ;;  %1198 = vrot.lane.b32.xlu1 %v1851_v61, %s3564_s5  ;;  %1117 = vrot.lane.b32.xlu0 %v1837_v62, %s3551_s17  ;;  %v1839_v0 = vld [vmem:[%s3443_s0 + $0x15] sm:$0x1] }
 0x137   :  { %v641_v3 = vpop.permute.xlu1 %640  ;;  %v635_v4 = vpop.permute.xlu0 %634 }
 0x138   :  { %637 = vst.msk [vmem:[#allocation2 + $0x7] sm:$0x1] %vm36_vm2, %v635_v4  ;;  %v1858_v4 = vld [vmem:[%s3443_s0 + $0x1b] sm:$0x1] }
 0x139   :  { %643 = vst.msk [vmem:[#allocation2 + $0x7] sm:$0x1] %vm43_vm3, %v641_v3  ;;  %1368 = vrot.lane.b32.xlu1 %v1879_v1, %s3551_s17  ;;  %1283 = vrot.lane.b32.xlu0 %v1865_v2, %s3557_s13 }
 0x13b   :  { %v653_v7 = vpop.permute.xlu1 %652  ;;  %v647_v8 = vpop.permute.xlu0 %646 }
 0x13c   :  { %649 = vst.msk [vmem:[#allocation2 + $0x7] sm:$0x1] %vm50_vm4, %v647_v8 }
 0x13d   :  { %655 = vst.msk [vmem:[#allocation2 + $0x7] sm:$0x1] %vm57_vm5, %v653_v7  ;;  %1534 = vrot.lane.b32.xlu1 %v1907_v5, %s3557_s13  ;;  %1449 = vrot.lane.b32.xlu0 %v1893_v6, %s3564_s5  ;;  %s3566_s13 = smov 70   ;;  %v1853_v5 = vld [vmem:[%s3443_s0 + $0x16] sm:$0x1] }
 0x13f   :  { %v665_v11 = vpop.permute.xlu1 %664  ;;  %v659_v12 = vpop.permute.xlu0 %658 }
 0x140   :  { %661 = vst.msk [vmem:[#allocation2 + $0x7] sm:$0x1] %vm64_vm6, %v659_v12 }
 0x141   :  { %667 = vst.msk [vmem:[#allocation2 + $0x7] sm:$0x1] %vm71_vm7, %v665_v11  ;;  %1662 = vrot.lane.b32.xlu1 %v1928_v9, %s3542_s18  ;;  %1631 = vrot.lane.b32.xlu0 %v1923_v10, %s3537_s7  ;;  %v1872_v9 = vld [vmem:[%s3443_s0 + $0x1b] sm:$0x1]  ;;  %v1867_v10 = vld [vmem:[%s3443_s0 + $0x16] sm:$0x1] }
 0x143   :  { %v720_v16 = vpop.permute.xlu1 %719  ;;  %v714_v17 = vpop.permute.xlu0 %713 }
 0x144   :  { %716 = vst.msk [vmem:[#allocation2 + $0x10] sm:$0x1] %vm29_vm0, %v714_v17 }
 0x145   :  { %722 = vst.msk [vmem:[#allocation2 + $0x10] sm:$0x1] %vm36_vm2, %v720_v16  ;;  %983 = vrot.lane.b32.xlu1 %v1815_v13, %s3550_s20  ;;  %953 = vrot.lane.b32.xlu0 %v1810_v15, %s3565_s19  ;;  %v1886_v13 = vld [vmem:[%s3443_s0 + $0x1b] sm:$0x1]  ;;  %v1881_v15 = vld [vmem:[%s3443_s0 + $0x16] sm:$0x1] }
 0x147   :  { %v732_v20 = vpop.permute.xlu1 %731  ;;  %v726_v21 = vpop.permute.xlu0 %725 }
 0x148   :  { %728 = vst.msk [vmem:[#allocation2 + $0x10] sm:$0x1] %vm43_vm3, %v726_v21 }
 0x149   :  { %734 = vst.msk [vmem:[#allocation2 + $0x10] sm:$0x1] %vm50_vm4, %v732_v20  ;;  %1068 = vrot.lane.b32.xlu1 %v1829_v18, %s3531_s6  ;;  %1038 = vrot.lane.b32.xlu0 %v1824_v19, %s3528_s12  ;;  %v1900_v18 = vld [vmem:[%s3443_s0 + $0x1c] sm:$0x1]  ;;  %v1895_v19 = vld [vmem:[%s3443_s0 + $0x17] sm:$0x1] }
 0x14b   :  { %v744_v24 = vpop.permute.xlu1 %743  ;;  %v738_v25 = vpop.permute.xlu0 %737 }
 0x14c   :  { %740 = vst.msk [vmem:[#allocation2 + $0x10] sm:$0x1] %vm57_vm5, %v738_v25 }
 0x14d   :  { %746 = vst.msk [vmem:[#allocation2 + $0x10] sm:$0x1] %vm64_vm6, %v744_v24  ;;  %1153 = vrot.lane.b32.xlu1 %v1843_v22, %s3540_s14  ;;  %1123 = vrot.lane.b32.xlu0 %v1838_v23, %s3554_s9  ;;  %v1914_v22 = vld [vmem:[%s3443_s0 + $0x1c] sm:$0x1]  ;;  %v1909_v23 = vld [vmem:[%s3443_s0 + $0x17] sm:$0x1] }
 0x14f   :  { %v756_v28 = vpop.permute.xlu1 %755  ;;  %v750_v29 = vpop.permute.xlu0 %749 }
 0x150   :  { %752 = vst.msk [vmem:[#allocation2 + $0x10] sm:$0x1] %vm71_vm7, %v750_v29 }
 0x151   :  { %758 = vst.msk [vmem:[#allocation2 + $0x10] sm:$0x1] %vm78_vm8, %v756_v28  ;;  %1234 = vrot.lane.b32.xlu1 %v1857_v26, %s3550_s20  ;;  %1204 = vrot.lane.b32.xlu0 %v1852_v27, %s3565_s19  ;;  %v1930_v26 = vld [vmem:[%s3443_s0 + $0x1e] sm:$0x1]  ;;  %v1925_v27 = vld [vmem:[%s3443_s0 + $0x19] sm:$0x1] }
 0x153   :  { %v671_v32 = vpop.permute.xlu1 %670  ;;  %v762_v33 = vpop.permute.xlu0 %761 }
 0x154   :  { %673 = vst.msk [vmem:[#allocation2 + $0x7] sm:$0x1] %vm78_vm8, %v671_v32 }
 0x155   :  { %764 = vst.msk [vmem:[#allocation2 + $0x10] sm:$0x1] %vm85_vm9, %v762_v33  ;;  %1319 = vrot.lane.b32.xlu1 %v1871_v30, %s3531_s6  ;;  %1289 = vrot.lane.b32.xlu0 %v1866_v31, %s3528_s12  ;;  %v1817_v30 = vld [vmem:[%s3443_s0 + $0x1b] sm:$0x1]  ;;  %v1812_v31 = vld [vmem:[%s3443_s0 + $0x16] sm:$0x1] }
 0x157   :  { %v677_v36 = vpop.permute.xlu1 %676  ;;  %v768_v37 = vpop.permute.xlu0 %767 }
 0x158   :  { %679 = vst.msk [vmem:[#allocation2 + $0x7] sm:$0x1] %vm85_vm9, %v677_v36 }
 0x159   :  { %770 = vst.msk [vmem:[#allocation2 + $0x10] sm:$0x1] %vm92_vm10, %v768_v37  ;;  %1404 = vrot.lane.b32.xlu1 %v1885_v34, %s3540_s14  ;;  %1374 = vrot.lane.b32.xlu0 %v1880_v35, %s3554_s9  ;;  %v1831_v34 = vld [vmem:[%s3443_s0 + $0x1b] sm:$0x1]  ;;  %v1826_v35 = vld [vmem:[%s3443_s0 + $0x16] sm:$0x1] }
 0x15a   :  { %771 = vst.msk [vmem:[#allocation2 + $0x18] sm:$0x1] %vm94_vm11, %v768_v37  ;;  %s2039_s14 = smov [#allocation3]  }
 0x15b   :  { %v683_v40 = vpop.permute.xlu1 %682  ;;  %v775_v41 = vpop.permute.xlu0 %774 }
 0x15c   :  { %685 = vst.msk [vmem:[#allocation2 + $0x7] sm:$0x1] %vm92_vm10, %v683_v40 }
 0x15d   :  { %686 = vst.msk [vmem:[#allocation2 + $0xf] sm:$0x1] %vm94_vm11, %v683_v40  ;;  %1485 = vrot.lane.b32.xlu1 %v1899_v38, %s3550_s20  ;;  %1455 = vrot.lane.b32.xlu0 %v1894_v39, %s3565_s19  ;;  %v1845_v38 = vld [vmem:[%s3443_s0 + $0x1b] sm:$0x1]  ;;  %v1840_v39 = vld [vmem:[%s3443_s0 + $0x16] sm:$0x1] }
 0x15e   :  { %777 = vst.msk [vmem:[#allocation2 + $0x18] sm:$0x1] %vm101_vm12, %v775_v41  ;;  %s3572_s20 = smov 111  }
 0x15f   :  { %v690_v44 = vpop.permute.xlu1 %689  ;;  %v781_v45 = vpop.permute.xlu0 %780 }
 0x160   :  { %692 = vst.msk [vmem:[#allocation2 + $0xf] sm:$0x1] %vm101_vm12, %v690_v44  ;;  %v798_v61 = vld [vmem:[#allocation2 + $0x10] sm:$0xff] }
 0x161   :  { %783 = vst.msk [vmem:[#allocation2 + $0x18] sm:$0x1] %vm108_vm13, %v781_v45  ;;  %1570 = vrot.lane.b32.xlu1 %v1913_v42, %s3531_s6  ;;  %1540 = vrot.lane.b32.xlu0 %v1908_v43, %s3528_s12  ;;  %v1859_v42 = vld [vmem:[%s3443_s0 + $0x1c] sm:$0x1]  ;;  %v1854_v43 = vld [vmem:[%s3443_s0 + $0x17] sm:$0x1] }
 0x162   :  { %s3569_s6 = smov 97  }
 0x163   :  { %v796_v51 = vld [vmem:[#allocation2] sm:$0xff]  ;;  %v696_v52 = vpop.permute.xlu1 %695  ;;  %v787_v53 = vpop.permute.xlu0 %786 }
 0x164   :  { %698 = vst.msk [vmem:[#allocation2 + $0xf] sm:$0x1] %vm108_vm13, %v696_v52 }
 0x165   :  { %789 = vst.msk [vmem:[#allocation2 + $0x18] sm:$0x1] %vm115_vm14, %v787_v53  ;;  %1668 = vrot.lane.b32.xlu1 %v1929_v49, %s3558_s1  ;;  %1637 = vrot.lane.b32.xlu0 %v1924_v50, %s3539_s29  ;;  %v1887_v50 = vld [vmem:[%s3443_s0 + $0x1c] sm:$0x1] }
 0x166   :  { %932 = vst.msk [vmem:[#allocation2] sm:$0x1] %vm29_vm0, %v1806_v46  ;;  %1183 = vst.msk [vmem:[#allocation2 + $0x3] sm:$0x1] %vm29_vm0, %v1848_v47  ;;  %v1873_v46 = vld [vmem:[%s3443_s0 + $0x1c] sm:$0x1] }
 0x167   :  { %1434 = vst.msk [vmem:[#allocation2 + $0x6] sm:$0x1] %vm29_vm0, %v1890_v48  ;;  %v702_v56 = vpop.permute.xlu1 %701  ;;  %v793_v57 = vpop.permute.xlu0 %792  ;;  %v1868_v47 = vld [vmem:[%s3443_s0 + $0x17] sm:$0x1] }
 0x168   :  { %704 = vst.msk [vmem:[#allocation2 + $0xf] sm:$0x1] %vm115_vm14, %v702_v56 }
 0x169   :  { %795 = vst.msk [vmem:[#allocation2 + $0x18] sm:$0x1] %vm122_vm15, %v793_v57  ;;  %990 = vrot.lane.b32.xlu1 %v1816_v54, %s3549_s23  ;;  %959 = vrot.lane.b32.xlu0 %v1811_v55, %s3566_s13  ;;  %v1901_v54 = vld [vmem:[%s3443_s0 + $0x1d] sm:$0x1]  ;;  %v1896_v55 = vld [vmem:[%s3443_s0 + $0x18] sm:$0x1] }
 0x16b   :  { %v1602_v60 = vpop.permute.xlu1 %1601  ;;  %v708_v62 = vpop.permute.xlu0 %707 }
 0x16c   :  { %1604 = vst.msk [vmem:[#allocation2 + $0x10] sm:$0x1] %vm29_vm0, %v1602_v60 }
 0x16d   :  { %710 = vst.msk [vmem:[#allocation2 + $0xf] sm:$0x1] %vm122_vm15, %v708_v62  ;;  %1075 = vrot.lane.b32.xlu1 %v1830_v58, %s3534_s4  ;;  %1044 = vrot.lane.b32.xlu0 %v1825_v59, %s3527_s25  ;;  %v1915_v58 = vld [vmem:[%s3443_s0 + $0x1d] sm:$0x1]  ;;  %v1910_v59 = vld [vmem:[%s3443_s0 + $0x18] sm:$0x1] }
 0x16e   :  { %v1931_v62 = vld [vmem:[%s3443_s0 + $0x1f] sm:$0x1] }
 0x16f   :  { %v1015_v1 = vpop.permute.xlu1 %1014  ;;  %v1608_v2 = vpop.permute.xlu0 %1607 }
 0x170   :  { %v799_v3 = vld [vmem:[#allocation2 + $0x18] sm:$0xff]  ;;  %1017 = vst.msk [vmem:[#allocation2 + $0x1] sm:$0x1] %vm29_vm0, %v1015_v1 }
 0x171   :  { %1610 = vst.msk [vmem:[#allocation2 + $0x10] sm:$0x1] %vm36_vm2, %v1608_v2  ;;  %861 = vmatprep.subr.mxu0 %v799_v3  ;;  %1160 = vrot.lane.b32.xlu1 %v1844_v63, %s3542_s18  ;;  %v1926_v63 = vld [vmem:[%s3443_s0 + $0x1a] sm:$0x1]  ;;  %v1818_v2 = vld [vmem:[%s3443_s0 + $0x1c] sm:$0x1] }
 0x172   :  { %1129 = vrot.lane.b32.xlu0 %v1839_v0, %s3537_s7  ;;  %862 = vmatpush1.msra.mxu0 %v798_v61  ;;  %v1813_v3 = vld [vmem:[%s3443_s0 + $0x17] sm:$0x1] }
 0x173   :  { %v1266_v7 = vpop.permute.xlu1 %1265  ;;  %v1100_v8 = vpop.permute.xlu0 %1099 }
 0x174   :  { %v797_v6 = vld [vmem:[#allocation2 + $0x8] sm:$0xff]  ;;  %1268 = vst.msk [vmem:[#allocation2 + $0x4] sm:$0x1] %vm29_vm0, %v1266_v7  ;;  %1102 = vst.msk [vmem:[#allocation2 + $0x2] sm:$0x1] %vm29_vm0, %v1100_v8 }
 0x175   :  { %863 = vmatprep.subr.mxu0 %v797_v6  ;;  %1241 = vrot.lane.b32.xlu1 %v1858_v4, %s3549_s23  ;;  %v1832_v6 = vld [vmem:[%s3443_s0 + $0x1c] sm:$0x1]  ;;  %v1827_v7 = vld [vmem:[%s3443_s0 + $0x17] sm:$0x1] }
 0x176   :  { %1210 = vrot.lane.b32.xlu0 %v1853_v5, %s3566_s13  ;;  %864 = vmatpush1.msra.mxu0 %v796_v51  ;;  %v1882_v51 = vld [vmem:[%s3443_s0 + $0x17] sm:$0x1] }
 0x177   :  { %v1517_v11 = vpop.permute.xlu1 %1516  ;;  %v1351_v12 = vpop.permute.xlu0 %1350 }
 0x178   :  { %1519 = vst.msk [vmem:[#allocation2 + $0x7] sm:$0x1] %vm29_vm0, %v1517_v11  ;;  %1353 = vst.msk [vmem:[#allocation2 + $0x5] sm:$0x1] %vm29_vm0, %v1351_v12  ;;  %v1841_v11 = vld [vmem:[%s3443_s0 + $0x17] sm:$0x1] }
 0x179   :  { %1326 = vrot.lane.b32.xlu1 %v1872_v9, %s3534_s4  ;;  %vm820_vm0 = vcmask 130048  }
 0x17a   :  { %1295 = vrot.lane.b32.xlu0 %v1867_v10, %s3527_s25  ;;  %v1846_v10 = vld [vmem:[%s3443_s0 + $0x1c] sm:$0x1] }
 0x17b   :  { %v936_v16 = vpop.permute.xlu1 %935  ;;  %v1614_v17 = vpop.permute.xlu0 %1613 }
 0x17c   :  { %938 = vst.msk [vmem:[#allocation2] sm:$0x1] %vm36_vm2, %v936_v16  ;;  %v1855_v16 = vld [vmem:[%s3443_s0 + $0x18] sm:$0x1] }
 0x17d   :  { %1616 = vst.msk [vmem:[#allocation2 + $0x10] sm:$0x1] %vm43_vm3, %v1614_v17  ;;  %1411 = vrot.lane.b32.xlu1 %v1886_v13, %s3542_s18 }
 0x17e   :  { %1380 = vrot.lane.b32.xlu0 %v1881_v15, %s3537_s7  ;;  %v1860_v15 = vld [vmem:[%s3443_s0 + $0x1d] sm:$0x1] }
 0x17f   :  { %v1106_v20 = vpop.permute.xlu1 %1105  ;;  %v1021_v21 = vpop.permute.xlu0 %1020 }
 0x180   :  { %1108 = vst.msk [vmem:[#allocation2 + $0x2] sm:$0x1] %vm36_vm2, %v1106_v20  ;;  %1023 = vst.msk [vmem:[#allocation2 + $0x1] sm:$0x1] %vm36_vm2, %v1021_v21  ;;  %v1869_v20 = vld [vmem:[%s3443_s0 + $0x18] sm:$0x1] }
 0x181   :  { %1492 = vrot.lane.b32.xlu1 %v1900_v18, %s3549_s23 }
 0x182   :  { %1461 = vrot.lane.b32.xlu0 %v1895_v19, %s3566_s13  ;;  %v1874_v19 = vld [vmem:[%s3443_s0 + $0x1d] sm:$0x1]  ;;  %s3574_s13 = sld [smem:[#allocation7_spill]] }
 0x183   :  { %v1272_v24 = vpop.permute.xlu1 %1271  ;;  %v1187_v25 = vpop.permute.xlu0 %1186 }
 0x184   :  { %1274 = vst.msk [vmem:[#allocation2 + $0x4] sm:$0x1] %vm36_vm2, %v1272_v24  ;;  %1189 = vst.msk [vmem:[#allocation2 + $0x3] sm:$0x1] %vm36_vm2, %v1187_v25  ;;  %v1883_v24 = vld [vmem:[%s3443_s0 + $0x18] sm:$0x1] }
 0x185   :  { %1577 = vrot.lane.b32.xlu1 %v1914_v22, %s3534_s4  ;;  %s3568_s4 = smov 98  }
 0x186   :  { %1546 = vrot.lane.b32.xlu0 %v1909_v23, %s3527_s25  ;;  %v1888_v23 = vld [vmem:[%s3443_s0 + $0x1d] sm:$0x1] }
 0x187   :  { %v1438_v28 = vpop.permute.xlu1 %1437  ;;  %v1357_v29 = vpop.permute.xlu0 %1356 }
 0x188   :  { %1440 = vst.msk [vmem:[#allocation2 + $0x6] sm:$0x1] %vm36_vm2, %v1438_v28  ;;  %1359 = vst.msk [vmem:[#allocation2 + $0x5] sm:$0x1] %vm36_vm2, %v1357_v29  ;;  %v1897_v28 = vld [vmem:[%s3443_s0 + $0x19] sm:$0x1] }
 0x189   :  { %1674 = vrot.lane.b32.xlu1 %v1930_v26, %s3543_s24 }
 0x18a   :  { %1643 = vrot.lane.b32.xlu0 %v1925_v27, %s3538_s28  ;;  %v1902_v27 = vld [vmem:[%s3443_s0 + $0x1e] sm:$0x1] }
 0x18b   :  { %v1620_v32 = vpop.permute.xlu1 %1619  ;;  %v1523_v33 = vpop.permute.xlu0 %1522 }
 0x18c   :  { %1622 = vst.msk [vmem:[#allocation2 + $0x10] sm:$0x1] %vm50_vm4, %v1620_v32  ;;  %v1911_v32 = vld [vmem:[%s3443_s0 + $0x19] sm:$0x1] }
 0x18d   :  { %1525 = vst.msk [vmem:[#allocation2 + $0x7] sm:$0x1] %vm36_vm2, %v1523_v33  ;;  %996 = vrot.lane.b32.xlu1 %v1817_v30, %s3552_s22 }
 0x18e   :  { %965 = vrot.lane.b32.xlu0 %v1812_v31, %s3567_s3  ;;  %v1916_v31 = vld [vmem:[%s3443_s0 + $0x1e] sm:$0x1] }
 0x18f   :  { %v1027_v36 = vpop.permute.xlu1 %1026  ;;  %v942_v37 = vpop.permute.xlu0 %941 }
 0x190   :  { %1029 = vst.msk [vmem:[#allocation2 + $0x1] sm:$0x1] %vm43_vm3, %v1027_v36  ;;  %944 = vst.msk [vmem:[#allocation2] sm:$0x1] %vm43_vm3, %v942_v37  ;;  %v1814_v36 = vld [vmem:[%s3443_s0 + $0x18] sm:$0x1] }
 0x191   :  { %1081 = vrot.lane.b32.xlu1 %v1831_v34, %s3533_s27 }
 0x192   :  { %1050 = vrot.lane.b32.xlu0 %v1826_v35, %s3530_s10  ;;  %v1819_v35 = vld [vmem:[%s3443_s0 + $0x1d] sm:$0x1] }
 0x193   :  { %v1193_v40 = vpop.permute.xlu1 %1192  ;;  %v1112_v41 = vpop.permute.xlu0 %1111 }
 0x194   :  { %1195 = vst.msk [vmem:[#allocation2 + $0x3] sm:$0x1] %vm43_vm3, %v1193_v40  ;;  %1114 = vst.msk [vmem:[#allocation2 + $0x2] sm:$0x1] %vm43_vm3, %v1112_v41  ;;  %v1828_v40 = vld [vmem:[%s3443_s0 + $0x18] sm:$0x1] }
 0x195   :  { %1166 = vrot.lane.b32.xlu1 %v1845_v38, %s3558_s1 }
 0x196   :  { %1135 = vrot.lane.b32.xlu0 %v1840_v39, %s3539_s29  ;;  %v1833_v39 = vld [vmem:[%s3443_s0 + $0x1d] sm:$0x1] }
 0x197   :  { %v1363_v44 = vpop.permute.xlu1 %1362  ;;  %v1278_v45 = vpop.permute.xlu0 %1277 }
 0x198   :  { %1365 = vst.msk [vmem:[#allocation2 + $0x5] sm:$0x1] %vm43_vm3, %v1363_v44  ;;  %1280 = vst.msk [vmem:[#allocation2 + $0x4] sm:$0x1] %vm43_vm3, %v1278_v45  ;;  %v1842_v44 = vld [vmem:[%s3443_s0 + $0x18] sm:$0x1] }
 0x199   :  { %1247 = vrot.lane.b32.xlu1 %v1859_v42, %s3552_s22 }
 0x19a   :  { %1216 = vrot.lane.b32.xlu0 %v1854_v43, %s3567_s3  ;;  %v1847_v43 = vld [vmem:[%s3443_s0 + $0x1d] sm:$0x1] }
 0x19b   :  { %v1529_v48 = vpop.permute.xlu1 %1528  ;;  %v1444_v49 = vpop.permute.xlu0 %1443 }
 0x19c   :  { %1531 = vst.msk [vmem:[#allocation2 + $0x7] sm:$0x1] %vm43_vm3, %v1529_v48  ;;  %1446 = vst.msk [vmem:[#allocation2 + $0x6] sm:$0x1] %vm43_vm3, %v1444_v49  ;;  %v1856_v48 = vld [vmem:[%s3443_s0 + $0x19] sm:$0x1] }
 0x19d   :  { %1332 = vrot.lane.b32.xlu1 %v1873_v46, %s3533_s27 }
 0x19e   :  { %1301 = vrot.lane.b32.xlu0 %v1868_v47, %s3530_s10  ;;  %v1861_v47 = vld [vmem:[%s3443_s0 + $0x1e] sm:$0x1] }
 0x19f   :  { %v3081_v52 = vpop.permute.xlu1 %1655  ;;  %v1626_v53 = vpop.permute.xlu0 %1625 }
 0x1a0   :  { %1659 = vst.msk [vmem:[#allocation2 + $0x18] sm:$0x1] %vm94_vm11, %v3081_v52 }
 0x1a1   :  { %1628 = vst.msk [vmem:[#allocation2 + $0x10] sm:$0x1] %vm57_vm5, %v1626_v53  ;;  %1417 = vrot.lane.b32.xlu1 %v1887_v50, %s3558_s1  ;;  %v1870_v53 = vld [vmem:[%s3443_s0 + $0x19] sm:$0x1] }
 0x1a2   :  { %1386 = vrot.lane.b32.xlu0 %v1882_v51, %s3539_s29  ;;  %s3571_s29 = smov 53   ;;  %v1875_v51 = vld [vmem:[%s3443_s0 + $0x1e] sm:$0x1] }
 0x1a3   :  { %v1033_v56 = vpop.permute.xlu1 %1032  ;;  %v948_v57 = vpop.permute.xlu0 %947 }
 0x1a4   :  { %1035 = vst.msk [vmem:[#allocation2 + $0x1] sm:$0x1] %vm50_vm4, %v1033_v56  ;;  %950 = vst.msk [vmem:[#allocation2] sm:$0x1] %vm50_vm4, %v948_v57  ;;  %v3275_v56 = vld [vmem:[%s3573_s15] sm:$0xff] }
 0x1a5   :  { %1498 = vrot.lane.b32.xlu1 %v1901_v54, %s3552_s22  ;;  %v1889_v57 = vld [vmem:[%s3443_s0 + $0x1e] sm:$0x1]  ;;  %1802 = vmatmul.mubr.msk.f32.vlgmr.msra.gmra.mxu0 %vm820_vm0, %v3275_v56 }
 0x1a6   :  { %1467 = vrot.lane.b32.xlu0 %v1896_v55, %s3567_s3  ;;  %903 = vmatprep.mubr.f32.mxu0 %v2013_v14 }
 0x1a7   :  { %v1199_v60 = vpop.permute.xlu1 %1198  ;;  %v1118_v61 = vpop.permute.xlu0 %1117 }
 0x1a8   :  { %1201 = vst.msk [vmem:[#allocation2 + $0x3] sm:$0x1] %vm50_vm4, %v1199_v60  ;;  %1120 = vst.msk [vmem:[#allocation2 + $0x2] sm:$0x1] %vm50_vm4, %v1118_v61  ;;  %v1903_v61 = vld [vmem:[%s3443_s0 + $0x1f] sm:$0x1] }
 0x1a9   :  { %1583 = vrot.lane.b32.xlu1 %v1915_v58, %s3533_s27  ;;  %v1884_v58 = vld [vmem:[%s3443_s0 + $0x19] sm:$0x1] }
 0x1aa   :  { %1552 = vrot.lane.b32.xlu0 %v1910_v59, %s3530_s10 }
 0x1ab   :  { %v1369_v0 = vpop.permute.xlu1 %1368  ;;  %v1284_v1 = vpop.permute.xlu0 %1283 }
 0x1ac   :  { %1371 = vst.msk [vmem:[#allocation2 + $0x5] sm:$0x1] %vm50_vm4, %v1369_v0  ;;  %1286 = vst.msk [vmem:[#allocation2 + $0x4] sm:$0x1] %vm50_vm4, %v1284_v1  ;;  %v3303_v1 = vld [vmem:[%s3573_s15 + $0x8] sm:$0xff] }
 0x1ad   :  { %1680 = vrot.lane.b32.xlu1 %v1931_v62, %s3559_s16  ;;  %v1898_v62 = vld [vmem:[%s3443_s0 + $0x1a] sm:$0x1]  ;;  %1803 = vmatmul.mubr.msk.f32.gmra.mxu0 %vm820_vm0, %v3303_v1 }
 0x1ae   :  { %1649 = vrot.lane.b32.xlu0 %v1926_v63, %s3541_s21  ;;  %909 = vmatprep.mubr.f32.mxu0 %v2013_v14 }
 0x1af   :  { %v1535_v4 = vpop.permute.xlu1 %1534  ;;  %v1450_v5 = vpop.permute.xlu0 %1449 }
 0x1b0   :  { %1537 = vst.msk [vmem:[#allocation2 + $0x7] sm:$0x1] %vm50_vm4, %v1535_v4  ;;  %1452 = vst.msk [vmem:[#allocation2 + $0x6] sm:$0x1] %vm50_vm4, %v1450_v5 }
 0x1b1   :  { %1002 = vrot.lane.b32.xlu1 %v1818_v2, %s3551_s17  ;;  %v1917_v2 = vld [vmem:[%s3443_s0 + $0x1f] sm:$0x1] }
 0x1b2   :  { %971 = vrot.lane.b32.xlu0 %v1813_v3, %s3568_s4  ;;  %v1912_v3 = vld [vmem:[%s3443_s0 + $0x1a] sm:$0x1] }
 0x1b3   :  { %v1663_v8 = vpop.permute.xlu1 %1662  ;;  %v1632_v9 = vpop.permute.xlu0 %1631 }
 0x1b4   :  { %1665 = vst.msk [vmem:[#allocation2 + $0x18] sm:$0x1] %vm101_vm12, %v1663_v8 }
 0x1b5   :  { %1634 = vst.msk [vmem:[#allocation2 + $0x10] sm:$0x1] %vm64_vm6, %v1632_v9  ;;  %1087 = vrot.lane.b32.xlu1 %v1832_v6, %s3536_s11  ;;  %v3317_v6 = vld [vmem:[%s3573_s15 + $0x10] sm:$0xff]  ;;  %v3329_v9 = vld [vmem:[%s3573_s15 + $0x18] sm:$0xff] }
 0x1b6   :  { %1056 = vrot.lane.b32.xlu0 %v1827_v7, %s3569_s6  ;;  %1804 = vmatmul.mubr.msk.f32.gmra.mxu0 %vm820_vm0, %v3317_v6 }
 0x1b7   :  { %v3144_v12 = vpop.permute.xlu1 %983  ;;  %v954_v13 = vpop.permute.xlu0 %953  ;;  %915 = vmatprep.mubr.f32.mxu0 %v2013_v14 }
 0x1b8   :  { %987 = vst.msk [vmem:[#allocation2 + $0x8] sm:$0x1] %vm94_vm11, %v3144_v12 }
 0x1b9   :  { %956 = vst.msk [vmem:[#allocation2] sm:$0x1] %vm57_vm5, %v954_v13  ;;  %1172 = vrot.lane.b32.xlu1 %v1846_v10, %s3543_s24  ;;  %v24_v13 = vld [vmem:[%s3574_s13] sm:$0xff] }
 0x1ba   :  { %1141 = vrot.lane.b32.xlu0 %v1841_v11, %s3538_s28  ;;  %1805 = vmatmul.mubr.msk.f32.gmra.mxu0 %vm820_vm0, %v3329_v9 }
 0x1bb   :  { %v3157_v17 = vpop.permute.xlu1 %1068  ;;  %v1039_v18 = vpop.permute.xlu0 %1038 }
 0x1bc   :  { %1072 = vst.msk [vmem:[#allocation2 + $0x9] sm:$0x1] %vm94_vm11, %v3157_v17 }
 0x1bd   :  { %1041 = vst.msk [vmem:[#allocation2 + $0x1] sm:$0x1] %vm57_vm5, %v1039_v18  ;;  %1253 = vrot.lane.b32.xlu1 %v1860_v15, %s3551_s17  ;;  %v25_v15 = vld [vmem:[%s3574_s13 + $0x8] sm:$0xff] }
 0x1be   :  { %1222 = vrot.lane.b32.xlu0 %v1855_v16, %s3568_s4 }
 0x1bf   :  { %v3170_v21 = vpop.permute.xlu1 %1153  ;;  %v1124_v22 = vpop.permute.xlu0 %1123 }
 0x1c0   :  { %1157 = vst.msk [vmem:[#allocation2 + $0xa] sm:$0x1] %vm94_vm11, %v3170_v21 }
 0x1c1   :  { %1126 = vst.msk [vmem:[#allocation2 + $0x2] sm:$0x1] %vm57_vm5, %v1124_v22  ;;  %1338 = vrot.lane.b32.xlu1 %v1874_v19, %s3536_s11  ;;  %v2038_v19 = vmov 0   ;;  %v27_v22 = vld [vmem:[%s3574_s13 + $0x18] sm:$0xff] }
 0x1c2   :  { %1307 = vrot.lane.b32.xlu0 %v1869_v20, %s3569_s6  ;;  %1978 = vset.pattern.permute.xlu1 %v2038_v19  ;;  %v26_v20 = vld [vmem:[%s3574_s13 + $0x10] sm:$0xff] }
 0x1c3   :  { %v3183_v25 = vpop.permute.xlu1 %1234  ;;  %v1205_v26 = vpop.permute.xlu0 %1204  ;;  %1977 = vset.pattern.permute.xlu0 %v2038_v19 }
 0x1c4   :  { %1238 = vst.msk [vmem:[#allocation2 + $0xb] sm:$0x1] %vm94_vm11, %v3183_v25 }
 0x1c5   :  { %1207 = vst.msk [vmem:[#allocation2 + $0x3] sm:$0x1] %vm57_vm5, %v1205_v26  ;;  %1423 = vrot.lane.b32.xlu1 %v1888_v23, %s3543_s24 }
 0x1c6   :  { %1392 = vrot.lane.b32.xlu0 %v1883_v24, %s3538_s28  ;;  %s1791_s28 = sshll.u32 %s2039_s14, 4  ;;  %s1792_s28 = int_to_ptr.vmem [resolvable:$true] %s1791_s28 }
 0x1c7   :  { %v3196_v29 = vpop.permute.xlu1 %1319  ;;  %v1290_v30 = vpop.permute.xlu0 %1289  ;;  %s1979_s24 = scalar_lea.vmem %s1792_s28, 2048  ;;  %p1984_p1 = scmp.lt.s32.totalorder %s1792_s28, %s1792_s28 }
 0x1c8   :  { %1323 = vst.msk [vmem:[#allocation2 + $0xc] sm:$0x1] %vm94_vm11, %v3196_v29  ;;  %p1980_p0 = scmp.ne.s32.totalorder %s1792_s28, %s1979_s24  ;;  %p1985_p2 = scmp.lt.s32.totalorder %s1979_s24, %s1979_s24 }
 0x1c9   :  { %1292 = vst.msk [vmem:[#allocation2 + $0x4] sm:$0x1] %vm57_vm5, %v1290_v30  ;;  %1504 = vrot.lane.b32.xlu1 %v1902_v27, %s3551_s17 }
 0x1ca   :  { %1473 = vrot.lane.b32.xlu0 %v1897_v28, %s3568_s4  ;;  %p1986_p3 = por %p1985_p2, %p1984_p1 }
 0x1cb   :  { %v3209_v33 = vpop.permute.xlu1 %1404  ;;  %v1375_v34 = vpop.permute.xlu0 %1374 }
 0x1cc   :  { %1408 = vst.msk [vmem:[#allocation2 + $0xd] sm:$0x1] %vm94_vm11, %v3209_v33  ;;  %p1987_p4 = pnand %p1986_p3, %p1980_p0 }
 0x1cd   :  { %1377 = vst.msk [vmem:[#allocation2 + $0x5] sm:$0x1] %vm57_vm5, %v1375_v34  ;;  %1589 = vrot.lane.b32.xlu1 %v1916_v31, %s3536_s11  ;;  %s3570_s11 = smov 112  }
 0x1ce   :  { %1558 = vrot.lane.b32.xlu0 %v1911_v32, %s3569_s6 }
 0x1cf   :  { %v3222_v37 = vpop.permute.xlu1 %1485  ;;  %v1456_v38 = vpop.permute.xlu0 %1455 }
 0x1d0   :  { %1489 = vst.msk [vmem:[#allocation2 + $0xe] sm:$0x1] %vm94_vm11, %v3222_v37 }
 0x1d1   :  { %1458 = vst.msk [vmem:[#allocation2 + $0x6] sm:$0x1] %vm57_vm5, %v1456_v38  ;;  %1008 = vrot.lane.b32.xlu1 %v1819_v35, %s3554_s9 }
 0x1d2   :  { %977 = vrot.lane.b32.xlu0 %v1814_v36, %s3570_s11 }
 0x1d3   :  { %v3235_v41 = vpop.permute.xlu1 %1570  ;;  %v1541_v42 = vpop.permute.xlu0 %1540 }
 0x1d4   :  { %1574 = vst.msk [vmem:[#allocation2 + $0xf] sm:$0x1] %vm94_vm11, %v3235_v41 }
 0x1d5   :  { %1543 = vst.msk [vmem:[#allocation2 + $0x7] sm:$0x1] %vm57_vm5, %v1541_v42  ;;  %1093 = vrot.lane.b32.xlu1 %v1833_v39, %s3571_s29 }
 0x1d6   :  { %1062 = vrot.lane.b32.xlu0 %v1828_v40, %s3572_s20 }
 0x1d7   :  { %v1669_v45 = vpop.permute.xlu1 %1668  ;;  %v1638_v46 = vpop.permute.xlu0 %1637 }
 0x1d8   :  { %1671 = vst.msk [vmem:[#allocation2 + $0x18] sm:$0x1] %vm108_vm13, %v1669_v45 }
 0x1d9   :  { %1640 = vst.msk [vmem:[#allocation2 + $0x10] sm:$0x1] %vm71_vm7, %v1638_v46  ;;  %1178 = vrot.lane.b32.xlu1 %v1847_v43, %s3559_s16 }
 0x1da   :  { %1147 = vrot.lane.b32.xlu0 %v1842_v44, %s3541_s21 }
 0x1db   :  { %v991_v49 = vpop.permute.xlu1 %990  ;;  %v960_v50 = vpop.permute.xlu0 %959 }
 0x1dc   :  { %993 = vst.msk [vmem:[#allocation2 + $0x8] sm:$0x1] %vm101_vm12, %v991_v49 }
 0x1dd   :  { %962 = vst.msk [vmem:[#allocation2] sm:$0x1] %vm64_vm6, %v960_v50  ;;  %1259 = vrot.lane.b32.xlu1 %v1861_v47, %s3554_s9 }
 0x1de   :  { %1228 = vrot.lane.b32.xlu0 %v1856_v48, %s3570_s11 }
 0x1df   :  { %v1076_v54 = vpop.permute.xlu1 %1075  ;;  %v1045_v55 = vpop.permute.xlu0 %1044 }
 0x1e0   :  { %1078 = vst.msk [vmem:[#allocation2 + $0x9] sm:$0x1] %vm101_vm12, %v1076_v54 }
 0x1e1   :  { %1047 = vst.msk [vmem:[#allocation2 + $0x1] sm:$0x1] %vm64_vm6, %v1045_v55  ;;  %1344 = vrot.lane.b32.xlu1 %v1875_v51, %s3571_s29 }
 0x1e2   :  { %1313 = vrot.lane.b32.xlu0 %v1870_v53, %s3572_s20 }
 0x1e3   :  { %v1161_v59 = vpop.permute.xlu1 %1160 }
 0x1e4   :  { %v1130_v60 = vpop.permute.xlu0 %1129  ;;  %1163 = vst.msk [vmem:[#allocation2 + $0xa] sm:$0x1] %vm101_vm12, %v1161_v59 }
 0x1e5   :  { %1132 = vst.msk [vmem:[#allocation2 + $0x2] sm:$0x1] %vm64_vm6, %v1130_v60  ;;  %1429 = vrot.lane.b32.xlu1 %v1889_v57, %s3559_s16 }
 0x1e6   :  { %1398 = vrot.lane.b32.xlu0 %v1884_v58, %s3541_s21 }
 0x1e7   :  { %v1242_v63 = vpop.permute.xlu1 %1241 }
 0x1e8   :  { %v1211_v0 = vpop.permute.xlu0 %1210  ;;  %1244 = vst.msk [vmem:[#allocation2 + $0xb] sm:$0x1] %vm101_vm12, %v1242_v63 }
 0x1e9   :  { %1213 = vst.msk [vmem:[#allocation2 + $0x3] sm:$0x1] %vm64_vm6, %v1211_v0  ;;  %1510 = vrot.lane.b32.xlu1 %v1903_v61, %s3554_s9 }
 0x1ea   :  { %1479 = vrot.lane.b32.xlu0 %v1898_v62, %s3570_s11 }
 0x1eb   :  { %v1327_v4 = vpop.permute.xlu1 %1326 }
 0x1ec   :  { %v1296_v5 = vpop.permute.xlu0 %1295  ;;  %1329 = vst.msk [vmem:[#allocation2 + $0xc] sm:$0x1] %vm101_vm12, %v1327_v4 }
 0x1ed   :  { %1298 = vst.msk [vmem:[#allocation2 + $0x4] sm:$0x1] %vm64_vm6, %v1296_v5  ;;  %1595 = vrot.lane.b32.xlu1 %v1917_v2, %s3571_s29 }
 0x1ee   :  { %1564 = vrot.lane.b32.xlu0 %v1912_v3, %s3572_s20 }
 0x1ef   :  { %v1412_v7 = vpop.permute.xlu1 %1411 }
 0x1f0   :  { %v1381_v8 = vpop.permute.xlu0 %1380  ;;  %1414 = vst.msk [vmem:[#allocation2 + $0xd] sm:$0x1] %vm101_vm12, %v1412_v7 }
 0x1f1   :  { %1383 = vst.msk [vmem:[#allocation2 + $0x5] sm:$0x1] %vm64_vm6, %v1381_v8  ;;  %807 = vperm.xlu1 %1978, %v25_v15  }
 0x1f2   :  { %802 = vperm.xlu0 %1977, %v24_v13  }
 0x1f3   :  { %v1493_v10 = vpop.permute.xlu1 %1492 }
 0x1f4   :  { %v1462_v11 = vpop.permute.xlu0 %1461  ;;  %1495 = vst.msk [vmem:[#allocation2 + $0xe] sm:$0x1] %vm101_vm12, %v1493_v10 }
 0x1f5   :  { %1464 = vst.msk [vmem:[#allocation2 + $0x6] sm:$0x1] %vm64_vm6, %v1462_v11  ;;  %812 = vperm.xlu1 %1978, %v26_v20  }
 0x1f6   :  { %817 = vperm.xlu0 %1977, %v27_v22  }
 0x1f7   :  { %v1578_v16 = vpop.permute.xlu1 %1577 }
 0x1f8   :  { %v1547_v18 = vpop.permute.xlu0 %1546  ;;  %1580 = vst.msk [vmem:[#allocation2 + $0xf] sm:$0x1] %vm101_vm12, %v1578_v16 }
 0x1f9   :  { %1549 = vst.msk [vmem:[#allocation2 + $0x7] sm:$0x1] %vm64_vm6, %v1547_v18 }
 0x1fb   :  { %v1675_v23 = vpop.permute.xlu1 %1674 }
 0x1fc   :  { %v1644_v24 = vpop.permute.xlu0 %1643  ;;  %1677 = vst.msk [vmem:[#allocation2 + $0x18] sm:$0x1] %vm115_vm14, %v1675_v23 }
 0x1fd   :  { %1646 = vst.msk [vmem:[#allocation2 + $0x10] sm:$0x1] %vm78_vm8, %v1644_v24 }
 0x1ff   :  { %v997_v26 = vpop.permute.xlu1 %996 }
 0x200   :  { %v966_v27 = vpop.permute.xlu0 %965  ;;  %999 = vst.msk [vmem:[#allocation2 + $0x8] sm:$0x1] %vm108_vm13, %v997_v26 }
 0x201   :  { %968 = vst.msk [vmem:[#allocation2] sm:$0x1] %vm71_vm7, %v966_v27 }
 0x203   :  { %v1082_v28 = vpop.permute.xlu1 %1081 }
 0x204   :  { %v1051_v30 = vpop.permute.xlu0 %1050  ;;  %1084 = vst.msk [vmem:[#allocation2 + $0x9] sm:$0x1] %vm108_vm13, %v1082_v28 }
 0x205   :  { %1053 = vst.msk [vmem:[#allocation2 + $0x1] sm:$0x1] %vm71_vm7, %v1051_v30 }
 0x207   :  { %v1167_v31 = vpop.permute.xlu1 %1166 }
 0x208   :  { %v1136_v32 = vpop.permute.xlu0 %1135  ;;  %1169 = vst.msk [vmem:[#allocation2 + $0xa] sm:$0x1] %vm108_vm13, %v1167_v31 }
 0x209   :  { %1138 = vst.msk [vmem:[#allocation2 + $0x2] sm:$0x1] %vm71_vm7, %v1136_v32 }
 0x20b   :  { %v1248_v34 = vpop.permute.xlu1 %1247 }
 0x20c   :  { %v1217_v35 = vpop.permute.xlu0 %1216  ;;  %1250 = vst.msk [vmem:[#allocation2 + $0xb] sm:$0x1] %vm108_vm13, %v1248_v34 }
 0x20d   :  { %1219 = vst.msk [vmem:[#allocation2 + $0x3] sm:$0x1] %vm71_vm7, %v1217_v35 }
 0x20f   :  { %v1333_v36 = vpop.permute.xlu1 %1332 }
 0x210   :  { %v1302_v38 = vpop.permute.xlu0 %1301  ;;  %1335 = vst.msk [vmem:[#allocation2 + $0xc] sm:$0x1] %vm108_vm13, %v1333_v36 }
 0x211   :  { %1304 = vst.msk [vmem:[#allocation2 + $0x4] sm:$0x1] %vm71_vm7, %v1302_v38 }
 0x213   :  { %v1418_v39 = vpop.permute.xlu1 %1417 }
 0x214   :  { %v1387_v40 = vpop.permute.xlu0 %1386  ;;  %1420 = vst.msk [vmem:[#allocation2 + $0xd] sm:$0x1] %vm108_vm13, %v1418_v39 }
 0x215   :  { %1389 = vst.msk [vmem:[#allocation2 + $0x5] sm:$0x1] %vm71_vm7, %v1387_v40 }
 0x217   :  { %v1499_v42 = vpop.permute.xlu1 %1498 }
 0x218   :  { %v1468_v43 = vpop.permute.xlu0 %1467  ;;  %1501 = vst.msk [vmem:[#allocation2 + $0xe] sm:$0x1] %vm108_vm13, %v1499_v42 }
 0x219   :  { %1470 = vst.msk [vmem:[#allocation2 + $0x6] sm:$0x1] %vm71_vm7, %v1468_v43 }
 0x21b   :  { %v1584_v44 = vpop.permute.xlu1 %1583 }
 0x21c   :  { %v1553_v45 = vpop.permute.xlu0 %1552  ;;  %1586 = vst.msk [vmem:[#allocation2 + $0xf] sm:$0x1] %vm108_vm13, %v1584_v44 }
 0x21d   :  { %1555 = vst.msk [vmem:[#allocation2 + $0x7] sm:$0x1] %vm71_vm7, %v1553_v45 }
 0x21f   :  { %v1681_v46 = vpop.permute.xlu1 %1680 }
 0x220   :  { %v1650_v47 = vpop.permute.xlu0 %1649  ;;  %1683 = vst.msk [vmem:[#allocation2 + $0x18] sm:$0x1] %vm122_vm15, %v1681_v46 }
 0x221   :  { %1652 = vst.msk [vmem:[#allocation2 + $0x10] sm:$0x1] %vm85_vm9, %v1650_v47 }
 0x222   :  { %1658 = vst.msk [vmem:[#allocation2 + $0x10] sm:$0x1] %vm92_vm10, %v3081_v52 }
 0x223   :  { %v1003_v48 = vpop.permute.xlu1 %1002 }
 0x224   :  { %v972_v49 = vpop.permute.xlu0 %971  ;;  %1005 = vst.msk [vmem:[#allocation2 + $0x8] sm:$0x1] %vm115_vm14, %v1003_v48 }
 0x225   :  { %974 = vst.msk [vmem:[#allocation2] sm:$0x1] %vm78_vm8, %v972_v49 }
 0x227   :  { %v1088_v50 = vpop.permute.xlu1 %1087  ;;  %v1687_v53 = vld [vmem:[#allocation2 + $0x18] sm:$0xff] }
 0x228   :  { %v1057_v51 = vpop.permute.xlu0 %1056  ;;  %1090 = vst.msk [vmem:[#allocation2 + $0x9] sm:$0x1] %vm115_vm14, %v1088_v50  ;;  %1716 = vmatprep.subr.mxu1 %v1687_v53 }
 0x229   :  { %1059 = vst.msk [vmem:[#allocation2 + $0x1] sm:$0x1] %vm78_vm8, %v1057_v51  ;;  %v1686_v54 = vld [vmem:[#allocation2 + $0x10] sm:$0xff] }
 0x22a   :  { %1717 = vmatpush1.msra.mxu1 %v1686_v54 }
 0x22b   :  { %v1173_v55 = vpop.permute.xlu1 %1172 }
 0x22c   :  { %v1142_v57 = vpop.permute.xlu0 %1141  ;;  %1175 = vst.msk [vmem:[#allocation2 + $0xa] sm:$0x1] %vm115_vm14, %v1173_v55 }
 0x22d   :  { %1144 = vst.msk [vmem:[#allocation2 + $0x2] sm:$0x1] %vm78_vm8, %v1142_v57 }
 0x22f   :  { %v1254_v52 = vpop.permute.xlu1 %1253 }
 0x230   :  { %v1223_v58 = vpop.permute.xlu0 %1222  ;;  %1256 = vst.msk [vmem:[#allocation2 + $0xb] sm:$0x1] %vm115_vm14, %v1254_v52 }
 0x231   :  { %1225 = vst.msk [vmem:[#allocation2 + $0x3] sm:$0x1] %vm78_vm8, %v1223_v58 }
 0x233   :  { %v1339_v59 = vpop.permute.xlu1 %1338 }
 0x234   :  { %v1308_v60 = vpop.permute.xlu0 %1307  ;;  %1341 = vst.msk [vmem:[#allocation2 + $0xc] sm:$0x1] %vm115_vm14, %v1339_v59 }
 0x235   :  { %1310 = vst.msk [vmem:[#allocation2 + $0x4] sm:$0x1] %vm78_vm8, %v1308_v60 }
 0x237   :  { %v1424_v61 = vpop.permute.xlu1 %1423 }
 0x238   :  { %v1393_v62 = vpop.permute.xlu0 %1392  ;;  %1426 = vst.msk [vmem:[#allocation2 + $0xd] sm:$0x1] %vm115_vm14, %v1424_v61 }
 0x239   :  { %1395 = vst.msk [vmem:[#allocation2 + $0x5] sm:$0x1] %vm78_vm8, %v1393_v62 }
 0x23b   :  { %v1505_v63 = vpop.permute.xlu1 %1504 }
 0x23c   :  { %v1474_v0 = vpop.permute.xlu0 %1473  ;;  %1507 = vst.msk [vmem:[#allocation2 + $0xe] sm:$0x1] %vm115_vm14, %v1505_v63 }
 0x23d   :  { %1476 = vst.msk [vmem:[#allocation2 + $0x6] sm:$0x1] %vm78_vm8, %v1474_v0 }
 0x23f   :  { %v1590_v2 = vpop.permute.xlu1 %1589 }
 0x240   :  { %v1559_v3 = vpop.permute.xlu0 %1558  ;;  %1592 = vst.msk [vmem:[#allocation2 + $0xf] sm:$0x1] %vm115_vm14, %v1590_v2 }
 0x241   :  { %1561 = vst.msk [vmem:[#allocation2 + $0x7] sm:$0x1] %vm78_vm8, %v1559_v3 }
 0x243   :  { %v1009_v4 = vpop.permute.xlu1 %1008 }
 0x244   :  { %v978_v5 = vpop.permute.xlu0 %977  ;;  %1011 = vst.msk [vmem:[#allocation2 + $0x8] sm:$0x1] %vm122_vm15, %v1009_v4 }
 0x245   :  { %980 = vst.msk [vmem:[#allocation2] sm:$0x1] %vm85_vm9, %v978_v5 }
 0x246   :  { %986 = vst.msk [vmem:[#allocation2] sm:$0x1] %vm92_vm10, %v3144_v12 }
 0x247   :  { %v1094_v7 = vpop.permute.xlu1 %1093 }
 0x248   :  { %v1063_v8 = vpop.permute.xlu0 %1062  ;;  %1096 = vst.msk [vmem:[#allocation2 + $0x9] sm:$0x1] %vm122_vm15, %v1094_v7 }
 0x249   :  { %1065 = vst.msk [vmem:[#allocation2 + $0x1] sm:$0x1] %vm85_vm9, %v1063_v8 }
 0x24a   :  { %1071 = vst.msk [vmem:[#allocation2 + $0x1] sm:$0x1] %vm92_vm10, %v3157_v17 }
 0x24b   :  { %v1179_v10 = vpop.permute.xlu1 %1178 }
 0x24c   :  { %v1148_v11 = vpop.permute.xlu0 %1147  ;;  %1181 = vst.msk [vmem:[#allocation2 + $0xa] sm:$0x1] %vm122_vm15, %v1179_v10 }
 0x24d   :  { %1150 = vst.msk [vmem:[#allocation2 + $0x2] sm:$0x1] %vm85_vm9, %v1148_v11 }
 0x24e   :  { %1156 = vst.msk [vmem:[#allocation2 + $0x2] sm:$0x1] %vm92_vm10, %v3170_v21 }
 0x24f   :  { %v1260_v13 = vpop.permute.xlu1 %1259 }
 0x250   :  { %v1229_v12 = vpop.permute.xlu0 %1228  ;;  %1262 = vst.msk [vmem:[#allocation2 + $0xb] sm:$0x1] %vm122_vm15, %v1260_v13 }
 0x251   :  { %1231 = vst.msk [vmem:[#allocation2 + $0x3] sm:$0x1] %vm85_vm9, %v1229_v12 }
 0x252   :  { %1237 = vst.msk [vmem:[#allocation2 + $0x3] sm:$0x1] %vm92_vm10, %v3183_v25 }
 0x253   :  { %v1345_v15 = vpop.permute.xlu1 %1344 }
 0x254   :  { %v1314_v17 = vpop.permute.xlu0 %1313  ;;  %1347 = vst.msk [vmem:[#allocation2 + $0xc] sm:$0x1] %vm122_vm15, %v1345_v15 }
 0x255   :  { %1316 = vst.msk [vmem:[#allocation2 + $0x4] sm:$0x1] %vm85_vm9, %v1314_v17 }
 0x256   :  { %1322 = vst.msk [vmem:[#allocation2 + $0x4] sm:$0x1] %vm92_vm10, %v3196_v29 }
 0x257   :  { %v1430_v16 = vpop.permute.xlu1 %1429 }
 0x258   :  { %v1399_v21 = vpop.permute.xlu0 %1398  ;;  %1432 = vst.msk [vmem:[#allocation2 + $0xd] sm:$0x1] %vm122_vm15, %v1430_v16 }
 0x259   :  { %1401 = vst.msk [vmem:[#allocation2 + $0x5] sm:$0x1] %vm85_vm9, %v1399_v21 }
 0x25a   :  { %1407 = vst.msk [vmem:[#allocation2 + $0x5] sm:$0x1] %vm92_vm10, %v3209_v33 }
 0x25b   :  { %v1511_v18 = vpop.permute.xlu1 %1510 }
 0x25c   :  { %v1480_v25 = vpop.permute.xlu0 %1479  ;;  %1513 = vst.msk [vmem:[#allocation2 + $0xe] sm:$0x1] %vm122_vm15, %v1511_v18 }
 0x25d   :  { %1482 = vst.msk [vmem:[#allocation2 + $0x6] sm:$0x1] %vm85_vm9, %v1480_v25 }
 0x25e   :  { %1488 = vst.msk [vmem:[#allocation2 + $0x6] sm:$0x1] %vm92_vm10, %v3222_v37 }
 0x25f   :  { %v1596_v19 = vpop.permute.xlu1 %1595 }
 0x260   :  { %v1565_v29 = vpop.permute.xlu0 %1564  ;;  %1598 = vst.msk [vmem:[#allocation2 + $0xf] sm:$0x1] %vm122_vm15, %v1596_v19 }
 0x261   :  { %1567 = vst.msk [vmem:[#allocation2 + $0x7] sm:$0x1] %vm85_vm9, %v1565_v29 }
 0x262   :  { %1573 = vst.msk [vmem:[#allocation2 + $0x7] sm:$0x1] %vm92_vm10, %v3235_v41 }
 0x265   :  { %v899_v41 = vpop.f32.mrf.mxu0 }
 0x267   :  { %v1685_v20 = vld [vmem:[#allocation2 + $0x8] sm:$0xff]  ;;  %v901_v23 = vpop.f32.mrf.mxu0 }
 0x268   :  { %1718 = vmatprep.subr.mxu1 %v1685_v20 }
 0x269   :  { %v1684_v33 = vld [vmem:[#allocation2] sm:$0xff] }
 0x26a   :  { %1719 = vmatpush1.msra.mxu1 %v1684_v33 }
 0x26b   :  { %1932 = vmatmul.mubr.msk.f32.vlgmr.msra.gmra.mxu1 %vm820_vm0, %v3275_v56 }
 0x26c   :  { %1758 = vmatprep.mubr.f32.mxu1 %v2013_v14  ;;  %v808_v26 = vpop.permute.xlu1 %807 }
 0x26d   :  { %v803_v37 = vpop.permute.xlu0 %802  ;;  %v905_v24 = vpop.f32.mrf.mxu0 }
 0x26e   :  { %v900_v22 = vadd.f32 %v899_v41, %v803_v37  ;;  %v902_v56 = vadd.f32 %v901_v23, %v803_v37  ;;  %v906_v28 = vadd.f32 %v905_v24, %v808_v26 }
 0x26f   :  { %1933 = vmatmul.mubr.msk.f32.gmra.mxu1 %vm820_vm0, %v3303_v1  ;;  %v907_v1 = vpop.f32.mrf.mxu0 }
 0x270   :  { %1764 = vmatprep.mubr.f32.mxu1 %v2013_v14  ;;  %922 = vst [vmem:[#allocation3] sm:$0xff] %v900_v22  ;;  %923 = vst.msk [vmem:[#allocation3 + $0x8] sm:$0xff] %vm16_vm1, %v902_v56  ;;  %v908_v30 = vadd.f32 %v907_v1, %v808_v26 }
 0x271   :  { %924 = vst [vmem:[#allocation3 + $0x10] sm:$0xff] %v906_v28  ;;  %v818_v34 = vpop.permute.xlu0 %817 }
 0x272   :  { %925 = vst.msk [vmem:[#allocation3 + $0x18] sm:$0xff] %vm16_vm1, %v908_v30 }
 0x273   :  { %1934 = vmatmul.mubr.msk.f32.gmra.mxu1 %vm820_vm0, %v3317_v6 }
 0x274   :  { %1770 = vmatprep.mubr.f32.mxu1 %v2013_v14  ;;  %v813_v14 = vpop.permute.xlu1 %812 }
 0x276   :  { %v911_v27 = vpop.f32.mrf.mxu0 }
 0x277   :  { %1935 = vmatmul.mubr.msk.f32.gmra.mxu1 %vm820_vm0, %v3329_v9  ;;  %v912_v31 = vadd.f32 %v911_v27, %v813_v14 }
 0x278   :  { %v913_v6 = vpop.f32.mrf.mxu0 }
 0x279   :  { %v914_v32 = vadd.f32 %v913_v6, %v813_v14  ;;  %926 = vst [vmem:[#allocation3 + $0x20] sm:$0xff] %v912_v31 }
 0x27a   :  { %v917_v9 = vpop.f32.mrf.mxu0 }
 0x27b   :  { %927 = vst.msk [vmem:[#allocation3 + $0x28] sm:$0xff] %vm16_vm1, %v914_v32  ;;  %v918_v36 = vadd.f32 %v917_v9, %v818_v34 }
 0x27c   :  { %v919_v35 = vpop.f32.mrf.mxu0 }
 0x27d   :  { %v920_v38 = vadd.f32 %v919_v35, %v818_v34  ;;  %928 = vst [vmem:[#allocation3 + $0x30] sm:$0xff] %v918_v36 }
 0x27f   :  { %929 = vst.msk [vmem:[#allocation3 + $0x38] sm:$0xff] %vm16_vm1, %v920_v38 }
 0x32b   :  { %v1754_v39 = vpop.f32.mrf.mxu1 }
 0x32c   :  { %v1755_v40 = vadd.f32 %v1754_v39, %v803_v37 }
 0x32d   :  { %v1756_v42 = vpop.f32.mrf.mxu1 }
 0x32e   :  { %1778 = vst [vmem:[#allocation3 + $0x40] sm:$0xff] %v1755_v40  ;;  %v1757_v43 = vadd.f32 %v1756_v42, %v803_v37 }
 0x32f   :  { %v1760_v44 = vpop.f32.mrf.mxu1 }
 0x330   :  { %1779 = vst.msk [vmem:[#allocation3 + $0x48] sm:$0xff] %vm16_vm1, %v1757_v43  ;;  %v1761_v45 = vadd.f32 %v1760_v44, %v808_v26 }
 0x331   :  { %v1762_v46 = vpop.f32.mrf.mxu1 }
 0x332   :  { %1780 = vst [vmem:[#allocation3 + $0x50] sm:$0xff] %v1761_v45  ;;  %v1763_v47 = vadd.f32 %v1762_v46, %v808_v26 }
 0x333   :  { %v1766_v48 = vpop.f32.mrf.mxu1 }
 0x334   :  { %1781 = vst.msk [vmem:[#allocation3 + $0x58] sm:$0xff] %vm16_vm1, %v1763_v47  ;;  %v1767_v49 = vadd.f32 %v1766_v48, %v813_v14 }
 0x335   :  { %v1768_v50 = vpop.f32.mrf.mxu1 }
 0x336   :  { %1782 = vst [vmem:[#allocation3 + $0x60] sm:$0xff] %v1767_v49  ;;  %v1769_v51 = vadd.f32 %v1768_v50, %v813_v14 }
 0x337   :  { %v1772_v53 = vpop.f32.mrf.mxu1 }
 0x338   :  { %1783 = vst.msk [vmem:[#allocation3 + $0x68] sm:$0xff] %vm16_vm1, %v1769_v51  ;;  %v1773_v54 = vadd.f32 %v1772_v53, %v818_v34 }
 0x339   :  { %v1774_v55 = vpop.f32.mrf.mxu1 }
 0x33a   :  { %1784 = vst [vmem:[#allocation3 + $0x70] sm:$0xff] %v1773_v54  ;;  %v1775_v57 = vadd.f32 %v1774_v55, %v818_v34 }
 0x33c   :  { %1785 = vst.msk [vmem:[#allocation3 + $0x78] sm:$0xff] %vm16_vm1, %v1775_v57 }
 0x33d   :  { %1990 = shalt.err (!%p1987_p4)
}
 0x33e   :  { %s2040_s15 = smov 256   ;;  %s2041_s12 = smov 16  }
 0x33f   :  { %s3575_s2 = sld [smem:[#allocation8_spill]] }
 0x345   :  { %1797 = dma.vmem_to_hbm [thread:$0]  %s1792_s28, 2048, %s3575_s2, [#allocation4], %s2040_s15, %s2040_s15, %s2041_s12  }
 0x346   :  { %1999 = dma.done.wait [#allocation4], 2048  }
 0x347   :  { %2000 = vsyncadd [#allocation4], 4294965248 }
 0x348   :  { %1801 = vsyncpa [#allocation4], 1 }

</bundles_post_ra>
